<compile_context>
chip_gen: v7x
topology: tpu7x:2x2x1
jax: 0.10.0
libtpu: 0.0.40
codegen_flags: <defaults>
</compile_context>

<pallas_src>
import functools

import jax
import jax.numpy as jnp
from jax.experimental import pallas as pl
from jax.experimental.pallas import tpu as pltpu

_MM_DTYPE = jnp.bfloat16          # MXU operand dtype for feed-forward matmuls
_VMEM_LIMIT = 48 * 1024 * 1024    # safe on v5e/v6e (128 MiB) and v7x (64 MiB)


def _mm_params():
    return pltpu.CompilerParams(dimension_semantics=("parallel",),
                                vmem_limit_bytes=_VMEM_LIMIT)


def _mxu(act, w):
    # activations are cast in-kernel; weights are pre-cast to bf16 at prep time
    return jnp.dot(act.astype(_MM_DTYPE), w, preferred_element_type=jnp.float32)


# ----------------------------- Pallas kernels ------------------------------

def _linear_kernel(x_ref, w_ref, b_ref, o_ref, *, relu_in, relu_out):
    x = x_ref[...]
    if relu_in:
        x = jnp.maximum(x, 0.0)
    y = _mxu(x, w_ref[...]) + b_ref[...]
    if relu_out:
        y = jnp.maximum(y, 0.0)
    o_ref[...] = y


def _gru_gates1_kernel(x_ref, wf_ref, wb_ref, bf_ref, bb_ref, gf_ref, gb_ref):
    """GRUBlock input gates, layer 0 (single H-wide input), ReLU fused in."""
    x = jnp.maximum(x_ref[...], 0.0)
    gf_ref[...] = _mxu(x, wf_ref[...]) + bf_ref[...]
    gb_ref[...] = _mxu(x, wb_ref[...]) + bb_ref[...]


def _gru_gates2_kernel(xa_ref, xb_ref, wfa_ref, wfb_ref, wba_ref, wbb_ref,
                       bf_ref, bb_ref, gf_ref, gb_ref):
    """GRUBlock input gates, layers 1/2 (inputs = prev fwd/bwd halves)."""
    xa = jnp.maximum(xa_ref[...], 0.0)
    xb = jnp.maximum(xb_ref[...], 0.0)
    gf_ref[...] = _mxu(xa, wfa_ref[...]) + _mxu(xb, wfb_ref[...]) + bf_ref[...]
    gb_ref[...] = _mxu(xa, wba_ref[...]) + _mxu(xb, wbb_ref[...]) + bb_ref[...]


def _classifier_kernel(xa_ref, xb_ref, w1a_ref, w1b_ref, b1_ref, w2_ref, b2_ref,
                       o_ref):
    # Linear -> ReLU -> Linear fused; hidden activation never leaves VMEM.
    h = _mxu(xa_ref[...], w1a_ref[...]) + _mxu(xb_ref[...], w1b_ref[...]) + b1_ref[...]
    h = jnp.maximum(h, 0.0)
    o_ref[...] = _mxu(h, w2_ref[...]) + b2_ref[...]


def _rescnn_kernel(x_ref, w1_ref, b1_ref, w2_ref, b2_ref, sc1_ref, sh1_ref,
                   o_ref):
    """Fused ResidualCNNBlock (eval mode) for one batch element.

    x_ref : (1, F, T, C) raw input slab (also the residual)
    w*_ref: (9, Cin, Cout) conv taps (bf16), tap index = kh*3 + kw
    b*_ref, sc1/sh1 : (1, 1, C)
    All intermediates (bn1+relu activation, conv1 output) stay in VMEM.
    """
    _, F, T, C = x_ref.shape
    x = x_ref[0]                                                 # (F, T, C)
    a = jnp.maximum(x * sc1_ref[...] + sh1_ref[...], 0.0)        # bn1 + relu

    def conv3x3(inp, w_ref, bias):
        cin = inp.shape[-1]
        cout = w_ref.shape[2]
        zt = jnp.zeros((F, 1, cin), jnp.float32)
        zf = jnp.zeros((1, T + 2, cin), jnp.float32)
        p = jnp.concatenate([zf, jnp.concatenate([zt, inp, zt], axis=1), zf],
                            axis=0)                              # (F+2, T+2, Cin)
        acc = jnp.zeros((F * T, cout), jnp.float32)
        for df in range(3):
            for dt in range(3):
                xs = p[df:df + F, dt:dt + T, :].reshape(F * T, cin)
                acc = acc + _mxu(xs, w_ref[df * 3 + dt])
        return acc.reshape(F, T, cout) + bias

    # conv1 with bn2+relu folded into its weights/bias
    y1 = jnp.maximum(conv3x3(a, w1_ref, b1_ref[...]), 0.0)
    # conv2 + residual add
    o_ref[0] = conv3x3(y1, w2_ref, b2_ref[...]) + x


def _bigru_chunk_kernel(gxf_ref, gxb_ref, whf_ref, whb_ref, bhf_ref, bhb_ref,
                        of_ref, ob_ref, hf_ref, hb_ref, *, hidden, chunk):
    """K timesteps of the fwd+bwd GRU recurrence per grid step.

    gxf_ref : (K, Bp, 3H) fwd input gates for this chunk (forward time order)
    gxb_ref : (K, Bp, 3H) bwd input gates, chunk picked in reversed order by
              the index_map; within the chunk we walk it back-to-front.
    whf/whb : (H, 3H) per-direction hidden weights (f32),  bhf/bhb : (1, 3H)
    hf/hb   : (Bp, H) persistent hidden-state scratch.
    """
    H = hidden

    @pl.when(pl.program_id(0) == 0)
    def _():
        hf_ref[...] = jnp.zeros(hf_ref.shape, hf_ref.dtype)
        hb_ref[...] = jnp.zeros(hb_ref.shape, hb_ref.dtype)

    whf = whf_ref[...]
    whb = whb_ref[...]
    bhf = bhf_ref[...]
    bhb = bhb_ref[...]
    hf = hf_ref[...]
    hb = hb_ref[...]

    def step(gx, h, whh, bhh):
        gh = jnp.dot(h, whh, preferred_element_type=jnp.float32) + bhh
        s = jax.nn.sigmoid(gx[:, :2 * H] + gh[:, :2 * H])   # r/z lanes only
        r = s[:, :H]
        z = s[:, H:]
        n = jnp.tanh(gx[:, 2 * H:] + r * gh[:, 2 * H:])
        return (1.0 - z) * n + z * h

    for k in range(chunk):
        hf = step(gxf_ref[k], hf, whf, bhf)                  # forward stream
        of_ref[k] = hf
        kb = chunk - 1 - k                                   # backward stream
        hb = step(gxb_ref[kb], hb, whb, bhb)
        ob_ref[kb] = hb

    hf_ref[...] = hf
    hb_ref[...] = hb


# ------------------------------ kernel wrappers -----------------------------

def pallas_linear(x, w, b, *, relu_in=False, relu_out=False, block_m=1024):
    M, K = x.shape
    N = w.shape[1]
    bm = min(M, block_m)
    kernel = functools.partial(_linear_kernel, relu_in=relu_in, relu_out=relu_out)
    return pl.pallas_call(
        kernel,
        out_shape=jax.ShapeDtypeStruct((M, N), jnp.float32),
        grid=(pl.cdiv(M, bm),),
        in_specs=[pl.BlockSpec((bm, K), lambda i: (i, 0)),
                  pl.BlockSpec((K, N), lambda i: (0, 0)),
                  pl.BlockSpec((1, N), lambda i: (0, 0))],
        out_specs=pl.BlockSpec((bm, N), lambda i: (i, 0)),
        compiler_params=_mm_params(),
    )(x, w, b.reshape(1, N))


def pallas_gru_gates1(x, wf, wb, bf, bb, *, block_m=1024):
    M, K = x.shape
    N = wf.shape[1]
    bm = min(M, block_m)
    return pl.pallas_call(
        _gru_gates1_kernel,
        out_shape=(jax.ShapeDtypeStruct((M, N), jnp.float32),
                   jax.ShapeDtypeStruct((M, N), jnp.float32)),
        grid=(pl.cdiv(M, bm),),
        in_specs=[pl.BlockSpec((bm, K), lambda i: (i, 0)),
                  pl.BlockSpec((K, N), lambda i: (0, 0)),
                  pl.BlockSpec((K, N), lambda i: (0, 0)),
                  pl.BlockSpec((1, N), lambda i: (0, 0)),
                  pl.BlockSpec((1, N), lambda i: (0, 0))],
        out_specs=(pl.BlockSpec((bm, N), lambda i: (i, 0)),
                   pl.BlockSpec((bm, N), lambda i: (i, 0))),
        compiler_params=_mm_params(),
    )(x, wf, wb, bf, bb)


def pallas_gru_gates2(xa, xb, wfa, wfb, wba, wbb, bf, bb, *, block_m=1024):
    M, K = xa.shape
    N = wfa.shape[1]
    bm = min(M, block_m)
    return pl.pallas_call(
        _gru_gates2_kernel,
        out_shape=(jax.ShapeDtypeStruct((M, N), jnp.float32),
                   jax.ShapeDtypeStruct((M, N), jnp.float32)),
        grid=(pl.cdiv(M, bm),),
        in_specs=[pl.BlockSpec((bm, K), lambda i: (i, 0)),
                  pl.BlockSpec((bm, K), lambda i: (i, 0)),
                  pl.BlockSpec((K, N), lambda i: (0, 0)),
                  pl.BlockSpec((K, N), lambda i: (0, 0)),
                  pl.BlockSpec((K, N), lambda i: (0, 0)),
                  pl.BlockSpec((K, N), lambda i: (0, 0)),
                  pl.BlockSpec((1, N), lambda i: (0, 0)),
                  pl.BlockSpec((1, N), lambda i: (0, 0))],
        out_specs=(pl.BlockSpec((bm, N), lambda i: (i, 0)),
                   pl.BlockSpec((bm, N), lambda i: (i, 0))),
        compiler_params=_mm_params(),
    )(xa, xb, wfa, wfb, wba, wbb, bf, bb)


def pallas_classifier(xa, xb, w1a, w1b, b1, w2, b2, *, block_m=1024):
    M, Ka = xa.shape
    Kb = xb.shape[1]
    Nh = w1a.shape[1]
    N2 = w2.shape[1]            # already padded to a multiple of 128
    bm = min(M, block_m)
    return pl.pallas_call(
        _classifier_kernel,
        out_shape=jax.ShapeDtypeStruct((M, N2), jnp.float32),
        grid=(pl.cdiv(M, bm),),
        in_specs=[pl.BlockSpec((bm, Ka), lambda i: (i, 0)),
                  pl.BlockSpec((bm, Kb), lambda i: (i, 0)),
                  pl.BlockSpec((Ka, Nh), lambda i: (0, 0)),
                  pl.BlockSpec((Kb, Nh), lambda i: (0, 0)),
                  pl.BlockSpec((1, Nh), lambda i: (0, 0)),
                  pl.BlockSpec((Nh, N2), lambda i: (0, 0)),
                  pl.BlockSpec((1, N2), lambda i: (0, 0))],
        out_specs=pl.BlockSpec((bm, N2), lambda i: (i, 0)),
        compiler_params=_mm_params(),
    )(xa, xb, w1a, w1b, b1.reshape(1, Nh), w2, b2.reshape(1, N2))


def pallas_rescnn(y, blk):
    """Fused ResidualCNNBlock; grid over batch, whole (F,T,C) slab in VMEM.

    TODO(synk): tile over F/T with halos for very long utterances so the slab
    plus scratch stays inside v7x's 64 MiB VMEM; also pack spatial positions
    into lanes so the C=32 stores become 128-lane dense.
    """
    B, F, T, C = y.shape
    return pl.pallas_call(
        _rescnn_kernel,
        out_shape=jax.ShapeDtypeStruct((B, F, T, C), jnp.float32),
        grid=(B,),
        in_specs=[pl.BlockSpec((1, F, T, C), lambda b: (b, 0, 0, 0)),
                  pl.BlockSpec((9, C, C), lambda b: (0, 0, 0)),
                  pl.BlockSpec((1, 1, C), lambda b: (0, 0, 0)),
                  pl.BlockSpec((9, C, C), lambda b: (0, 0, 0)),
                  pl.BlockSpec((1, 1, C), lambda b: (0, 0, 0)),
                  pl.BlockSpec((1, 1, C), lambda b: (0, 0, 0)),
                  pl.BlockSpec((1, 1, C), lambda b: (0, 0, 0))],
        out_specs=pl.BlockSpec((1, F, T, C), lambda b: (b, 0, 0, 0)),
        compiler_params=pltpu.CompilerParams(dimension_semantics=("parallel",),
                                             vmem_limit_bytes=_VMEM_LIMIT),
    )(y, blk['w1'], blk['b1'], blk['w2'], blk['b2'], blk['sc1'], blk['sh1'])


def _pick_chunk(T):
    for k in (32, 16, 8, 4, 2, 1):
        if T % k == 0:
            return k
    return 1


def bigru_recurrence(gxf, gxb, whh_f, whh_b, bhh_f, bhh_b, hidden):
    """Merged forward+backward GRU over time, chunked K steps per grid step.

    gxf/gxb : (T, Bp, 3H) per-direction input gates
    returns (of, ob) each (T, Bp, H), already at their original time positions
    (backward stream reversal is expressed in the index_map + in-chunk order).
    """
    T, Bp, _ = gxf.shape
    H = hidden
    K = _pick_chunk(T)
    Tc = T // K
    kernel = functools.partial(_bigru_chunk_kernel, hidden=H, chunk=K)
    of, ob = pl.pallas_call(
        kernel,
        out_shape=(jax.ShapeDtypeStruct((T, Bp, H), jnp.float32),
                   jax.ShapeDtypeStruct((T, Bp, H), jnp.float32)),
        grid=(Tc,),
        in_specs=[pl.BlockSpec((K, Bp, 3 * H), lambda c: (c, 0, 0)),
                  pl.BlockSpec((K, Bp, 3 * H), lambda c: (Tc - 1 - c, 0, 0)),
                  pl.BlockSpec((H, 3 * H), lambda c: (0, 0)),
                  pl.BlockSpec((H, 3 * H), lambda c: (0, 0)),
                  pl.BlockSpec((1, 3 * H), lambda c: (0, 0)),
                  pl.BlockSpec((1, 3 * H), lambda c: (0, 0))],
        out_specs=(pl.BlockSpec((K, Bp, H), lambda c: (c, 0, 0)),
                   pl.BlockSpec((K, Bp, H), lambda c: (Tc - 1 - c, 0, 0))),
        scratch_shapes=[pltpu.VMEM((Bp, H), jnp.float32),
                        pltpu.VMEM((Bp, H), jnp.float32)],
        compiler_params=pltpu.CompilerParams(dimension_semantics=("arbitrary",),
                                             vmem_limit_bytes=_VMEM_LIMIT),
        # TODO(synk): on v7x, split the two directions across the two
        # TensorCores (leading core-parallel grid axis of size 2).
    )(gxf, gxb, whh_f, whh_b, bhh_f, bhh_b)
    return of, ob


# ------------------------------- JAX glue -----------------------------------

def im2col_nhwc(x, kh, kw, stride, pad):
    # Only used for the tiny 1-channel stride-2 stem conv (9 columns total).
    # TODO(synk): fold the stem conv into a strided-slice in-kernel conv too.
    B, H, W, C = x.shape
    xp = jnp.pad(x, ((0, 0), (pad, pad), (pad, pad), (0, 0)))
    Ho = (H + 2 * pad - kh) // stride + 1
    Wo = (W + 2 * pad - kw) // stride + 1
    cols = []
    for i in range(kh):
        for j in range(kw):
            cols.append(xp[:, i:i + stride * Ho:stride, j:j + stride * Wo:stride, :])
    col = jnp.stack(cols, axis=3)                    # (B, Ho, Wo, kh*kw, C)
    return col.reshape(B * Ho * Wo, kh * kw * C), Ho, Wo


def conv_w_to_mat(w):
    """(Cout, Cin, kh, kw) -> (kh*kw*Cin, Cout), matching im2col column order."""
    Cout, Cin, kh, kw = w.shape
    return w.transpose(2, 3, 1, 0).reshape(kh * kw * Cin, Cout)


def conv_w_to_taps(w):
    """(Cout, Cin, 3, 3) -> (9, Cin, Cout), tap index = kh*3 + kw."""
    Cout, Cin, kh, kw = w.shape
    return w.transpose(2, 3, 1, 0).reshape(kh * kw, Cin, Cout)


def speech_recognition_forward(x, q, rnn_dim, n_classes):
    """x: (B, 1, F, T) NCHW float32 -> logits (B, T_out, n_classes)."""
    B = x.shape[0]
    H = rnn_dim
    C = 32

    # ---- CNN stem (stride 2, Cin=1) ----
    xh = jnp.transpose(x, (0, 2, 3, 1))                       # (B, F, T, 1)
    col, Fo, To = im2col_nhwc(xh, 3, 3, stride=2, pad=1)
    y = pallas_linear(col, q['conv0_w'], q['conv0_b'])        # (B*Fo*To, 32)
    y = y.reshape(B, Fo, To, C)

    # ---- fused ResidualCNN blocks (all intermediates stay in VMEM) ----
    for blk in q['res']:
        y = pallas_rescnn(y, blk)

    # ---- feature relayout + fc (weight rows pre-permuted to (f*C + c)) ----
    Bp = max(8, ((B + 7) // 8) * 8)                           # sublane-pad batch
    feat = y.transpose(2, 0, 1, 3).reshape(To, B, Fo * C)     # minor dims kept
    feat = jnp.pad(feat, ((0, 0), (0, Bp - B), (0, 0)))
    feat = pallas_linear(feat.reshape(To * Bp, Fo * C), q['fc_w'], q['fc_b'])

    # ---- BiGRU stack in (T, Bp, .) layout, per-direction gate streams ----
    g = q['gru'][0]
    gf, gb = pallas_gru_gates1(feat, g['wih_f'], g['wih_b'], g['bih_f'], g['bih_b'])
    of, ob = bigru_recurrence(gf.reshape(To, Bp, 3 * H), gb.reshape(To, Bp, 3 * H),
                              g['whh_f'], g['whh_b'], g['bhh_f'], g['bhh_b'], H)
    for g in q['gru'][1:]:
        gf, gb = pallas_gru_gates2(of.reshape(To * Bp, H), ob.reshape(To * Bp, H),
                                   g['wih_f_a'], g['wih_f_b'],
                                   g['wih_b_a'], g['wih_b_b'],
                                   g['bih_f'], g['bih_b'])
        of, ob = bigru_recurrence(gf.reshape(To, Bp, 3 * H), gb.reshape(To, Bp, 3 * H),
                                  g['whh_f'], g['whh_b'], g['bhh_f'], g['bhh_b'], H)

    # ---- fused classifier (lane-dense padded output) ----
    logits = pallas_classifier(of.reshape(To * Bp, H), ob.reshape(To * Bp, H),
                               q['cls_w1a'], q['cls_w1b'], q['cls_b1'],
                               q['cls_w2'], q['cls_b2'])
    n_pad = logits.shape[1]
    logits = logits.reshape(To, Bp, n_pad)[:, :B, :n_classes]
    return logits.transpose(1, 0, 2)


# ------------------------- parameter preparation ----------------------------

def prepare_params(p, rnn_dim, n_classes, n_cnn_features, eps=1e-5):
    """Convert PyTorch-layout parameters into kernel-friendly forms: BN folding,
    per-direction GRU weights, fc row permutation, bf16 pre-cast weights,
    padded classifier head."""
    H = rnn_dim
    C = 32
    Fo = n_cnn_features // 2
    q = {'conv0_w': conv_w_to_mat(p['cnn0_w']).astype(_MM_DTYPE),
         'conv0_b': p['cnn0_b'], 'res': [], 'gru': []}

    for blk in p['res']:
        scale1 = blk['bn1_gamma'] / jnp.sqrt(blk['bn1_var'] + eps)
        shift1 = blk['bn1_beta'] - blk['bn1_mean'] * scale1
        scale2 = blk['bn2_gamma'] / jnp.sqrt(blk['bn2_var'] + eps)
        shift2 = blk['bn2_beta'] - blk['bn2_mean'] * scale2
        w1 = conv_w_to_taps(blk['w1'])                  # (9, Cin, Cout)
        w2 = conv_w_to_taps(blk['w2'])
        q['res'].append({
            'sc1': scale1.reshape(1, 1, C), 'sh1': shift1.reshape(1, 1, C),
            # fold bn2 into conv1:  relu( conv1(a)*s2 + t2 )
            'w1': (w1 * scale2[None, None, :]).astype(_MM_DTYPE),
            'b1': (blk['b1'] * scale2 + shift2).reshape(1, 1, C),
            'w2': w2.astype(_MM_DTYPE),
            'b2': blk['b2'].reshape(1, 1, C),
        })

    # fc: PyTorch column order is (c*Fo + f); our relayout yields (f*C + c).
    wfc = p['fc_w'].reshape(H, C, Fo).transpose(2, 1, 0).reshape(Fo * C, H)
    q['fc_w'] = wfc.astype(_MM_DTYPE)
    q['fc_b'] = p['fc_b']

    for li, gp in enumerate(p['gru']):
        ent = {
            'whh_f': gp['w_hh_fwd'].T,                        # (H, 3H) f32
            'whh_b': gp['w_hh_bwd'].T,
            'bhh_f': gp['b_hh_fwd'].reshape(1, 3 * H),
            'bhh_b': gp['b_hh_bwd'].reshape(1, 3 * H),
            'bih_f': gp['b_ih_fwd'].reshape(1, 3 * H),
            'bih_b': gp['b_ih_bwd'].reshape(1, 3 * H),
        }
        wf = gp['w_ih_fwd'].T.astype(_MM_DTYPE)               # (in_dim, 3H)
        wb = gp['w_ih_bwd'].T.astype(_MM_DTYPE)
        if li == 0:
            ent['wih_f'] = wf
            ent['wih_b'] = wb
        else:                                                 # in_dim = 2H
            ent['wih_f_a'] = wf[:H]
            ent['wih_f_b'] = wf[H:]
            ent['wih_b_a'] = wb[:H]
            ent['wih_b_b'] = wb[H:]
        q['gru'].append(ent)

    w1t = p['cls1_w'].T                                       # (2H, H)
    q['cls_w1a'] = w1t[:H].astype(_MM_DTYPE)
    q['cls_w1b'] = w1t[H:].astype(_MM_DTYPE)
    q['cls_b1'] = p['cls1_b']
    n_pad = ((n_classes + 127) // 128) * 128                  # lane-dense output
    w2t = p['cls2_w'].T                                       # (H, n_classes)
    q['cls_w2'] = jnp.pad(w2t, ((0, 0), (0, n_pad - n_classes))).astype(_MM_DTYPE)
    q['cls_b2'] = jnp.pad(p['cls2_b'], (0, n_pad - n_classes))
    return q


# ------------------------- deterministic parameters --------------------------

def init_params(key, rnn_dim, n_classes, n_cnn_features):
    keys = iter(jax.random.split(key, 128))

    def nrm(shape, scale=0.1):
        return (scale * jax.random.normal(next(keys), shape)).astype(jnp.float32)

    p = {'cnn0_w': nrm((32, 1, 3, 3)), 'cnn0_b': nrm((32,))}

    res = []
    for _ in range(2):
        blk = {}
        for bn in ('bn1', 'bn2'):
            blk[f'{bn}_gamma'] = 1.0 + nrm((32,))
            blk[f'{bn}_beta'] = nrm((32,))
            blk[f'{bn}_mean'] = nrm((32,))
            blk[f'{bn}_var'] = (1.0 + 0.1 * jnp.abs(
                jax.random.normal(next(keys), (32,)))).astype(jnp.float32)
        blk['w1'] = nrm((32, 32, 3, 3)); blk['b1'] = nrm((32,))
        blk['w2'] = nrm((32, 32, 3, 3)); blk['b2'] = nrm((32,))
        res.append(blk)
    p['res'] = res

    fc_in = (n_cnn_features // 2) * 32
    p['fc_w'] = nrm((rnn_dim, fc_in)); p['fc_b'] = nrm((rnn_dim,))

    gru = []
    for d_in in (rnn_dim, 2 * rnn_dim, 2 * rnn_dim):
        gp = {}
        for d in ('fwd', 'bwd'):
            gp[f'w_ih_{d}'] = nrm((3 * rnn_dim, d_in))
            gp[f'w_hh_{d}'] = nrm((3 * rnn_dim, rnn_dim))
            gp[f'b_ih_{d}'] = nrm((3 * rnn_dim,))
            gp[f'b_hh_{d}'] = nrm((3 * rnn_dim,))
        gru.append(gp)
    p['gru'] = gru

    p['cls1_w'] = nrm((rnn_dim, 2 * rnn_dim)); p['cls1_b'] = nrm((rnn_dim,))
    p['cls2_w'] = nrm((n_classes, rnn_dim));   p['cls2_b'] = nrm((n_classes,))
    return p


# ---------------------------------- main -------------------------------------

if __name__ == "__main__":
    B, F_FEAT, T_IN = 2, 16, 16          # (batch, n_cnn_features, time)
    RNN_DIM, N_CLASSES = 32, 29

    key = jax.random.PRNGKey(0)
    pkey, xkey = jax.random.split(key)
    raw_params = init_params(pkey, RNN_DIM, N_CLASSES, F_FEAT)
    params = prepare_params(raw_params, RNN_DIM, N_CLASSES, F_FEAT)

    x = jax.random.normal(xkey, (B, 1, F_FEAT, T_IN), dtype=jnp.float32)

    fwd = jax.jit(lambda xx, pp: speech_recognition_forward(xx, pp, RNN_DIM, N_CLASSES))
    out = fwd(x, params)
    out = jax.block_until_ready(out)

    T_OUT = (T_IN + 2 * 1 - 3) // 2 + 1   # stride-2 first conv -> 8
    assert out.shape == (B, T_OUT, N_CLASSES), out.shape
    assert bool(jnp.all(jnp.isfinite(out)))
    print("KERNEL_OK")
</pallas_src>

<mosaic_0001>
module attributes {stable_mosaic.version = 11 : i64} {
  func.func @_linear_kernel(%arg0: i32, %arg1: memref<128x9xf32, #tpu.memory_space<vmem>>, %arg2: memref<9x32xbf16, #tpu.memory_space<vmem>>, %arg3: memref<1x32xf32, #tpu.memory_space<vmem>>, %arg4: memref<128x32xf32, #tpu.memory_space<vmem>>) attributes {dimension_semantics = [#tpu.dimension_semantics<parallel>], iteration_bounds = array<i64: 1>, scalar_prefetch = 0 : i64, scratch_operands = 0 : i64, tpu.core_type = #tpu.core_type<tc>, window_params = [{transform_indices = @transform_0, window_bounds = array<i64: 128, 9>}, {pipeline_mode = #tpu.pipeline_mode<synchronous>, transform_indices = @transform_1, window_bounds = array<i64: 9, 32>}, {pipeline_mode = #tpu.pipeline_mode<synchronous>, transform_indices = @transform_2, window_bounds = array<i64: 1, 32>}, {transform_indices = @transform_3, window_bounds = array<i64: 128, 32>}]} {
    %c0 = arith.constant 0 : index
    %c0_0 = arith.constant 0 : index
    %0 = vector.load %arg1[%c0, %c0_0] : memref<128x9xf32, #tpu.memory_space<vmem>>, vector<128x9xf32>
    %c0_1 = arith.constant 0 : index
    %c0_2 = arith.constant 0 : index
    %1 = vector.load %arg2[%c0_1, %c0_2] : memref<9x32xbf16, #tpu.memory_space<vmem>>, vector<9x32xbf16>
    %2 = arith.truncf %0 : vector<128x9xf32> to vector<128x9xbf16>
    %cst = arith.constant dense<0.000000e+00> : vector<128x32xf32>
    %3 = tpu.matmul %2, %1, %cst {dimension_numbers = #tpu.dot_dimension_numbers<[1], [0], [0], [1], [0, 0, 1, 1], [], []>} : vector<128x9xbf16>, vector<9x32xbf16>, vector<128x32xf32> -> vector<128x32xf32>
    %c0_3 = arith.constant 0 : index
    %c0_4 = arith.constant 0 : index
    %4 = vector.load %arg3[%c0_3, %c0_4] : memref<1x32xf32, #tpu.memory_space<vmem>>, vector<1x32xf32>
    %5 = vector.broadcast %4 : vector<1x32xf32> to vector<128x32xf32>
    %6 = arith.addf %3, %5 : vector<128x32xf32>
    %c0_5 = arith.constant 0 : index
    %c0_6 = arith.constant 0 : index
    %7 = vector.load %arg4[%c0_5, %c0_6] : memref<128x32xf32, #tpu.memory_space<vmem>>, vector<128x32xf32>
    tpu.vector_store %arg4[%c0_5, %c0_6], %6 {strides = array<i32>} : memref<128x32xf32, #tpu.memory_space<vmem>>, vector<128x32xf32>,
    return
  }
  func.func @transform_0(%arg0: i32) -> (i32, i32) {
    %c0_i32 = arith.constant 0 : i32
    %c0_i32_0 = arith.constant 0 : i32
    return %arg0, %c0_i32 : i32, i32
  }
  func.func @transform_1(%arg0: i32) -> (i32, i32) {
    %c0_i32 = arith.constant 0 : i32
    %c0_i32_0 = arith.constant 0 : i32
    %c0_i32_1 = arith.constant 0 : i32
    return %c0_i32, %c0_i32_0 : i32, i32
  }
  func.func @transform_2(%arg0: i32) -> (i32, i32) {
    %c0_i32 = arith.constant 0 : i32
    %c0_i32_0 = arith.constant 0 : i32
    %c0_i32_1 = arith.constant 0 : i32
    return %c0_i32, %c0_i32_0 : i32, i32
  }
  func.func @transform_3(%arg0: i32) -> (i32, i32) {
    %c0_i32 = arith.constant 0 : i32
    %c0_i32_0 = arith.constant 0 : i32
    return %arg0, %c0_i32 : i32, i32
  }
}

module attributes {stable_mosaic.version = 11 : i64} {
  func.func @_rescnn_kernel(%arg0: i32, %arg1: memref<1x8x8x32xf32, #tpu.memory_space<vmem>>, %arg2: memref<9x32x32xbf16, #tpu.memory_space<vmem>>, %arg3: memref<1x1x32xf32, #tpu.memory_space<vmem>>, %arg4: memref<9x32x32xbf16, #tpu.memory_space<vmem>>, %arg5: memref<1x1x32xf32, #tpu.memory_space<vmem>>, %arg6: memref<1x1x32xf32, #tpu.memory_space<vmem>>, %arg7: memref<1x1x32xf32, #tpu.memory_space<vmem>>, %arg8: memref<1x8x8x32xf32, #tpu.memory_space<vmem>>) attributes {dimension_semantics = [#tpu.dimension_semantics<parallel>], iteration_bounds = array<i64: 2>, scalar_prefetch = 0 : i64, scratch_operands = 0 : i64, tpu.core_type = #tpu.core_type<tc>, window_params = [{transform_indices = @transform_0, window_bounds = array<i64: 1, 8, 8, 32>}, {pipeline_mode = #tpu.pipeline_mode<synchronous>, transform_indices = @transform_1, window_bounds = array<i64: 9, 32, 32>}, {pipeline_mode = #tpu.pipeline_mode<synchronous>, transform_indices = @transform_2, window_bounds = array<i64: 1, 1, 32>}, {pipeline_mode = #tpu.pipeline_mode<synchronous>, transform_indices = @transform_3, window_bounds = array<i64: 9, 32, 32>}, {pipeline_mode = #tpu.pipeline_mode<synchronous>, transform_indices = @transform_4, window_bounds = array<i64: 1, 1, 32>}, {pipeline_mode = #tpu.pipeline_mode<synchronous>, transform_indices = @transform_5, window_bounds = array<i64: 1, 1, 32>}, {pipeline_mode = #tpu.pipeline_mode<synchronous>, transform_indices = @transform_6, window_bounds = array<i64: 1, 1, 32>}, {transform_indices = @transform_7, window_bounds = array<i64: 1, 8, 8, 32>}]} {
    %c0 = arith.constant 0 : index
    %c0_0 = arith.constant 0 : index
    %c0_1 = arith.constant 0 : index
    %c0_2 = arith.constant 0 : index
    %0 = vector.load %arg1[%c0, %c0_0, %c0_1, %c0_2] : memref<1x8x8x32xf32, #tpu.memory_space<vmem>>, vector<1x8x8x32xf32>
    %1 = vector.shape_cast %0 : vector<1x8x8x32xf32> to vector<8x8x32xf32>
    %c0_3 = arith.constant 0 : index
    %c0_4 = arith.constant 0 : index
    %c0_5 = arith.constant 0 : index
    %2 = vector.load %arg6[%c0_3, %c0_4, %c0_5] : memref<1x1x32xf32, #tpu.memory_space<vmem>>, vector<1x1x32xf32>
    %3 = vector.broadcast %2 : vector<1x1x32xf32> to vector<8x8x32xf32>
    %4 = arith.mulf %1, %3 : vector<8x8x32xf32>
    %c0_6 = arith.constant 0 : index
    %c0_7 = arith.constant 0 : index
    %c0_8 = arith.constant 0 : index
    %5 = vector.load %arg7[%c0_6, %c0_7, %c0_8] : memref<1x1x32xf32, #tpu.memory_space<vmem>>, vector<1x1x32xf32>
    %6 = vector.broadcast %5 : vector<1x1x32xf32> to vector<8x8x32xf32>
    %7 = arith.addf %4, %6 : vector<8x8x32xf32>
    %cst = arith.constant 0.000000e+00 : f32
    %8 = vector.broadcast %cst : f32 to vector<8x8x32xf32>
    %9 = arith.maximumf %7, %8 : vector<8x8x32xf32>
    %c0_9 = arith.constant 0 : index
    %c0_10 = arith.constant 0 : index
    %c0_11 = arith.constant 0 : index
    %10 = vector.load %arg3[%c0_9, %c0_10, %c0_11] : memref<1x1x32xf32, #tpu.memory_space<vmem>>, vector<1x1x32xf32>
    %cst_12 = arith.constant 0.000000e+00 : f32
    %11 = vector.broadcast %cst_12 : f32 to vector<8x1x32xf32>
    %cst_13 = arith.constant 0.000000e+00 : f32
    %12 = vector.broadcast %cst_13 : f32 to vector<1x10x32xf32>
    %13 = tpu.concatenate %11, %9, %11 in 1 : vector<8x1x32xf32>, vector<8x8x32xf32>, vector<8x1x32xf32> -> vector<8x10x32xf32>
    %14 = tpu.concatenate %12, %13, %12 in 0 : vector<1x10x32xf32>, vector<8x10x32xf32>, vector<1x10x32xf32> -> vector<10x10x32xf32>
    %cst_14 = arith.constant 0.000000e+00 : f32
    %15 = vector.broadcast %cst_14 : f32 to vector<64x32xf32>
    %16 = vector.extract_strided_slice %14 {offsets = [0, 0, 0], sizes = [8, 8, 32], strides = [1, 1, 1]} : vector<10x10x32xf32> to vector<8x8x32xf32>
    %17 = vector.shape_cast %16 : vector<8x8x32xf32> to vector<64x32xf32>
    %c0_15 = arith.constant 0 : index
    %c0_16 = arith.constant 0 : index
    %c0_17 = arith.constant 0 : index
    %18 = vector.load %arg2[%c0_15, %c0_16, %c0_17] : memref<9x32x32xbf16, #tpu.memory_space<vmem>>, vector<1x32x32xbf16>
    %19 = vector.shape_cast %18 : vector<1x32x32xbf16> to vector<32x32xbf16>
    %20 = arith.truncf %17 : vector<64x32xf32> to vector<64x32xbf16>
    %cst_18 = arith.constant dense<0.000000e+00> : vector<64x32xf32>
    %21 = tpu.matmul %20, %19, %cst_18 {dimension_numbers = #tpu.dot_dimension_numbers<[1], [0], [0], [1], [0, 0, 1, 1], [], []>} : vector<64x32xbf16>, vector<32x32xbf16>, vector<64x32xf32> -> vector<64x32xf32>
    %22 = arith.addf %15, %21 : vector<64x32xf32>
    %23 = vector.extract_strided_slice %14 {offsets = [0, 1, 0], sizes = [8, 8, 32], strides = [1, 1, 1]} : vector<10x10x32xf32> to vector<8x8x32xf32>
    %24 = vector.shape_cast %23 : vector<8x8x32xf32> to vector<64x32xf32>
    %c1 = arith.constant 1 : index
    %c0_19 = arith.constant 0 : index
    %c0_20 = arith.constant 0 : index
    %25 = vector.load %arg2[%c1, %c0_19, %c0_20] : memref<9x32x32xbf16, #tpu.memory_space<vmem>>, vector<1x32x32xbf16>
    %26 = vector.shape_cast %25 : vector<1x32x32xbf16> to vector<32x32xbf16>
    %27 = arith.truncf %24 : vector<64x32xf32> to vector<64x32xbf16>
    %cst_21 = arith.constant dense<0.000000e+00> : vector<64x32xf32>
    %28 = tpu.matmul %27, %26, %cst_21 {dimension_numbers = #tpu.dot_dimension_numbers<[1], [0], [0], [1], [0, 0, 1, 1], [], []>} : vector<64x32xbf16>, vector<32x32xbf16>, vector<64x32xf32> -> vector<64x32xf32>
    %29 = arith.addf %22, %28 : vector<64x32xf32>
    %30 = vector.extract_strided_slice %14 {offsets = [0, 2, 0], sizes = [8, 8, 32], strides = [1, 1, 1]} : vector<10x10x32xf32> to vector<8x8x32xf32>
    %31 = vector.shape_cast %30 : vector<8x8x32xf32> to vector<64x32xf32>
    %c2 = arith.constant 2 : index
    %c0_22 = arith.constant 0 : index
    %c0_23 = arith.constant 0 : index
    %32 = vector.load %arg2[%c2, %c0_22, %c0_23] : memref<9x32x32xbf16, #tpu.memory_space<vmem>>, vector<1x32x32xbf16>
    %33 = vector.shape_cast %32 : vector<1x32x32xbf16> to vector<32x32xbf16>
    %34 = arith.truncf %31 : vector<64x32xf32> to vector<64x32xbf16>
    %cst_24 = arith.constant dense<0.000000e+00> : vector<64x32xf32>
    %35 = tpu.matmul %34, %33, %cst_24 {dimension_numbers = #tpu.dot_dimension_numbers<[1], [0], [0], [1], [0, 0, 1, 1], [], []>} : vector<64x32xbf16>, vector<32x32xbf16>, vector<64x32xf32> -> vector<64x32xf32>
    %36 = arith.addf %29, %35 : vector<64x32xf32>
    %37 = vector.extract_strided_slice %14 {offsets = [1, 0, 0], sizes = [8, 8, 32], strides = [1, 1, 1]} : vector<10x10x32xf32> to vector<8x8x32xf32>
    %38 = vector.shape_cast %37 : vector<8x8x32xf32> to vector<64x32xf32>
    %c3 = arith.constant 3 : index
    %c0_25 = arith.constant 0 : index
    %c0_26 = arith.constant 0 : index
    %39 = vector.load %arg2[%c3, %c0_25, %c0_26] : memref<9x32x32xbf16, #tpu.memory_space<vmem>>, vector<1x32x32xbf16>
    %40 = vector.shape_cast %39 : vector<1x32x32xbf16> to vector<32x32xbf16>
    %41 = arith.truncf %38 : vector<64x32xf32> to vector<64x32xbf16>
    %cst_27 = arith.constant dense<0.000000e+00> : vector<64x32xf32>
    %42 = tpu.matmul %41, %40, %cst_27 {dimension_numbers = #tpu.dot_dimension_numbers<[1], [0], [0], [1], [0, 0, 1, 1], [], []>} : vector<64x32xbf16>, vector<32x32xbf16>, vector<64x32xf32> -> vector<64x32xf32>
    %43 = arith.addf %36, %42 : vector<64x32xf32>
    %44 = vector.extract_strided_slice %14 {offsets = [1, 1, 0], sizes = [8, 8, 32], strides = [1, 1, 1]} : vector<10x10x32xf32> to vector<8x8x32xf32>
    %45 = vector.shape_cast %44 : vector<8x8x32xf32> to vector<64x32xf32>
    %c4 = arith.constant 4 : index
    %c0_28 = arith.constant 0 : index
    %c0_29 = arith.constant 0 : index
    %46 = vector.load %arg2[%c4, %c0_28, %c0_29] : memref<9x32x32xbf16, #tpu.memory_space<vmem>>, vector<1x32x32xbf16>
    %47 = vector.shape_cast %46 : vector<1x32x32xbf16> to vector<32x32xbf16>
    %48 = arith.truncf %45 : vector<64x32xf32> to vector<64x32xbf16>
    %cst_30 = arith.constant dense<0.000000e+00> : vector<64x32xf32>
    %49 = tpu.matmul %48, %47, %cst_30 {dimension_numbers = #tpu.dot_dimension_numbers<[1], [0], [0], [1], [0, 0, 1, 1], [], []>} : vector<64x32xbf16>, vector<32x32xbf16>, vector<64x32xf32> -> vector<64x32xf32>
    %50 = arith.addf %43, %49 : vector<64x32xf32>
    %51 = vector.extract_strided_slice %14 {offsets = [1, 2, 0], sizes = [8, 8, 32], strides = [1, 1, 1]} : vector<10x10x32xf32> to vector<8x8x32xf32>
    %52 = vector.shape_cast %51 : vector<8x8x32xf32> to vector<64x32xf32>
    %c5 = arith.constant 5 : index
    %c0_31 = arith.constant 0 : index
    %c0_32 = arith.constant 0 : index
    %53 = vector.load %arg2[%c5, %c0_31, %c0_32] : memref<9x32x32xbf16, #tpu.memory_space<vmem>>, vector<1x32x32xbf16>
    %54 = vector.shape_cast %53 : vector<1x32x32xbf16> to vector<32x32xbf16>
    %55 = arith.truncf %52 : vector<64x32xf32> to vector<64x32xbf16>
    %cst_33 = arith.constant dense<0.000000e+00> : vector<64x32xf32>
    %56 = tpu.matmul %55, %54, %cst_33 {dimension_numbers = #tpu.dot_dimension_numbers<[1], [0], [0], [1], [0, 0, 1, 1], [], []>} : vector<64x32xbf16>, vector<32x32xbf16>, vector<64x32xf32> -> vector<64x32xf32>
    %57 = arith.addf %50, %56 : vector<64x32xf32>
    %58 = vector.extract_strided_slice %14 {offsets = [2, 0, 0], sizes = [8, 8, 32], strides = [1, 1, 1]} : vector<10x10x32xf32> to vector<8x8x32xf32>
    %59 = vector.shape_cast %58 : vector<8x8x32xf32> to vector<64x32xf32>
    %c6 = arith.constant 6 : index
    %c0_34 = arith.constant 0 : index
    %c0_35 = arith.constant 0 : index
    %60 = vector.load %arg2[%c6, %c0_34, %c0_35] : memref<9x32x32xbf16, #tpu.memory_space<vmem>>, vector<1x32x32xbf16>
    %61 = vector.shape_cast %60 : vector<1x32x32xbf16> to vector<32x32xbf16>
    %62 = arith.truncf %59 : vector<64x32xf32> to vector<64x32xbf16>
    %cst_36 = arith.constant dense<0.000000e+00> : vector<64x32xf32>
    %63 = tpu.matmul %62, %61, %cst_36 {dimension_numbers = #tpu.dot_dimension_numbers<[1], [0], [0], [1], [0, 0, 1, 1], [], []>} : vector<64x32xbf16>, vector<32x32xbf16>, vector<64x32xf32> -> vector<64x32xf32>
    %64 = arith.addf %57, %63 : vector<64x32xf32>
    %65 = vector.extract_strided_slice %14 {offsets = [2, 1, 0], sizes = [8, 8, 32], strides = [1, 1, 1]} : vector<10x10x32xf32> to vector<8x8x32xf32>
    %66 = vector.shape_cast %65 : vector<8x8x32xf32> to vector<64x32xf32>
    %c7 = arith.constant 7 : index
    %c0_37 = arith.constant 0 : index
    %c0_38 = arith.constant 0 : index
    %67 = vector.load %arg2[%c7, %c0_37, %c0_38] : memref<9x32x32xbf16, #tpu.memory_space<vmem>>, vector<1x32x32xbf16>
    %68 = vector.shape_cast %67 : vector<1x32x32xbf16> to vector<32x32xbf16>
    %69 = arith.truncf %66 : vector<64x32xf32> to vector<64x32xbf16>
    %cst_39 = arith.constant dense<0.000000e+00> : vector<64x32xf32>
    %70 = tpu.matmul %69, %68, %cst_39 {dimension_numbers = #tpu.dot_dimension_numbers<[1], [0], [0], [1], [0, 0, 1, 1], [], []>} : vector<64x32xbf16>, vector<32x32xbf16>, vector<64x32xf32> -> vector<64x32xf32>
    %71 = arith.addf %64, %70 : vector<64x32xf32>
    %72 = vector.extract_strided_slice %14 {offsets = [2, 2, 0], sizes = [8, 8, 32], strides = [1, 1, 1]} : vector<10x10x32xf32> to vector<8x8x32xf32>
    %73 = vector.shape_cast %72 : vector<8x8x32xf32> to vector<64x32xf32>
    %c8 = arith.constant 8 : index
    %c0_40 = arith.constant 0 : index
    %c0_41 = arith.constant 0 : index
    %74 = vector.load %arg2[%c8, %c0_40, %c0_41] : memref<9x32x32xbf16, #tpu.memory_space<vmem>>, vector<1x32x32xbf16>
    %75 = vector.shape_cast %74 : vector<1x32x32xbf16> to vector<32x32xbf16>
    %76 = arith.truncf %73 : vector<64x32xf32> to vector<64x32xbf16>
    %cst_42 = arith.constant dense<0.000000e+00> : vector<64x32xf32>
    %77 = tpu.matmul %76, %75, %cst_42 {dimension_numbers = #tpu.dot_dimension_numbers<[1], [0], [0], [1], [0, 0, 1, 1], [], []>} : vector<64x32xbf16>, vector<32x32xbf16>, vector<64x32xf32> -> vector<64x32xf32>
    %78 = arith.addf %71, %77 : vector<64x32xf32>
    %79 = vector.shape_cast %78 : vector<64x32xf32> to vector<8x8x32xf32>
    %80 = vector.broadcast %10 : vector<1x1x32xf32> to vector<8x8x32xf32>
    %81 = arith.addf %79, %80 : vector<8x8x32xf32>
    %cst_43 = arith.constant 0.000000e+00 : f32
    %82 = vector.broadcast %cst_43 : f32 to vector<8x8x32xf32>
    %83 = arith.maximumf %81, %82 : vector<8x8x32xf32>
    %c0_44 = arith.constant 0 : index
    %c0_45 = arith.constant 0 : index
    %c0_46 = arith.constant 0 : index
    %84 = vector.load %arg5[%c0_44, %c0_45, %c0_46] : memref<1x1x32xf32, #tpu.memory_space<vmem>>, vector<1x1x32xf32>
    %cst_47 = arith.constant 0.000000e+00 : f32
    %85 = vector.broadcast %cst_47 : f32 to vector<8x1x32xf32>
    %cst_48 = arith.constant 0.000000e+00 : f32
    %86 = vector.broadcast %cst_48 : f32 to vector<1x10x32xf32>
    %87 = tpu.concatenate %85, %83, %85 in 1 : vector<8x1x32xf32>, vector<8x8x32xf32>, vector<8x1x32xf32> -> vector<8x10x32xf32>
    %88 = tpu.concatenate %86, %87, %86 in 0 : vector<1x10x32xf32>, vector<8x10x32xf32>, vector<1x10x32xf32> -> vector<10x10x32xf32>
    %cst_49 = arith.constant 0.000000e+00 : f32
    %89 = vector.broadcast %cst_49 : f32 to vector<64x32xf32>
    %90 = vector.extract_strided_slice %88 {offsets = [0, 0, 0], sizes = [8, 8, 32], strides = [1, 1, 1]} : vector<10x10x32xf32> to vector<8x8x32xf32>
    %91 = vector.shape_cast %90 : vector<8x8x32xf32> to vector<64x32xf32>
    %c0_50 = arith.constant 0 : index
    %c0_51 = arith.constant 0 : index
    %c0_52 = arith.constant 0 : index
    %92 = vector.load %arg4[%c0_50, %c0_51, %c0_52] : memref<9x32x32xbf16, #tpu.memory_space<vmem>>, vector<1x32x32xbf16>
    %93 = vector.shape_cast %92 : vector<1x32x32xbf16> to vector<32x32xbf16>
    %94 = arith.truncf %91 : vector<64x32xf32> to vector<64x32xbf16>
    %cst_53 = arith.constant dense<0.000000e+00> : vector<64x32xf32>
    %95 = tpu.matmul %94, %93, %cst_53 {dimension_numbers = #tpu.dot_dimension_numbers<[1], [0], [0], [1], [0, 0, 1, 1], [], []>} : vector<64x32xbf16>, vector<32x32xbf16>, vector<64x32xf32> -> vector<64x32xf32>
    %96 = arith.addf %89, %95 : vector<64x32xf32>
    %97 = vector.extract_strided_slice %88 {offsets = [0, 1, 0], sizes = [8, 8, 32], strides = [1, 1, 1]} : vector<10x10x32xf32> to vector<8x8x32xf32>
    %98 = vector.shape_cast %97 : vector<8x8x32xf32> to vector<64x32xf32>
    %c1_54 = arith.constant 1 : index
    %c0_55 = arith.constant 0 : index
    %c0_56 = arith.constant 0 : index
    %99 = vector.load %arg4[%c1_54, %c0_55, %c0_56] : memref<9x32x32xbf16, #tpu.memory_space<vmem>>, vector<1x32x32xbf16>
    %100 = vector.shape_cast %99 : vector<1x32x32xbf16> to vector<32x32xbf16>
    %101 = arith.truncf %98 : vector<64x32xf32> to vector<64x32xbf16>
    %cst_57 = arith.constant dense<0.000000e+00> : vector<64x32xf32>
    %102 = tpu.matmul %101, %100, %cst_57 {dimension_numbers = #tpu.dot_dimension_numbers<[1], [0], [0], [1], [0, 0, 1, 1], [], []>} : vector<64x32xbf16>, vector<32x32xbf16>, vector<64x32xf32> -> vector<64x32xf32>
    %103 = arith.addf %96, %102 : vector<64x32xf32>
    %104 = vector.extract_strided_slice %88 {offsets = [0, 2, 0], sizes = [8, 8, 32], strides = [1, 1, 1]} : vector<10x10x32xf32> to vector<8x8x32xf32>
    %105 = vector.shape_cast %104 : vector<8x8x32xf32> to vector<64x32xf32>
    %c2_58 = arith.constant 2 : index
    %c0_59 = arith.constant 0 : index
    %c0_60 = arith.constant 0 : index
    %106 = vector.load %arg4[%c2_58, %c0_59, %c0_60] : memref<9x32x32xbf16, #tpu.memory_space<vmem>>, vector<1x32x32xbf16>
    %107 = vector.shape_cast %106 : vector<1x32x32xbf16> to vector<32x32xbf16>
    %108 = arith.truncf %105 : vector<64x32xf32> to vector<64x32xbf16>
    %cst_61 = arith.constant dense<0.000000e+00> : vector<64x32xf32>
    %109 = tpu.matmul %108, %107, %cst_61 {dimension_numbers = #tpu.dot_dimension_numbers<[1], [0], [0], [1], [0, 0, 1, 1], [], []>} : vector<64x32xbf16>, vector<32x32xbf16>, vector<64x32xf32> -> vector<64x32xf32>
    %110 = arith.addf %103, %109 : vector<64x32xf32>
    %111 = vector.extract_strided_slice %88 {offsets = [1, 0, 0], sizes = [8, 8, 32], strides = [1, 1, 1]} : vector<10x10x32xf32> to vector<8x8x32xf32>
    %112 = vector.shape_cast %111 : vector<8x8x32xf32> to vector<64x32xf32>
    %c3_62 = arith.constant 3 : index
    %c0_63 = arith.constant 0 : index
    %c0_64 = arith.constant 0 : index
    %113 = vector.load %arg4[%c3_62, %c0_63, %c0_64] : memref<9x32x32xbf16, #tpu.memory_space<vmem>>, vector<1x32x32xbf16>
    %114 = vector.shape_cast %113 : vector<1x32x32xbf16> to vector<32x32xbf16>
    %115 = arith.truncf %112 : vector<64x32xf32> to vector<64x32xbf16>
    %cst_65 = arith.constant dense<0.000000e+00> : vector<64x32xf32>
    %116 = tpu.matmul %115, %114, %cst_65 {dimension_numbers = #tpu.dot_dimension_numbers<[1], [0], [0], [1], [0, 0, 1, 1], [], []>} : vector<64x32xbf16>, vector<32x32xbf16>, vector<64x32xf32> -> vector<64x32xf32>
    %117 = arith.addf %110, %116 : vector<64x32xf32>
    %118 = vector.extract_strided_slice %88 {offsets = [1, 1, 0], sizes = [8, 8, 32], strides = [1, 1, 1]} : vector<10x10x32xf32> to vector<8x8x32xf32>
    %119 = vector.shape_cast %118 : vector<8x8x32xf32> to vector<64x32xf32>
    %c4_66 = arith.constant 4 : index
    %c0_67 = arith.constant 0 : index
    %c0_68 = arith.constant 0 : index
    %120 = vector.load %arg4[%c4_66, %c0_67, %c0_68] : memref<9x32x32xbf16, #tpu.memory_space<vmem>>, vector<1x32x32xbf16>
    %121 = vector.shape_cast %120 : vector<1x32x32xbf16> to vector<32x32xbf16>
    %122 = arith.truncf %119 : vector<64x32xf32> to vector<64x32xbf16>
    %cst_69 = arith.constant dense<0.000000e+00> : vector<64x32xf32>
    %123 = tpu.matmul %122, %121, %cst_69 {dimension_numbers = #tpu.dot_dimension_numbers<[1], [0], [0], [1], [0, 0, 1, 1], [], []>} : vector<64x32xbf16>, vector<32x32xbf16>, vector<64x32xf32> -> vector<64x32xf32>
    %124 = arith.addf %117, %123 : vector<64x32xf32>
    %125 = vector.extract_strided_slice %88 {offsets = [1, 2, 0], sizes = [8, 8, 32], strides = [1, 1, 1]} : vector<10x10x32xf32> to vector<8x8x32xf32>
    %126 = vector.shape_cast %125 : vector<8x8x32xf32> to vector<64x32xf32>
    %c5_70 = arith.constant 5 : index
    %c0_71 = arith.constant 0 : index
    %c0_72 = arith.constant 0 : index
    %127 = vector.load %arg4[%c5_70, %c0_71, %c0_72] : memref<9x32x32xbf16, #tpu.memory_space<vmem>>, vector<1x32x32xbf16>
    %128 = vector.shape_cast %127 : vector<1x32x32xbf16> to vector<32x32xbf16>
    %129 = arith.truncf %126 : vector<64x32xf32> to vector<64x32xbf16>
    %cst_73 = arith.constant dense<0.000000e+00> : vector<64x32xf32>
    %130 = tpu.matmul %129, %128, %cst_73 {dimension_numbers = #tpu.dot_dimension_numbers<[1], [0], [0], [1], [0, 0, 1, 1], [], []>} : vector<64x32xbf16>, vector<32x32xbf16>, vector<64x32xf32> -> vector<64x32xf32>
    %131 = arith.addf %124, %130 : vector<64x32xf32>
    %132 = vector.extract_strided_slice %88 {offsets = [2, 0, 0], sizes = [8, 8, 32], strides = [1, 1, 1]} : vector<10x10x32xf32> to vector<8x8x32xf32>
    %133 = vector.shape_cast %132 : vector<8x8x32xf32> to vector<64x32xf32>
    %c6_74 = arith.constant 6 : index
    %c0_75 = arith.constant 0 : index
    %c0_76 = arith.constant 0 : index
    %134 = vector.load %arg4[%c6_74, %c0_75, %c0_76] : memref<9x32x32xbf16, #tpu.memory_space<vmem>>, vector<1x32x32xbf16>
    %135 = vector.shape_cast %134 : vector<1x32x32xbf16> to vector<32x32xbf16>
    %136 = arith.truncf %133 : vector<64x32xf32> to vector<64x32xbf16>
    %cst_77 = arith.constant dense<0.000000e+00> : vector<64x32xf32>
    %137 = tpu.matmul %136, %135, %cst_77 {dimension_numbers = #tpu.dot_dimension_numbers<[1], [0], [0], [1], [0, 0, 1, 1], [], []>} : vector<64x32xbf16>, vector<32x32xbf16>, vector<64x32xf32> -> vector<64x32xf32>
    %138 = arith.addf %131, %137 : vector<64x32xf32>
    %139 = vector.extract_strided_slice %88 {offsets = [2, 1, 0], sizes = [8, 8, 32], strides = [1, 1, 1]} : vector<10x10x32xf32> to vector<8x8x32xf32>
    %140 = vector.shape_cast %139 : vector<8x8x32xf32> to vector<64x32xf32>
    %c7_78 = arith.constant 7 : index
    %c0_79 = arith.constant 0 : index
    %c0_80 = arith.constant 0 : index
    %141 = vector.load %arg4[%c7_78, %c0_79, %c0_80] : memref<9x32x32xbf16, #tpu.memory_space<vmem>>, vector<1x32x32xbf16>
    %142 = vector.shape_cast %141 : vector<1x32x32xbf16> to vector<32x32xbf16>
    %143 = arith.truncf %140 : vector<64x32xf32> to vector<64x32xbf16>
    %cst_81 = arith.constant dense<0.000000e+00> : vector<64x32xf32>
    %144 = tpu.matmul %143, %142, %cst_81 {dimension_numbers = #tpu.dot_dimension_numbers<[1], [0], [0], [1], [0, 0, 1, 1], [], []>} : vector<64x32xbf16>, vector<32x32xbf16>, vector<64x32xf32> -> vector<64x32xf32>
    %145 = arith.addf %138, %144 : vector<64x32xf32>
    %146 = vector.extract_strided_slice %88 {offsets = [2, 2, 0], sizes = [8, 8, 32], strides = [1, 1, 1]} : vector<10x10x32xf32> to vector<8x8x32xf32>
    %147 = vector.shape_cast %146 : vector<8x8x32xf32> to vector<64x32xf32>
    %c8_82 = arith.constant 8 : index
    %c0_83 = arith.constant 0 : index
    %c0_84 = arith.constant 0 : index
    %148 = vector.load %arg4[%c8_82, %c0_83, %c0_84] : memref<9x32x32xbf16, #tpu.memory_space<vmem>>, vector<1x32x32xbf16>
    %149 = vector.shape_cast %148 : vector<1x32x32xbf16> to vector<32x32xbf16>
    %150 = arith.truncf %147 : vector<64x32xf32> to vector<64x32xbf16>
    %cst_85 = arith.constant dense<0.000000e+00> : vector<64x32xf32>
    %151 = tpu.matmul %150, %149, %cst_85 {dimension_numbers = #tpu.dot_dimension_numbers<[1], [0], [0], [1], [0, 0, 1, 1], [], []>} : vector<64x32xbf16>, vector<32x32xbf16>, vector<64x32xf32> -> vector<64x32xf32>
    %152 = arith.addf %145, %151 : vector<64x32xf32>
    %153 = vector.shape_cast %152 : vector<64x32xf32> to vector<8x8x32xf32>
    %154 = vector.broadcast %84 : vector<1x1x32xf32> to vector<8x8x32xf32>
    %155 = arith.addf %153, %154 : vector<8x8x32xf32>
    %156 = arith.addf %155, %1 : vector<8x8x32xf32>
    %c0_86 = arith.constant 0 : index
    %c0_87 = arith.constant 0 : index
    %c0_88 = arith.constant 0 : index
    %c0_89 = arith.constant 0 : index
    %157 = vector.load %arg8[%c0_86, %c0_87, %c0_88, %c0_89] : memref<1x8x8x32xf32, #tpu.memory_space<vmem>>, vector<1x8x8x32xf32>
    %158 = vector.shape_cast %157 : vector<1x8x8x32xf32> to vector<8x8x32xf32>
    %159 = vector.shape_cast %156 : vector<8x8x32xf32> to vector<1x8x8x32xf32>
    tpu.vector_store %arg8[%c0_86, %c0_87, %c0_88, %c0_89], %159 {strides = array<i32>} : memref<1x8x8x32xf32, #tpu.memory_space<vmem>>, vector<1x8x8x32xf32>,
    return
  }
  func.func @transform_0(%arg0: i32) -> (i32, i32, i32, i32) {
    %c0_i32 = arith.constant 0 : i32
    %c0_i32_0 = arith.constant 0 : i32
    %c0_i32_1 = arith.constant 0 : i32
    %c0_i32_2 = arith.constant 0 : i32
    return %arg0, %c0_i32, %c0_i32_0, %c0_i32_1 : i32, i32, i32, i32
  }
  func.func @transform_1(%arg0: i32) -> (i32, i32, i32) {
    %c0_i32 = arith.constant 0 : i32
    %c0_i32_0 = arith.constant 0 : i32
    %c0_i32_1 = arith.constant 0 : i32
    %c0_i32_2 = arith.constant 0 : i32
    return %c0_i32, %c0_i32_0, %c0_i32_1 : i32, i32, i32
  }
  func.func @transform_2(%arg0: i32) -> (i32, i32, i32) {
    %c0_i32 = arith.constant 0 : i32
    %c0_i32_0 = arith.constant 0 : i32
    %c0_i32_1 = arith.constant 0 : i32
    %c0_i32_2 = arith.constant 0 : i32
    return %c0_i32, %c0_i32_0, %c0_i32_1 : i32, i32, i32
  }
  func.func @transform_3(%arg0: i32) -> (i32, i32, i32) {
    %c0_i32 = arith.constant 0 : i32
    %c0_i32_0 = arith.constant 0 : i32
    %c0_i32_1 = arith.constant 0 : i32
    %c0_i32_2 = arith.constant 0 : i32
    return %c0_i32, %c0_i32_0, %c0_i32_1 : i32, i32, i32
  }
  func.func @transform_4(%arg0: i32) -> (i32, i32, i32) {
    %c0_i32 = arith.constant 0 : i32
    %c0_i32_0 = arith.constant 0 : i32
    %c0_i32_1 = arith.constant 0 : i32
    %c0_i32_2 = arith.constant 0 : i32
    return %c0_i32, %c0_i32_0, %c0_i32_1 : i32, i32, i32
  }
  func.func @transform_5(%arg0: i32) -> (i32, i32, i32) {
    %c0_i32 = arith.constant 0 : i32
    %c0_i32_0 = arith.constant 0 : i32
    %c0_i32_1 = arith.constant 0 : i32
    %c0_i32_2 = arith.constant 0 : i32
    return %c0_i32, %c0_i32_0, %c0_i32_1 : i32, i32, i32
  }
  func.func @transform_6(%arg0: i32) -> (i32, i32, i32) {
    %c0_i32 = arith.constant 0 : i32
    %c0_i32_0 = arith.constant 0 : i32
    %c0_i32_1 = arith.constant 0 : i32
    %c0_i32_2 = arith.constant 0 : i32
    return %c0_i32, %c0_i32_0, %c0_i32_1 : i32, i32, i32
  }
  func.func @transform_7(%arg0: i32) -> (i32, i32, i32, i32) {
    %c0_i32 = arith.constant 0 : i32
    %c0_i32_0 = arith.constant 0 : i32
    %c0_i32_1 = arith.constant 0 : i32
    %c0_i32_2 = arith.constant 0 : i32
    return %arg0, %c0_i32, %c0_i32_0, %c0_i32_1 : i32, i32, i32, i32
  }
}

module attributes {stable_mosaic.version = 11 : i64} {
  func.func @_linear_kernel(%arg0: i32, %arg1: memref<64x256xf32, #tpu.memory_space<vmem>>, %arg2: memref<256x32xbf16, #tpu.memory_space<vmem>>, %arg3: memref<1x32xf32, #tpu.memory_space<vmem>>, %arg4: memref<64x32xf32, #tpu.memory_space<vmem>>) attributes {dimension_semantics = [#tpu.dimension_semantics<parallel>], iteration_bounds = array<i64: 1>, scalar_prefetch = 0 : i64, scratch_operands = 0 : i64, tpu.core_type = #tpu.core_type<tc>, window_params = [{transform_indices = @transform_0, window_bounds = array<i64: 64, 256>}, {pipeline_mode = #tpu.pipeline_mode<synchronous>, transform_indices = @transform_1, window_bounds = array<i64: 256, 32>}, {pipeline_mode = #tpu.pipeline_mode<synchronous>, transform_indices = @transform_2, window_bounds = array<i64: 1, 32>}, {transform_indices = @transform_3, window_bounds = array<i64: 64, 32>}]} {
    %c0 = arith.constant 0 : index
    %c0_0 = arith.constant 0 : index
    %0 = vector.load %arg1[%c0, %c0_0] : memref<64x256xf32, #tpu.memory_space<vmem>>, vector<64x256xf32>
    %c0_1 = arith.constant 0 : index
    %c0_2 = arith.constant 0 : index
    %1 = vector.load %arg2[%c0_1, %c0_2] : memref<256x32xbf16, #tpu.memory_space<vmem>>, vector<256x32xbf16>
    %2 = arith.truncf %0 : vector<64x256xf32> to vector<64x256xbf16>
    %cst = arith.constant dense<0.000000e+00> : vector<64x32xf32>
    %3 = tpu.matmul %2, %1, %cst {dimension_numbers = #tpu.dot_dimension_numbers<[1], [0], [0], [1], [0, 0, 1, 1], [], []>} : vector<64x256xbf16>, vector<256x32xbf16>, vector<64x32xf32> -> vector<64x32xf32>
    %c0_3 = arith.constant 0 : index
    %c0_4 = arith.constant 0 : index
    %4 = vector.load %arg3[%c0_3, %c0_4] : memref<1x32xf32, #tpu.memory_space<vmem>>, vector<1x32xf32>
    %5 = vector.broadcast %4 : vector<1x32xf32> to vector<64x32xf32>
    %6 = arith.addf %3, %5 : vector<64x32xf32>
    %c0_5 = arith.constant 0 : index
    %c0_6 = arith.constant 0 : index
    %7 = vector.load %arg4[%c0_5, %c0_6] : memref<64x32xf32, #tpu.memory_space<vmem>>, vector<64x32xf32>
    tpu.vector_store %arg4[%c0_5, %c0_6], %6 {strides = array<i32>} : memref<64x32xf32, #tpu.memory_space<vmem>>, vector<64x32xf32>,
    return
  }
  func.func @transform_0(%arg0: i32) -> (i32, i32) {
    %c0_i32 = arith.constant 0 : i32
    %c0_i32_0 = arith.constant 0 : i32
    return %arg0, %c0_i32 : i32, i32
  }
  func.func @transform_1(%arg0: i32) -> (i32, i32) {
    %c0_i32 = arith.constant 0 : i32
    %c0_i32_0 = arith.constant 0 : i32
    %c0_i32_1 = arith.constant 0 : i32
    return %c0_i32, %c0_i32_0 : i32, i32
  }
  func.func @transform_2(%arg0: i32) -> (i32, i32) {
    %c0_i32 = arith.constant 0 : i32
    %c0_i32_0 = arith.constant 0 : i32
    %c0_i32_1 = arith.constant 0 : i32
    return %c0_i32, %c0_i32_0 : i32, i32
  }
  func.func @transform_3(%arg0: i32) -> (i32, i32) {
    %c0_i32 = arith.constant 0 : i32
    %c0_i32_0 = arith.constant 0 : i32
    return %arg0, %c0_i32 : i32, i32
  }
}

module attributes {stable_mosaic.version = 11 : i64} {
  func.func @_gru_gates1_kernel(%arg0: i32, %arg1: memref<64x32xf32, #tpu.memory_space<vmem>>, %arg2: memref<32x96xbf16, #tpu.memory_space<vmem>>, %arg3: memref<32x96xbf16, #tpu.memory_space<vmem>>, %arg4: memref<1x96xf32, #tpu.memory_space<vmem>>, %arg5: memref<1x96xf32, #tpu.memory_space<vmem>>, %arg6: memref<64x96xf32, #tpu.memory_space<vmem>>, %arg7: memref<64x96xf32, #tpu.memory_space<vmem>>) attributes {dimension_semantics = [#tpu.dimension_semantics<parallel>], iteration_bounds = array<i64: 1>, scalar_prefetch = 0 : i64, scratch_operands = 0 : i64, tpu.core_type = #tpu.core_type<tc>, window_params = [{transform_indices = @transform_0, window_bounds = array<i64: 64, 32>}, {pipeline_mode = #tpu.pipeline_mode<synchronous>, transform_indices = @transform_1, window_bounds = array<i64: 32, 96>}, {pipeline_mode = #tpu.pipeline_mode<synchronous>, transform_indices = @transform_2, window_bounds = array<i64: 32, 96>}, {pipeline_mode = #tpu.pipeline_mode<synchronous>, transform_indices = @transform_3, window_bounds = array<i64: 1, 96>}, {pipeline_mode = #tpu.pipeline_mode<synchronous>, transform_indices = @transform_4, window_bounds = array<i64: 1, 96>}, {transform_indices = @transform_5, window_bounds = array<i64: 64, 96>}, {transform_indices = @transform_6, window_bounds = array<i64: 64, 96>}]} {
    %c0 = arith.constant 0 : index
    %c0_0 = arith.constant 0 : index
    %0 = vector.load %arg1[%c0, %c0_0] : memref<64x32xf32, #tpu.memory_space<vmem>>, vector<64x32xf32>
    %cst = arith.constant 0.000000e+00 : f32
    %1 = vector.broadcast %cst : f32 to vector<64x32xf32>
    %2 = arith.maximumf %0, %1 : vector<64x32xf32>
    %c0_1 = arith.constant 0 : index
    %c0_2 = arith.constant 0 : index
    %3 = vector.load %arg2[%c0_1, %c0_2] : memref<32x96xbf16, #tpu.memory_space<vmem>>, vector<32x96xbf16>
    %4 = arith.truncf %2 : vector<64x32xf32> to vector<64x32xbf16>
    %cst_3 = arith.constant dense<0.000000e+00> : vector<64x96xf32>
    %5 = tpu.matmul %4, %3, %cst_3 {dimension_numbers = #tpu.dot_dimension_numbers<[1], [0], [0], [1], [0, 0, 1, 1], [], []>} : vector<64x32xbf16>, vector<32x96xbf16>, vector<64x96xf32> -> vector<64x96xf32>
    %c0_4 = arith.constant 0 : index
    %c0_5 = arith.constant 0 : index
    %6 = vector.load %arg4[%c0_4, %c0_5] : memref<1x96xf32, #tpu.memory_space<vmem>>, vector<1x96xf32>
    %7 = vector.broadcast %6 : vector<1x96xf32> to vector<64x96xf32>
    %8 = arith.addf %5, %7 : vector<64x96xf32>
    %c0_6 = arith.constant 0 : index
    %c0_7 = arith.constant 0 : index
    %9 = vector.load %arg6[%c0_6, %c0_7] : memref<64x96xf32, #tpu.memory_space<vmem>>, vector<64x96xf32>
    tpu.vector_store %arg6[%c0_6, %c0_7], %8 {strides = array<i32>} : memref<64x96xf32, #tpu.memory_space<vmem>>, vector<64x96xf32>,
    %c0_8 = arith.constant 0 : index
    %c0_9 = arith.constant 0 : index
    %10 = vector.load %arg3[%c0_8, %c0_9] : memref<32x96xbf16, #tpu.memory_space<vmem>>, vector<32x96xbf16>
    %11 = arith.truncf %2 : vector<64x32xf32> to vector<64x32xbf16>
    %cst_10 = arith.constant dense<0.000000e+00> : vector<64x96xf32>
    %12 = tpu.matmul %11, %10, %cst_10 {dimension_numbers = #tpu.dot_dimension_numbers<[1], [0], [0], [1], [0, 0, 1, 1], [], []>} : vector<64x32xbf16>, vector<32x96xbf16>, vector<64x96xf32> -> vector<64x96xf32>
    %c0_11 = arith.constant 0 : index
    %c0_12 = arith.constant 0 : index
    %13 = vector.load %arg5[%c0_11, %c0_12] : memref<1x96xf32, #tpu.memory_space<vmem>>, vector<1x96xf32>
    %14 = vector.broadcast %13 : vector<1x96xf32> to vector<64x96xf32>
    %15 = arith.addf %12, %14 : vector<64x96xf32>
    %c0_13 = arith.constant 0 : index
    %c0_14 = arith.constant 0 : index
    %16 = vector.load %arg7[%c0_13, %c0_14] : memref<64x96xf32, #tpu.memory_space<vmem>>, vector<64x96xf32>
    tpu.vector_store %arg7[%c0_13, %c0_14], %15 {strides = array<i32>} : memref<64x96xf32, #tpu.memory_space<vmem>>, vector<64x96xf32>,
    return
  }
  func.func @transform_0(%arg0: i32) -> (i32, i32) {
    %c0_i32 = arith.constant 0 : i32
    %c0_i32_0 = arith.constant 0 : i32
    return %arg0, %c0_i32 : i32, i32
  }
  func.func @transform_1(%arg0: i32) -> (i32, i32) {
    %c0_i32 = arith.constant 0 : i32
    %c0_i32_0 = arith.constant 0 : i32
    %c0_i32_1 = arith.constant 0 : i32
    return %c0_i32, %c0_i32_0 : i32, i32
  }
  func.func @transform_2(%arg0: i32) -> (i32, i32) {
    %c0_i32 = arith.constant 0 : i32
    %c0_i32_0 = arith.constant 0 : i32
    %c0_i32_1 = arith.constant 0 : i32
    return %c0_i32, %c0_i32_0 : i32, i32
  }
  func.func @transform_3(%arg0: i32) -> (i32, i32) {
    %c0_i32 = arith.constant 0 : i32
    %c0_i32_0 = arith.constant 0 : i32
    %c0_i32_1 = arith.constant 0 : i32
    return %c0_i32, %c0_i32_0 : i32, i32
  }
  func.func @transform_4(%arg0: i32) -> (i32, i32) {
    %c0_i32 = arith.constant 0 : i32
    %c0_i32_0 = arith.constant 0 : i32
    %c0_i32_1 = arith.constant 0 : i32
    return %c0_i32, %c0_i32_0 : i32, i32
  }
  func.func @transform_5(%arg0: i32) -> (i32, i32) {
    %c0_i32 = arith.constant 0 : i32
    %c0_i32_0 = arith.constant 0 : i32
    return %arg0, %c0_i32 : i32, i32
  }
  func.func @transform_6(%arg0: i32) -> (i32, i32) {
    %c0_i32 = arith.constant 0 : i32
    %c0_i32_0 = arith.constant 0 : i32
    return %arg0, %c0_i32 : i32, i32
  }
}

module attributes {stable_mosaic.version = 11 : i64} {
  func.func @_gru_gates2_kernel(%arg0: i32, %arg1: memref<64x32xf32, #tpu.memory_space<vmem>>, %arg2: memref<64x32xf32, #tpu.memory_space<vmem>>, %arg3: memref<32x96xbf16, #tpu.memory_space<vmem>>, %arg4: memref<32x96xbf16, #tpu.memory_space<vmem>>, %arg5: memref<32x96xbf16, #tpu.memory_space<vmem>>, %arg6: memref<32x96xbf16, #tpu.memory_space<vmem>>, %arg7: memref<1x96xf32, #tpu.memory_space<vmem>>, %arg8: memref<1x96xf32, #tpu.memory_space<vmem>>, %arg9: memref<64x96xf32, #tpu.memory_space<vmem>>, %arg10: memref<64x96xf32, #tpu.memory_space<vmem>>) attributes {dimension_semantics = [#tpu.dimension_semantics<parallel>], iteration_bounds = array<i64: 1>, scalar_prefetch = 0 : i64, scratch_operands = 0 : i64, tpu.core_type = #tpu.core_type<tc>, window_params = [{transform_indices = @transform_0, window_bounds = array<i64: 64, 32>}, {transform_indices = @transform_1, window_bounds = array<i64: 64, 32>}, {pipeline_mode = #tpu.pipeline_mode<synchronous>, transform_indices = @transform_2, window_bounds = array<i64: 32, 96>}, {pipeline_mode = #tpu.pipeline_mode<synchronous>, transform_indices = @transform_3, window_bounds = array<i64: 32, 96>}, {pipeline_mode = #tpu.pipeline_mode<synchronous>, transform_indices = @transform_4, window_bounds = array<i64: 32, 96>}, {pipeline_mode = #tpu.pipeline_mode<synchronous>, transform_indices = @transform_5, window_bounds = array<i64: 32, 96>}, {pipeline_mode = #tpu.pipeline_mode<synchronous>, transform_indices = @transform_6, window_bounds = array<i64: 1, 96>}, {pipeline_mode = #tpu.pipeline_mode<synchronous>, transform_indices = @transform_7, window_bounds = array<i64: 1, 96>}, {transform_indices = @transform_8, window_bounds = array<i64: 64, 96>}, {transform_indices = @transform_9, window_bounds = array<i64: 64, 96>}]} {
    %c0 = arith.constant 0 : index
    %c0_0 = arith.constant 0 : index
    %0 = vector.load %arg1[%c0, %c0_0] : memref<64x32xf32, #tpu.memory_space<vmem>>, vector<64x32xf32>
    %cst = arith.constant 0.000000e+00 : f32
    %1 = vector.broadcast %cst : f32 to vector<64x32xf32>
    %2 = arith.maximumf %0, %1 : vector<64x32xf32>
    %c0_1 = arith.constant 0 : index
    %c0_2 = arith.constant 0 : index
    %3 = vector.load %arg2[%c0_1, %c0_2] : memref<64x32xf32, #tpu.memory_space<vmem>>, vector<64x32xf32>
    %cst_3 = arith.constant 0.000000e+00 : f32
    %4 = vector.broadcast %cst_3 : f32 to vector<64x32xf32>
    %5 = arith.maximumf %3, %4 : vector<64x32xf32>
    %c0_4 = arith.constant 0 : index
    %c0_5 = arith.constant 0 : index
    %6 = vector.load %arg3[%c0_4, %c0_5] : memref<32x96xbf16, #tpu.memory_space<vmem>>, vector<32x96xbf16>
    %7 = arith.truncf %2 : vector<64x32xf32> to vector<64x32xbf16>
    %cst_6 = arith.constant dense<0.000000e+00> : vector<64x96xf32>
    %8 = tpu.matmul %7, %6, %cst_6 {dimension_numbers = #tpu.dot_dimension_numbers<[1], [0], [0], [1], [0, 0, 1, 1], [], []>} : vector<64x32xbf16>, vector<32x96xbf16>, vector<64x96xf32> -> vector<64x96xf32>
    %c0_7 = arith.constant 0 : index
    %c0_8 = arith.constant 0 : index
    %9 = vector.load %arg4[%c0_7, %c0_8] : memref<32x96xbf16, #tpu.memory_space<vmem>>, vector<32x96xbf16>
    %10 = arith.truncf %5 : vector<64x32xf32> to vector<64x32xbf16>
    %cst_9 = arith.constant dense<0.000000e+00> : vector<64x96xf32>
    %11 = tpu.matmul %10, %9, %cst_9 {dimension_numbers = #tpu.dot_dimension_numbers<[1], [0], [0], [1], [0, 0, 1, 1], [], []>} : vector<64x32xbf16>, vector<32x96xbf16>, vector<64x96xf32> -> vector<64x96xf32>
    %12 = arith.addf %8, %11 : vector<64x96xf32>
    %c0_10 = arith.constant 0 : index
    %c0_11 = arith.constant 0 : index
    %13 = vector.load %arg7[%c0_10, %c0_11] : memref<1x96xf32, #tpu.memory_space<vmem>>, vector<1x96xf32>
    %14 = vector.broadcast %13 : vector<1x96xf32> to vector<64x96xf32>
    %15 = arith.addf %12, %14 : vector<64x96xf32>
    %c0_12 = arith.constant 0 : index
    %c0_13 = arith.constant 0 : index
    %16 = vector.load %arg9[%c0_12, %c0_13] : memref<64x96xf32, #tpu.memory_space<vmem>>, vector<64x96xf32>
    tpu.vector_store %arg9[%c0_12, %c0_13], %15 {strides = array<i32>} : memref<64x96xf32, #tpu.memory_space<vmem>>, vector<64x96xf32>,
    %c0_14 = arith.constant 0 : index
    %c0_15 = arith.constant 0 : index
    %17 = vector.load %arg5[%c0_14, %c0_15] : memref<32x96xbf16, #tpu.memory_space<vmem>>, vector<32x96xbf16>
    %18 = arith.truncf %2 : vector<64x32xf32> to vector<64x32xbf16>
    %cst_16 = arith.constant dense<0.000000e+00> : vector<64x96xf32>
    %19 = tpu.matmul %18, %17, %cst_16 {dimension_numbers = #tpu.dot_dimension_numbers<[1], [0], [0], [1], [0, 0, 1, 1], [], []>} : vector<64x32xbf16>, vector<32x96xbf16>, vector<64x96xf32> -> vector<64x96xf32>
    %c0_17 = arith.constant 0 : index
    %c0_18 = arith.constant 0 : index
    %20 = vector.load %arg6[%c0_17, %c0_18] : memref<32x96xbf16, #tpu.memory_space<vmem>>, vector<32x96xbf16>
    %21 = arith.truncf %5 : vector<64x32xf32> to vector<64x32xbf16>
    %cst_19 = arith.constant dense<0.000000e+00> : vector<64x96xf32>
    %22 = tpu.matmul %21, %20, %cst_19 {dimension_numbers = #tpu.dot_dimension_numbers<[1], [0], [0], [1], [0, 0, 1, 1], [], []>} : vector<64x32xbf16>, vector<32x96xbf16>, vector<64x96xf32> -> vector<64x96xf32>
    %23 = arith.addf %19, %22 : vector<64x96xf32>
    %c0_20 = arith.constant 0 : index
    %c0_21 = arith.constant 0 : index
    %24 = vector.load %arg8[%c0_20, %c0_21] : memref<1x96xf32, #tpu.memory_space<vmem>>, vector<1x96xf32>
    %25 = vector.broadcast %24 : vector<1x96xf32> to vector<64x96xf32>
    %26 = arith.addf %23, %25 : vector<64x96xf32>
    %c0_22 = arith.constant 0 : index
    %c0_23 = arith.constant 0 : index
    %27 = vector.load %arg10[%c0_22, %c0_23] : memref<64x96xf32, #tpu.memory_space<vmem>>, vector<64x96xf32>
    tpu.vector_store %arg10[%c0_22, %c0_23], %26 {strides = array<i32>} : memref<64x96xf32, #tpu.memory_space<vmem>>, vector<64x96xf32>,
    return
  }
  func.func @transform_0(%arg0: i32) -> (i32, i32) {
    %c0_i32 = arith.constant 0 : i32
    %c0_i32_0 = arith.constant 0 : i32
    return %arg0, %c0_i32 : i32, i32
  }
  func.func @transform_1(%arg0: i32) -> (i32, i32) {
    %c0_i32 = arith.constant 0 : i32
    %c0_i32_0 = arith.constant 0 : i32
    return %arg0, %c0_i32 : i32, i32
  }
  func.func @transform_2(%arg0: i32) -> (i32, i32) {
    %c0_i32 = arith.constant 0 : i32
    %c0_i32_0 = arith.constant 0 : i32
    %c0_i32_1 = arith.constant 0 : i32
    return %c0_i32, %c0_i32_0 : i32, i32
  }
  func.func @transform_3(%arg0: i32) -> (i32, i32) {
    %c0_i32 = arith.constant 0 : i32
    %c0_i32_0 = arith.constant 0 : i32
    %c0_i32_1 = arith.constant 0 : i32
    return %c0_i32, %c0_i32_0 : i32, i32
  }
  func.func @transform_4(%arg0: i32) -> (i32, i32) {
    %c0_i32 = arith.constant 0 : i32
    %c0_i32_0 = arith.constant 0 : i32
    %c0_i32_1 = arith.constant 0 : i32
    return %c0_i32, %c0_i32_0 : i32, i32
  }
  func.func @transform_5(%arg0: i32) -> (i32, i32) {
    %c0_i32 = arith.constant 0 : i32
    %c0_i32_0 = arith.constant 0 : i32
    %c0_i32_1 = arith.constant 0 : i32
    return %c0_i32, %c0_i32_0 : i32, i32
  }
  func.func @transform_6(%arg0: i32) -> (i32, i32) {
    %c0_i32 = arith.constant 0 : i32
    %c0_i32_0 = arith.constant 0 : i32
    %c0_i32_1 = arith.constant 0 : i32
    return %c0_i32, %c0_i32_0 : i32, i32
  }
  func.func @transform_7(%arg0: i32) -> (i32, i32) {
    %c0_i32 = arith.constant 0 : i32
    %c0_i32_0 = arith.constant 0 : i32
    %c0_i32_1 = arith.constant 0 : i32
    return %c0_i32, %c0_i32_0 : i32, i32
  }
  func.func @transform_8(%arg0: i32) -> (i32, i32) {
    %c0_i32 = arith.constant 0 : i32
    %c0_i32_0 = arith.constant 0 : i32
    return %arg0, %c0_i32 : i32, i32
  }
  func.func @transform_9(%arg0: i32) -> (i32, i32) {
    %c0_i32 = arith.constant 0 : i32
    %c0_i32_0 = arith.constant 0 : i32
    return %arg0, %c0_i32 : i32, i32
  }
}

module attributes {stable_mosaic.version = 11 : i64} {
  func.func @_bigru_chunk_kernel(%arg0: i32, %arg1: memref<8x8x96xf32, #tpu.memory_space<vmem>>, %arg2: memref<8x8x96xf32, #tpu.memory_space<vmem>>, %arg3: memref<32x96xf32, #tpu.memory_space<vmem>>, %arg4: memref<32x96xf32, #tpu.memory_space<vmem>>, %arg5: memref<1x96xf32, #tpu.memory_space<vmem>>, %arg6: memref<1x96xf32, #tpu.memory_space<vmem>>, %arg7: memref<8x8x32xf32, #tpu.memory_space<vmem>>, %arg8: memref<8x8x32xf32, #tpu.memory_space<vmem>>, %arg9: memref<8x32xf32, #tpu.memory_space<vmem>>, %arg10: memref<8x32xf32, #tpu.memory_space<vmem>>) attributes {dimension_semantics = [#tpu.dimension_semantics<arbitrary>], iteration_bounds = array<i64: 1>, scalar_prefetch = 0 : i64, scratch_operands = 2 : i64, tpu.core_type = #tpu.core_type<tc>, window_params = [{transform_indices = @transform_0, window_bounds = array<i64: 8, 8, 96>}, {transform_indices = @transform_1, window_bounds = array<i64: 8, 8, 96>}, {pipeline_mode = #tpu.pipeline_mode<synchronous>, transform_indices = @transform_2, window_bounds = array<i64: 32, 96>}, {pipeline_mode = #tpu.pipeline_mode<synchronous>, transform_indices = @transform_3, window_bounds = array<i64: 32, 96>}, {pipeline_mode = #tpu.pipeline_mode<synchronous>, transform_indices = @transform_4, window_bounds = array<i64: 1, 96>}, {pipeline_mode = #tpu.pipeline_mode<synchronous>, transform_indices = @transform_5, window_bounds = array<i64: 1, 96>}, {transform_indices = @transform_6, window_bounds = array<i64: 8, 8, 32>}, {transform_indices = @transform_7, window_bounds = array<i64: 8, 8, 32>}]} {
    %c0_i32 = arith.constant 0 : i32
    %0 = arith.cmpi eq, %arg0, %c0_i32 : i32
    %1 = arith.extui %0 : i1 to i32
    %c0_i32_0 = arith.constant 0 : i32
    %2 = arith.cmpi ne, %1, %c0_i32_0 : i32
    scf.if %2 {
      %cst_152 = arith.constant 0.000000e+00 : f32
      %459 = vector.broadcast %cst_152 : f32 to vector<8x32xf32>
      %c0_153 = arith.constant 0 : index
      %c0_154 = arith.constant 0 : index
      %460 = vector.load %arg9[%c0_153, %c0_154] : memref<8x32xf32, #tpu.memory_space<vmem>>, vector<8x32xf32>
      tpu.vector_store %arg9[%c0_153, %c0_154], %459 {strides = array<i32>} : memref<8x32xf32, #tpu.memory_space<vmem>>, vector<8x32xf32>,
      %cst_155 = arith.constant 0.000000e+00 : f32
      %461 = vector.broadcast %cst_155 : f32 to vector<8x32xf32>
      %c0_156 = arith.constant 0 : index
      %c0_157 = arith.constant 0 : index
      %462 = vector.load %arg10[%c0_156, %c0_157] : memref<8x32xf32, #tpu.memory_space<vmem>>, vector<8x32xf32>
      tpu.vector_store %arg10[%c0_156, %c0_157], %461 {strides = array<i32>} : memref<8x32xf32, #tpu.memory_space<vmem>>, vector<8x32xf32>,
    } else {
    }
    %c0 = arith.constant 0 : index
    %c0_1 = arith.constant 0 : index
    %3 = vector.load %arg3[%c0, %c0_1] : memref<32x96xf32, #tpu.memory_space<vmem>>, vector<32x96xf32>
    %c0_2 = arith.constant 0 : index
    %c0_3 = arith.constant 0 : index
    %4 = vector.load %arg4[%c0_2, %c0_3] : memref<32x96xf32, #tpu.memory_space<vmem>>, vector<32x96xf32>
    %c0_4 = arith.constant 0 : index
    %c0_5 = arith.constant 0 : index
    %5 = vector.load %arg5[%c0_4, %c0_5] : memref<1x96xf32, #tpu.memory_space<vmem>>, vector<1x96xf32>
    %c0_6 = arith.constant 0 : index
    %c0_7 = arith.constant 0 : index
    %6 = vector.load %arg6[%c0_6, %c0_7] : memref<1x96xf32, #tpu.memory_space<vmem>>, vector<1x96xf32>
    %c0_8 = arith.constant 0 : index
    %c0_9 = arith.constant 0 : index
    %7 = vector.load %arg9[%c0_8, %c0_9] : memref<8x32xf32, #tpu.memory_space<vmem>>, vector<8x32xf32>
    %c0_10 = arith.constant 0 : index
    %c0_11 = arith.constant 0 : index
    %8 = vector.load %arg10[%c0_10, %c0_11] : memref<8x32xf32, #tpu.memory_space<vmem>>, vector<8x32xf32>
    %c0_12 = arith.constant 0 : index
    %c0_13 = arith.constant 0 : index
    %c0_14 = arith.constant 0 : index
    %9 = vector.load %arg1[%c0_12, %c0_13, %c0_14] : memref<8x8x96xf32, #tpu.memory_space<vmem>>, vector<1x8x96xf32>
    %10 = vector.shape_cast %9 : vector<1x8x96xf32> to vector<8x96xf32>
    %cst = arith.constant dense<0.000000e+00> : vector<8x96xf32>
    %11 = tpu.matmul %7, %3, %cst {dimension_numbers = #tpu.dot_dimension_numbers<[1], [0], [0], [1], [0, 0, 1, 1], [], []>} : vector<8x32xf32>, vector<32x96xf32>, vector<8x96xf32> -> vector<8x96xf32>
    %12 = vector.broadcast %5 : vector<1x96xf32> to vector<8x96xf32>
    %13 = arith.addf %11, %12 : vector<8x96xf32>
    %14 = vector.extract_strided_slice %10 {offsets = [0, 0], sizes = [8, 64], strides = [1, 1]} : vector<8x96xf32> to vector<8x64xf32>
    %15 = vector.extract_strided_slice %13 {offsets = [0, 0], sizes = [8, 64], strides = [1, 1]} : vector<8x96xf32> to vector<8x64xf32>
    %16 = arith.addf %14, %15 : vector<8x64xf32>
    %17 = arith.negf %16 : vector<8x64xf32>
    %18 = math.exp %17 : vector<8x64xf32>
    %cst_15 = arith.constant 1.000000e+00 : f32
    %19 = vector.broadcast %cst_15 : f32 to vector<8x64xf32>
    %20 = arith.addf %19, %18 : vector<8x64xf32>
    %21 = arith.divf %19, %20 : vector<8x64xf32>
    %22 = vector.extract_strided_slice %21 {offsets = [0, 0], sizes = [8, 32], strides = [1, 1]} : vector<8x64xf32> to vector<8x32xf32>
    %23 = vector.extract_strided_slice %21 {offsets = [0, 32], sizes = [8, 32], strides = [1, 1]} : vector<8x64xf32> to vector<8x32xf32>
    %24 = vector.extract_strided_slice %10 {offsets = [0, 64], sizes = [8, 32], strides = [1, 1]} : vector<8x96xf32> to vector<8x32xf32>
    %25 = vector.extract_strided_slice %13 {offsets = [0, 64], sizes = [8, 32], strides = [1, 1]} : vector<8x96xf32> to vector<8x32xf32>
    %26 = arith.mulf %22, %25 : vector<8x32xf32>
    %27 = arith.addf %24, %26 : vector<8x32xf32>
    %28 = math.tanh %27 : vector<8x32xf32>
    %cst_16 = arith.constant 1.000000e+00 : f32
    %29 = vector.broadcast %cst_16 : f32 to vector<8x32xf32>
    %30 = arith.subf %29, %23 : vector<8x32xf32>
    %31 = arith.mulf %30, %28 : vector<8x32xf32>
    %32 = arith.mulf %23, %7 : vector<8x32xf32>
    %33 = arith.addf %31, %32 : vector<8x32xf32>
    %c0_17 = arith.constant 0 : index
    %c0_18 = arith.constant 0 : index
    %c0_19 = arith.constant 0 : index
    %34 = vector.load %arg7[%c0_17, %c0_18, %c0_19] : memref<8x8x32xf32, #tpu.memory_space<vmem>>, vector<1x8x32xf32>
    %35 = vector.shape_cast %34 : vector<1x8x32xf32> to vector<8x32xf32>
    %36 = vector.shape_cast %33 : vector<8x32xf32> to vector<1x8x32xf32>
    tpu.vector_store %arg7[%c0_17, %c0_18, %c0_19], %36 {strides = array<i32>} : memref<8x8x32xf32, #tpu.memory_space<vmem>>, vector<1x8x32xf32>,
    %c7 = arith.constant 7 : index
    %c0_20 = arith.constant 0 : index
    %c0_21 = arith.constant 0 : index
    %37 = vector.load %arg2[%c7, %c0_20, %c0_21] : memref<8x8x96xf32, #tpu.memory_space<vmem>>, vector<1x8x96xf32>
    %38 = vector.shape_cast %37 : vector<1x8x96xf32> to vector<8x96xf32>
    %cst_22 = arith.constant dense<0.000000e+00> : vector<8x96xf32>
    %39 = tpu.matmul %8, %4, %cst_22 {dimension_numbers = #tpu.dot_dimension_numbers<[1], [0], [0], [1], [0, 0, 1, 1], [], []>} : vector<8x32xf32>, vector<32x96xf32>, vector<8x96xf32> -> vector<8x96xf32>
    %40 = vector.broadcast %6 : vector<1x96xf32> to vector<8x96xf32>
    %41 = arith.addf %39, %40 : vector<8x96xf32>
    %42 = vector.extract_strided_slice %38 {offsets = [0, 0], sizes = [8, 64], strides = [1, 1]} : vector<8x96xf32> to vector<8x64xf32>
    %43 = vector.extract_strided_slice %41 {offsets = [0, 0], sizes = [8, 64], strides = [1, 1]} : vector<8x96xf32> to vector<8x64xf32>
    %44 = arith.addf %42, %43 : vector<8x64xf32>
    %45 = arith.negf %44 : vector<8x64xf32>
    %46 = math.exp %45 : vector<8x64xf32>
    %cst_23 = arith.constant 1.000000e+00 : f32
    %47 = vector.broadcast %cst_23 : f32 to vector<8x64xf32>
    %48 = arith.addf %47, %46 : vector<8x64xf32>
    %49 = arith.divf %47, %48 : vector<8x64xf32>
    %50 = vector.extract_strided_slice %49 {offsets = [0, 0], sizes = [8, 32], strides = [1, 1]} : vector<8x64xf32> to vector<8x32xf32>
    %51 = vector.extract_strided_slice %49 {offsets = [0, 32], sizes = [8, 32], strides = [1, 1]} : vector<8x64xf32> to vector<8x32xf32>
    %52 = vector.extract_strided_slice %38 {offsets = [0, 64], sizes = [8, 32], strides = [1, 1]} : vector<8x96xf32> to vector<8x32xf32>
    %53 = vector.extract_strided_slice %41 {offsets = [0, 64], sizes = [8, 32], strides = [1, 1]} : vector<8x96xf32> to vector<8x32xf32>
    %54 = arith.mulf %50, %53 : vector<8x32xf32>
    %55 = arith.addf %52, %54 : vector<8x32xf32>
    %56 = math.tanh %55 : vector<8x32xf32>
    %cst_24 = arith.constant 1.000000e+00 : f32
    %57 = vector.broadcast %cst_24 : f32 to vector<8x32xf32>
    %58 = arith.subf %57, %51 : vector<8x32xf32>
    %59 = arith.mulf %58, %56 : vector<8x32xf32>
    %60 = arith.mulf %51, %8 : vector<8x32xf32>
    %61 = arith.addf %59, %60 : vector<8x32xf32>
    %c7_25 = arith.constant 7 : index
    %c0_26 = arith.constant 0 : index
    %c0_27 = arith.constant 0 : index
    %62 = vector.load %arg8[%c7_25, %c0_26, %c0_27] : memref<8x8x32xf32, #tpu.memory_space<vmem>>, vector<1x8x32xf32>
    %63 = vector.shape_cast %62 : vector<1x8x32xf32> to vector<8x32xf32>
    %64 = vector.shape_cast %61 : vector<8x32xf32> to vector<1x8x32xf32>
    tpu.vector_store %arg8[%c7_25, %c0_26, %c0_27], %64 {strides = array<i32>} : memref<8x8x32xf32, #tpu.memory_space<vmem>>, vector<1x8x32xf32>,
    %c1 = arith.constant 1 : index
    %c0_28 = arith.constant 0 : index
    %c0_29 = arith.constant 0 : index
    %65 = vector.load %arg1[%c1, %c0_28, %c0_29] : memref<8x8x96xf32, #tpu.memory_space<vmem>>, vector<1x8x96xf32>
    %66 = vector.shape_cast %65 : vector<1x8x96xf32> to vector<8x96xf32>
    %cst_30 = arith.constant dense<0.000000e+00> : vector<8x96xf32>
    %67 = tpu.matmul %33, %3, %cst_30 {dimension_numbers = #tpu.dot_dimension_numbers<[1], [0], [0], [1], [0, 0, 1, 1], [], []>} : vector<8x32xf32>, vector<32x96xf32>, vector<8x96xf32> -> vector<8x96xf32>
    %68 = vector.broadcast %5 : vector<1x96xf32> to vector<8x96xf32>
    %69 = arith.addf %67, %68 : vector<8x96xf32>
    %70 = vector.extract_strided_slice %66 {offsets = [0, 0], sizes = [8, 64], strides = [1, 1]} : vector<8x96xf32> to vector<8x64xf32>
    %71 = vector.extract_strided_slice %69 {offsets = [0, 0], sizes = [8, 64], strides = [1, 1]} : vector<8x96xf32> to vector<8x64xf32>
    %72 = arith.addf %70, %71 : vector<8x64xf32>
    %73 = arith.negf %72 : vector<8x64xf32>
    %74 = math.exp %73 : vector<8x64xf32>
    %cst_31 = arith.constant 1.000000e+00 : f32
    %75 = vector.broadcast %cst_31 : f32 to vector<8x64xf32>
    %76 = arith.addf %75, %74 : vector<8x64xf32>
    %77 = arith.divf %75, %76 : vector<8x64xf32>
    %78 = vector.extract_strided_slice %77 {offsets = [0, 0], sizes = [8, 32], strides = [1, 1]} : vector<8x64xf32> to vector<8x32xf32>
    %79 = vector.extract_strided_slice %77 {offsets = [0, 32], sizes = [8, 32], strides = [1, 1]} : vector<8x64xf32> to vector<8x32xf32>
    %80 = vector.extract_strided_slice %66 {offsets = [0, 64], sizes = [8, 32], strides = [1, 1]} : vector<8x96xf32> to vector<8x32xf32>
    %81 = vector.extract_strided_slice %69 {offsets = [0, 64], sizes = [8, 32], strides = [1, 1]} : vector<8x96xf32> to vector<8x32xf32>
    %82 = arith.mulf %78, %81 : vector<8x32xf32>
    %83 = arith.addf %80, %82 : vector<8x32xf32>
    %84 = math.tanh %83 : vector<8x32xf32>
    %cst_32 = arith.constant 1.000000e+00 : f32
    %85 = vector.broadcast %cst_32 : f32 to vector<8x32xf32>
    %86 = arith.subf %85, %79 : vector<8x32xf32>
    %87 = arith.mulf %86, %84 : vector<8x32xf32>
    %88 = arith.mulf %79, %33 : vector<8x32xf32>
    %89 = arith.addf %87, %88 : vector<8x32xf32>
    %c1_33 = arith.constant 1 : index
    %c0_34 = arith.constant 0 : index
    %c0_35 = arith.constant 0 : index
    %90 = vector.load %arg7[%c1_33, %c0_34, %c0_35] : memref<8x8x32xf32, #tpu.memory_space<vmem>>, vector<1x8x32xf32>
    %91 = vector.shape_cast %90 : vector<1x8x32xf32> to vector<8x32xf32>
    %92 = vector.shape_cast %89 : vector<8x32xf32> to vector<1x8x32xf32>
    tpu.vector_store %arg7[%c1_33, %c0_34, %c0_35], %92 {strides = array<i32>} : memref<8x8x32xf32, #tpu.memory_space<vmem>>, vector<1x8x32xf32>,
    %c6 = arith.constant 6 : index
    %c0_36 = arith.constant 0 : index
    %c0_37 = arith.constant 0 : index
    %93 = vector.load %arg2[%c6, %c0_36, %c0_37] : memref<8x8x96xf32, #tpu.memory_space<vmem>>, vector<1x8x96xf32>
    %94 = vector.shape_cast %93 : vector<1x8x96xf32> to vector<8x96xf32>
    %cst_38 = arith.constant dense<0.000000e+00> : vector<8x96xf32>
    %95 = tpu.matmul %61, %4, %cst_38 {dimension_numbers = #tpu.dot_dimension_numbers<[1], [0], [0], [1], [0, 0, 1, 1], [], []>} : vector<8x32xf32>, vector<32x96xf32>, vector<8x96xf32> -> vector<8x96xf32>
    %96 = vector.broadcast %6 : vector<1x96xf32> to vector<8x96xf32>
    %97 = arith.addf %95, %96 : vector<8x96xf32>
    %98 = vector.extract_strided_slice %94 {offsets = [0, 0], sizes = [8, 64], strides = [1, 1]} : vector<8x96xf32> to vector<8x64xf32>
    %99 = vector.extract_strided_slice %97 {offsets = [0, 0], sizes = [8, 64], strides = [1, 1]} : vector<8x96xf32> to vector<8x64xf32>
    %100 = arith.addf %98, %99 : vector<8x64xf32>
    %101 = arith.negf %100 : vector<8x64xf32>
    %102 = math.exp %101 : vector<8x64xf32>
    %cst_39 = arith.constant 1.000000e+00 : f32
    %103 = vector.broadcast %cst_39 : f32 to vector<8x64xf32>
    %104 = arith.addf %103, %102 : vector<8x64xf32>
    %105 = arith.divf %103, %104 : vector<8x64xf32>
    %106 = vector.extract_strided_slice %105 {offsets = [0, 0], sizes = [8, 32], strides = [1, 1]} : vector<8x64xf32> to vector<8x32xf32>
    %107 = vector.extract_strided_slice %105 {offsets = [0, 32], sizes = [8, 32], strides = [1, 1]} : vector<8x64xf32> to vector<8x32xf32>
    %108 = vector.extract_strided_slice %94 {offsets = [0, 64], sizes = [8, 32], strides = [1, 1]} : vector<8x96xf32> to vector<8x32xf32>
    %109 = vector.extract_strided_slice %97 {offsets = [0, 64], sizes = [8, 32], strides = [1, 1]} : vector<8x96xf32> to vector<8x32xf32>
    %110 = arith.mulf %106, %109 : vector<8x32xf32>
    %111 = arith.addf %108, %110 : vector<8x32xf32>
    %112 = math.tanh %111 : vector<8x32xf32>
    %cst_40 = arith.constant 1.000000e+00 : f32
    %113 = vector.broadcast %cst_40 : f32 to vector<8x32xf32>
    %114 = arith.subf %113, %107 : vector<8x32xf32>
    %115 = arith.mulf %114, %112 : vector<8x32xf32>
    %116 = arith.mulf %107, %61 : vector<8x32xf32>
    %117 = arith.addf %115, %116 : vector<8x32xf32>
    %c6_41 = arith.constant 6 : index
    %c0_42 = arith.constant 0 : index
    %c0_43 = arith.constant 0 : index
    %118 = vector.load %arg8[%c6_41, %c0_42, %c0_43] : memref<8x8x32xf32, #tpu.memory_space<vmem>>, vector<1x8x32xf32>
    %119 = vector.shape_cast %118 : vector<1x8x32xf32> to vector<8x32xf32>
    %120 = vector.shape_cast %117 : vector<8x32xf32> to vector<1x8x32xf32>
    tpu.vector_store %arg8[%c6_41, %c0_42, %c0_43], %120 {strides = array<i32>} : memref<8x8x32xf32, #tpu.memory_space<vmem>>, vector<1x8x32xf32>,
    %c2 = arith.constant 2 : index
    %c0_44 = arith.constant 0 : index
    %c0_45 = arith.constant 0 : index
    %121 = vector.load %arg1[%c2, %c0_44, %c0_45] : memref<8x8x96xf32, #tpu.memory_space<vmem>>, vector<1x8x96xf32>
    %122 = vector.shape_cast %121 : vector<1x8x96xf32> to vector<8x96xf32>
    %cst_46 = arith.constant dense<0.000000e+00> : vector<8x96xf32>
    %123 = tpu.matmul %89, %3, %cst_46 {dimension_numbers = #tpu.dot_dimension_numbers<[1], [0], [0], [1], [0, 0, 1, 1], [], []>} : vector<8x32xf32>, vector<32x96xf32>, vector<8x96xf32> -> vector<8x96xf32>
    %124 = vector.broadcast %5 : vector<1x96xf32> to vector<8x96xf32>
    %125 = arith.addf %123, %124 : vector<8x96xf32>
    %126 = vector.extract_strided_slice %122 {offsets = [0, 0], sizes = [8, 64], strides = [1, 1]} : vector<8x96xf32> to vector<8x64xf32>
    %127 = vector.extract_strided_slice %125 {offsets = [0, 0], sizes = [8, 64], strides = [1, 1]} : vector<8x96xf32> to vector<8x64xf32>
    %128 = arith.addf %126, %127 : vector<8x64xf32>
    %129 = arith.negf %128 : vector<8x64xf32>
    %130 = math.exp %129 : vector<8x64xf32>
    %cst_47 = arith.constant 1.000000e+00 : f32
    %131 = vector.broadcast %cst_47 : f32 to vector<8x64xf32>
    %132 = arith.addf %131, %130 : vector<8x64xf32>
    %133 = arith.divf %131, %132 : vector<8x64xf32>
    %134 = vector.extract_strided_slice %133 {offsets = [0, 0], sizes = [8, 32], strides = [1, 1]} : vector<8x64xf32> to vector<8x32xf32>
    %135 = vector.extract_strided_slice %133 {offsets = [0, 32], sizes = [8, 32], strides = [1, 1]} : vector<8x64xf32> to vector<8x32xf32>
    %136 = vector.extract_strided_slice %122 {offsets = [0, 64], sizes = [8, 32], strides = [1, 1]} : vector<8x96xf32> to vector<8x32xf32>
    %137 = vector.extract_strided_slice %125 {offsets = [0, 64], sizes = [8, 32], strides = [1, 1]} : vector<8x96xf32> to vector<8x32xf32>
    %138 = arith.mulf %134, %137 : vector<8x32xf32>
    %139 = arith.addf %136, %138 : vector<8x32xf32>
    %140 = math.tanh %139 : vector<8x32xf32>
    %cst_48 = arith.constant 1.000000e+00 : f32
    %141 = vector.broadcast %cst_48 : f32 to vector<8x32xf32>
    %142 = arith.subf %141, %135 : vector<8x32xf32>
    %143 = arith.mulf %142, %140 : vector<8x32xf32>
    %144 = arith.mulf %135, %89 : vector<8x32xf32>
    %145 = arith.addf %143, %144 : vector<8x32xf32>
    %c2_49 = arith.constant 2 : index
    %c0_50 = arith.constant 0 : index
    %c0_51 = arith.constant 0 : index
    %146 = vector.load %arg7[%c2_49, %c0_50, %c0_51] : memref<8x8x32xf32, #tpu.memory_space<vmem>>, vector<1x8x32xf32>
    %147 = vector.shape_cast %146 : vector<1x8x32xf32> to vector<8x32xf32>
    %148 = vector.shape_cast %145 : vector<8x32xf32> to vector<1x8x32xf32>
    tpu.vector_store %arg7[%c2_49, %c0_50, %c0_51], %148 {strides = array<i32>} : memref<8x8x32xf32, #tpu.memory_space<vmem>>, vector<1x8x32xf32>,
    %c5 = arith.constant 5 : index
    %c0_52 = arith.constant 0 : index
    %c0_53 = arith.constant 0 : index
    %149 = vector.load %arg2[%c5, %c0_52, %c0_53] : memref<8x8x96xf32, #tpu.memory_space<vmem>>, vector<1x8x96xf32>
    %150 = vector.shape_cast %149 : vector<1x8x96xf32> to vector<8x96xf32>
    %cst_54 = arith.constant dense<0.000000e+00> : vector<8x96xf32>
    %151 = tpu.matmul %117, %4, %cst_54 {dimension_numbers = #tpu.dot_dimension_numbers<[1], [0], [0], [1], [0, 0, 1, 1], [], []>} : vector<8x32xf32>, vector<32x96xf32>, vector<8x96xf32> -> vector<8x96xf32>
    %152 = vector.broadcast %6 : vector<1x96xf32> to vector<8x96xf32>
    %153 = arith.addf %151, %152 : vector<8x96xf32>
    %154 = vector.extract_strided_slice %150 {offsets = [0, 0], sizes = [8, 64], strides = [1, 1]} : vector<8x96xf32> to vector<8x64xf32>
    %155 = vector.extract_strided_slice %153 {offsets = [0, 0], sizes = [8, 64], strides = [1, 1]} : vector<8x96xf32> to vector<8x64xf32>
    %156 = arith.addf %154, %155 : vector<8x64xf32>
    %157 = arith.negf %156 : vector<8x64xf32>
    %158 = math.exp %157 : vector<8x64xf32>
    %cst_55 = arith.constant 1.000000e+00 : f32
    %159 = vector.broadcast %cst_55 : f32 to vector<8x64xf32>
    %160 = arith.addf %159, %158 : vector<8x64xf32>
    %161 = arith.divf %159, %160 : vector<8x64xf32>
    %162 = vector.extract_strided_slice %161 {offsets = [0, 0], sizes = [8, 32], strides = [1, 1]} : vector<8x64xf32> to vector<8x32xf32>
    %163 = vector.extract_strided_slice %161 {offsets = [0, 32], sizes = [8, 32], strides = [1, 1]} : vector<8x64xf32> to vector<8x32xf32>
    %164 = vector.extract_strided_slice %150 {offsets = [0, 64], sizes = [8, 32], strides = [1, 1]} : vector<8x96xf32> to vector<8x32xf32>
    %165 = vector.extract_strided_slice %153 {offsets = [0, 64], sizes = [8, 32], strides = [1, 1]} : vector<8x96xf32> to vector<8x32xf32>
    %166 = arith.mulf %162, %165 : vector<8x32xf32>
    %167 = arith.addf %164, %166 : vector<8x32xf32>
    %168 = math.tanh %167 : vector<8x32xf32>
    %cst_56 = arith.constant 1.000000e+00 : f32
    %169 = vector.broadcast %cst_56 : f32 to vector<8x32xf32>
    %170 = arith.subf %169, %163 : vector<8x32xf32>
    %171 = arith.mulf %170, %168 : vector<8x32xf32>
    %172 = arith.mulf %163, %117 : vector<8x32xf32>
    %173 = arith.addf %171, %172 : vector<8x32xf32>
    %c5_57 = arith.constant 5 : index
    %c0_58 = arith.constant 0 : index
    %c0_59 = arith.constant 0 : index
    %174 = vector.load %arg8[%c5_57, %c0_58, %c0_59] : memref<8x8x32xf32, #tpu.memory_space<vmem>>, vector<1x8x32xf32>
    %175 = vector.shape_cast %174 : vector<1x8x32xf32> to vector<8x32xf32>
    %176 = vector.shape_cast %173 : vector<8x32xf32> to vector<1x8x32xf32>
    tpu.vector_store %arg8[%c5_57, %c0_58, %c0_59], %176 {strides = array<i32>} : memref<8x8x32xf32, #tpu.memory_space<vmem>>, vector<1x8x32xf32>,
    %c3 = arith.constant 3 : index
    %c0_60 = arith.constant 0 : index
    %c0_61 = arith.constant 0 : index
    %177 = vector.load %arg1[%c3, %c0_60, %c0_61] : memref<8x8x96xf32, #tpu.memory_space<vmem>>, vector<1x8x96xf32>
    %178 = vector.shape_cast %177 : vector<1x8x96xf32> to vector<8x96xf32>
    %cst_62 = arith.constant dense<0.000000e+00> : vector<8x96xf32>
    %179 = tpu.matmul %145, %3, %cst_62 {dimension_numbers = #tpu.dot_dimension_numbers<[1], [0], [0], [1], [0, 0, 1, 1], [], []>} : vector<8x32xf32>, vector<32x96xf32>, vector<8x96xf32> -> vector<8x96xf32>
    %180 = vector.broadcast %5 : vector<1x96xf32> to vector<8x96xf32>
    %181 = arith.addf %179, %180 : vector<8x96xf32>
    %182 = vector.extract_strided_slice %178 {offsets = [0, 0], sizes = [8, 64], strides = [1, 1]} : vector<8x96xf32> to vector<8x64xf32>
    %183 = vector.extract_strided_slice %181 {offsets = [0, 0], sizes = [8, 64], strides = [1, 1]} : vector<8x96xf32> to vector<8x64xf32>
    %184 = arith.addf %182, %183 : vector<8x64xf32>
    %185 = arith.negf %184 : vector<8x64xf32>
    %186 = math.exp %185 : vector<8x64xf32>
    %cst_63 = arith.constant 1.000000e+00 : f32
    %187 = vector.broadcast %cst_63 : f32 to vector<8x64xf32>
    %188 = arith.addf %187, %186 : vector<8x64xf32>
    %189 = arith.divf %187, %188 : vector<8x64xf32>
    %190 = vector.extract_strided_slice %189 {offsets = [0, 0], sizes = [8, 32], strides = [1, 1]} : vector<8x64xf32> to vector<8x32xf32>
    %191 = vector.extract_strided_slice %189 {offsets = [0, 32], sizes = [8, 32], strides = [1, 1]} : vector<8x64xf32> to vector<8x32xf32>
    %192 = vector.extract_strided_slice %178 {offsets = [0, 64], sizes = [8, 32], strides = [1, 1]} : vector<8x96xf32> to vector<8x32xf32>
    %193 = vector.extract_strided_slice %181 {offsets = [0, 64], sizes = [8, 32], strides = [1, 1]} : vector<8x96xf32> to vector<8x32xf32>
    %194 = arith.mulf %190, %193 : vector<8x32xf32>
    %195 = arith.addf %192, %194 : vector<8x32xf32>
    %196 = math.tanh %195 : vector<8x32xf32>
    %cst_64 = arith.constant 1.000000e+00 : f32
    %197 = vector.broadcast %cst_64 : f32 to vector<8x32xf32>
    %198 = arith.subf %197, %191 : vector<8x32xf32>
    %199 = arith.mulf %198, %196 : vector<8x32xf32>
    %200 = arith.mulf %191, %145 : vector<8x32xf32>
    %201 = arith.addf %199, %200 : vector<8x32xf32>
    %c3_65 = arith.constant 3 : index
    %c0_66 = arith.constant 0 : index
    %c0_67 = arith.constant 0 : index
    %202 = vector.load %arg7[%c3_65, %c0_66, %c0_67] : memref<8x8x32xf32, #tpu.memory_space<vmem>>, vector<1x8x32xf32>
    %203 = vector.shape_cast %202 : vector<1x8x32xf32> to vector<8x32xf32>
    %204 = vector.shape_cast %201 : vector<8x32xf32> to vector<1x8x32xf32>
    tpu.vector_store %arg7[%c3_65, %c0_66, %c0_67], %204 {strides = array<i32>} : memref<8x8x32xf32, #tpu.memory_space<vmem>>, vector<1x8x32xf32>,
    %c4 = arith.constant 4 : index
    %c0_68 = arith.constant 0 : index
    %c0_69 = arith.constant 0 : index
    %205 = vector.load %arg2[%c4, %c0_68, %c0_69] : memref<8x8x96xf32, #tpu.memory_space<vmem>>, vector<1x8x96xf32>
    %206 = vector.shape_cast %205 : vector<1x8x96xf32> to vector<8x96xf32>
    %cst_70 = arith.constant dense<0.000000e+00> : vector<8x96xf32>
    %207 = tpu.matmul %173, %4, %cst_70 {dimension_numbers = #tpu.dot_dimension_numbers<[1], [0], [0], [1], [0, 0, 1, 1], [], []>} : vector<8x32xf32>, vector<32x96xf32>, vector<8x96xf32> -> vector<8x96xf32>
    %208 = vector.broadcast %6 : vector<1x96xf32> to vector<8x96xf32>
    %209 = arith.addf %207, %208 : vector<8x96xf32>
    %210 = vector.extract_strided_slice %206 {offsets = [0, 0], sizes = [8, 64], strides = [1, 1]} : vector<8x96xf32> to vector<8x64xf32>
    %211 = vector.extract_strided_slice %209 {offsets = [0, 0], sizes = [8, 64], strides = [1, 1]} : vector<8x96xf32> to vector<8x64xf32>
    %212 = arith.addf %210, %211 : vector<8x64xf32>
    %213 = arith.negf %212 : vector<8x64xf32>
    %214 = math.exp %213 : vector<8x64xf32>
    %cst_71 = arith.constant 1.000000e+00 : f32
    %215 = vector.broadcast %cst_71 : f32 to vector<8x64xf32>
    %216 = arith.addf %215, %214 : vector<8x64xf32>
    %217 = arith.divf %215, %216 : vector<8x64xf32>
    %218 = vector.extract_strided_slice %217 {offsets = [0, 0], sizes = [8, 32], strides = [1, 1]} : vector<8x64xf32> to vector<8x32xf32>
    %219 = vector.extract_strided_slice %217 {offsets = [0, 32], sizes = [8, 32], strides = [1, 1]} : vector<8x64xf32> to vector<8x32xf32>
    %220 = vector.extract_strided_slice %206 {offsets = [0, 64], sizes = [8, 32], strides = [1, 1]} : vector<8x96xf32> to vector<8x32xf32>
    %221 = vector.extract_strided_slice %209 {offsets = [0, 64], sizes = [8, 32], strides = [1, 1]} : vector<8x96xf32> to vector<8x32xf32>
    %222 = arith.mulf %218, %221 : vector<8x32xf32>
    %223 = arith.addf %220, %222 : vector<8x32xf32>
    %224 = math.tanh %223 : vector<8x32xf32>
    %cst_72 = arith.constant 1.000000e+00 : f32
    %225 = vector.broadcast %cst_72 : f32 to vector<8x32xf32>
    %226 = arith.subf %225, %219 : vector<8x32xf32>
    %227 = arith.mulf %226, %224 : vector<8x32xf32>
    %228 = arith.mulf %219, %173 : vector<8x32xf32>
    %229 = arith.addf %227, %228 : vector<8x32xf32>
    %c4_73 = arith.constant 4 : index
    %c0_74 = arith.constant 0 : index
    %c0_75 = arith.constant 0 : index
    %230 = vector.load %arg8[%c4_73, %c0_74, %c0_75] : memref<8x8x32xf32, #tpu.memory_space<vmem>>, vector<1x8x32xf32>
    %231 = vector.shape_cast %230 : vector<1x8x32xf32> to vector<8x32xf32>
    %232 = vector.shape_cast %229 : vector<8x32xf32> to vector<1x8x32xf32>
    tpu.vector_store %arg8[%c4_73, %c0_74, %c0_75], %232 {strides = array<i32>} : memref<8x8x32xf32, #tpu.memory_space<vmem>>, vector<1x8x32xf32>,
    %c4_76 = arith.constant 4 : index
    %c0_77 = arith.constant 0 : index
    %c0_78 = arith.constant 0 : index
    %233 = vector.load %arg1[%c4_76, %c0_77, %c0_78] : memref<8x8x96xf32, #tpu.memory_space<vmem>>, vector<1x8x96xf32>
    %234 = vector.shape_cast %233 : vector<1x8x96xf32> to vector<8x96xf32>
    %cst_79 = arith.constant dense<0.000000e+00> : vector<8x96xf32>
    %235 = tpu.matmul %201, %3, %cst_79 {dimension_numbers = #tpu.dot_dimension_numbers<[1], [0], [0], [1], [0, 0, 1, 1], [], []>} : vector<8x32xf32>, vector<32x96xf32>, vector<8x96xf32> -> vector<8x96xf32>
    %236 = vector.broadcast %5 : vector<1x96xf32> to vector<8x96xf32>
    %237 = arith.addf %235, %236 : vector<8x96xf32>
    %238 = vector.extract_strided_slice %234 {offsets = [0, 0], sizes = [8, 64], strides = [1, 1]} : vector<8x96xf32> to vector<8x64xf32>
    %239 = vector.extract_strided_slice %237 {offsets = [0, 0], sizes = [8, 64], strides = [1, 1]} : vector<8x96xf32> to vector<8x64xf32>
    %240 = arith.addf %238, %239 : vector<8x64xf32>
    %241 = arith.negf %240 : vector<8x64xf32>
    %242 = math.exp %241 : vector<8x64xf32>
    %cst_80 = arith.constant 1.000000e+00 : f32
    %243 = vector.broadcast %cst_80 : f32 to vector<8x64xf32>
    %244 = arith.addf %243, %242 : vector<8x64xf32>
    %245 = arith.divf %243, %244 : vector<8x64xf32>
    %246 = vector.extract_strided_slice %245 {offsets = [0, 0], sizes = [8, 32], strides = [1, 1]} : vector<8x64xf32> to vector<8x32xf32>
    %247 = vector.extract_strided_slice %245 {offsets = [0, 32], sizes = [8, 32], strides = [1, 1]} : vector<8x64xf32> to vector<8x32xf32>
    %248 = vector.extract_strided_slice %234 {offsets = [0, 64], sizes = [8, 32], strides = [1, 1]} : vector<8x96xf32> to vector<8x32xf32>
    %249 = vector.extract_strided_slice %237 {offsets = [0, 64], sizes = [8, 32], strides = [1, 1]} : vector<8x96xf32> to vector<8x32xf32>
    %250 = arith.mulf %246, %249 : vector<8x32xf32>
    %251 = arith.addf %248, %250 : vector<8x32xf32>
    %252 = math.tanh %251 : vector<8x32xf32>
    %cst_81 = arith.constant 1.000000e+00 : f32
    %253 = vector.broadcast %cst_81 : f32 to vector<8x32xf32>
    %254 = arith.subf %253, %247 : vector<8x32xf32>
    %255 = arith.mulf %254, %252 : vector<8x32xf32>
    %256 = arith.mulf %247, %201 : vector<8x32xf32>
    %257 = arith.addf %255, %256 : vector<8x32xf32>
    %c4_82 = arith.constant 4 : index
    %c0_83 = arith.constant 0 : index
    %c0_84 = arith.constant 0 : index
    %258 = vector.load %arg7[%c4_82, %c0_83, %c0_84] : memref<8x8x32xf32, #tpu.memory_space<vmem>>, vector<1x8x32xf32>
    %259 = vector.shape_cast %258 : vector<1x8x32xf32> to vector<8x32xf32>
    %260 = vector.shape_cast %257 : vector<8x32xf32> to vector<1x8x32xf32>
    tpu.vector_store %arg7[%c4_82, %c0_83, %c0_84], %260 {strides = array<i32>} : memref<8x8x32xf32, #tpu.memory_space<vmem>>, vector<1x8x32xf32>,
    %c3_85 = arith.constant 3 : index
    %c0_86 = arith.constant 0 : index
    %c0_87 = arith.constant 0 : index
    %261 = vector.load %arg2[%c3_85, %c0_86, %c0_87] : memref<8x8x96xf32, #tpu.memory_space<vmem>>, vector<1x8x96xf32>
    %262 = vector.shape_cast %261 : vector<1x8x96xf32> to vector<8x96xf32>
    %cst_88 = arith.constant dense<0.000000e+00> : vector<8x96xf32>
    %263 = tpu.matmul %229, %4, %cst_88 {dimension_numbers = #tpu.dot_dimension_numbers<[1], [0], [0], [1], [0, 0, 1, 1], [], []>} : vector<8x32xf32>, vector<32x96xf32>, vector<8x96xf32> -> vector<8x96xf32>
    %264 = vector.broadcast %6 : vector<1x96xf32> to vector<8x96xf32>
    %265 = arith.addf %263, %264 : vector<8x96xf32>
    %266 = vector.extract_strided_slice %262 {offsets = [0, 0], sizes = [8, 64], strides = [1, 1]} : vector<8x96xf32> to vector<8x64xf32>
    %267 = vector.extract_strided_slice %265 {offsets = [0, 0], sizes = [8, 64], strides = [1, 1]} : vector<8x96xf32> to vector<8x64xf32>
    %268 = arith.addf %266, %267 : vector<8x64xf32>
    %269 = arith.negf %268 : vector<8x64xf32>
    %270 = math.exp %269 : vector<8x64xf32>
    %cst_89 = arith.constant 1.000000e+00 : f32
    %271 = vector.broadcast %cst_89 : f32 to vector<8x64xf32>
    %272 = arith.addf %271, %270 : vector<8x64xf32>
    %273 = arith.divf %271, %272 : vector<8x64xf32>
    %274 = vector.extract_strided_slice %273 {offsets = [0, 0], sizes = [8, 32], strides = [1, 1]} : vector<8x64xf32> to vector<8x32xf32>
    %275 = vector.extract_strided_slice %273 {offsets = [0, 32], sizes = [8, 32], strides = [1, 1]} : vector<8x64xf32> to vector<8x32xf32>
    %276 = vector.extract_strided_slice %262 {offsets = [0, 64], sizes = [8, 32], strides = [1, 1]} : vector<8x96xf32> to vector<8x32xf32>
    %277 = vector.extract_strided_slice %265 {offsets = [0, 64], sizes = [8, 32], strides = [1, 1]} : vector<8x96xf32> to vector<8x32xf32>
    %278 = arith.mulf %274, %277 : vector<8x32xf32>
    %279 = arith.addf %276, %278 : vector<8x32xf32>
    %280 = math.tanh %279 : vector<8x32xf32>
    %cst_90 = arith.constant 1.000000e+00 : f32
    %281 = vector.broadcast %cst_90 : f32 to vector<8x32xf32>
    %282 = arith.subf %281, %275 : vector<8x32xf32>
    %283 = arith.mulf %282, %280 : vector<8x32xf32>
    %284 = arith.mulf %275, %229 : vector<8x32xf32>
    %285 = arith.addf %283, %284 : vector<8x32xf32>
    %c3_91 = arith.constant 3 : index
    %c0_92 = arith.constant 0 : index
    %c0_93 = arith.constant 0 : index
    %286 = vector.load %arg8[%c3_91, %c0_92, %c0_93] : memref<8x8x32xf32, #tpu.memory_space<vmem>>, vector<1x8x32xf32>
    %287 = vector.shape_cast %286 : vector<1x8x32xf32> to vector<8x32xf32>
    %288 = vector.shape_cast %285 : vector<8x32xf32> to vector<1x8x32xf32>
    tpu.vector_store %arg8[%c3_91, %c0_92, %c0_93], %288 {strides = array<i32>} : memref<8x8x32xf32, #tpu.memory_space<vmem>>, vector<1x8x32xf32>,
    %c5_94 = arith.constant 5 : index
    %c0_95 = arith.constant 0 : index
    %c0_96 = arith.constant 0 : index
    %289 = vector.load %arg1[%c5_94, %c0_95, %c0_96] : memref<8x8x96xf32, #tpu.memory_space<vmem>>, vector<1x8x96xf32>
    %290 = vector.shape_cast %289 : vector<1x8x96xf32> to vector<8x96xf32>
    %cst_97 = arith.constant dense<0.000000e+00> : vector<8x96xf32>
    %291 = tpu.matmul %257, %3, %cst_97 {dimension_numbers = #tpu.dot_dimension_numbers<[1], [0], [0], [1], [0, 0, 1, 1], [], []>} : vector<8x32xf32>, vector<32x96xf32>, vector<8x96xf32> -> vector<8x96xf32>
    %292 = vector.broadcast %5 : vector<1x96xf32> to vector<8x96xf32>
    %293 = arith.addf %291, %292 : vector<8x96xf32>
    %294 = vector.extract_strided_slice %290 {offsets = [0, 0], sizes = [8, 64], strides = [1, 1]} : vector<8x96xf32> to vector<8x64xf32>
    %295 = vector.extract_strided_slice %293 {offsets = [0, 0], sizes = [8, 64], strides = [1, 1]} : vector<8x96xf32> to vector<8x64xf32>
    %296 = arith.addf %294, %295 : vector<8x64xf32>
    %297 = arith.negf %296 : vector<8x64xf32>
    %298 = math.exp %297 : vector<8x64xf32>
    %cst_98 = arith.constant 1.000000e+00 : f32
    %299 = vector.broadcast %cst_98 : f32 to vector<8x64xf32>
    %300 = arith.addf %299, %298 : vector<8x64xf32>
    %301 = arith.divf %299, %300 : vector<8x64xf32>
    %302 = vector.extract_strided_slice %301 {offsets = [0, 0], sizes = [8, 32], strides = [1, 1]} : vector<8x64xf32> to vector<8x32xf32>
    %303 = vector.extract_strided_slice %301 {offsets = [0, 32], sizes = [8, 32], strides = [1, 1]} : vector<8x64xf32> to vector<8x32xf32>
    %304 = vector.extract_strided_slice %290 {offsets = [0, 64], sizes = [8, 32], strides = [1, 1]} : vector<8x96xf32> to vector<8x32xf32>
    %305 = vector.extract_strided_slice %293 {offsets = [0, 64], sizes = [8, 32], strides = [1, 1]} : vector<8x96xf32> to vector<8x32xf32>
    %306 = arith.mulf %302, %305 : vector<8x32xf32>
    %307 = arith.addf %304, %306 : vector<8x32xf32>
    %308 = math.tanh %307 : vector<8x32xf32>
    %cst_99 = arith.constant 1.000000e+00 : f32
    %309 = vector.broadcast %cst_99 : f32 to vector<8x32xf32>
    %310 = arith.subf %309, %303 : vector<8x32xf32>
    %311 = arith.mulf %310, %308 : vector<8x32xf32>
    %312 = arith.mulf %303, %257 : vector<8x32xf32>
    %313 = arith.addf %311, %312 : vector<8x32xf32>
    %c5_100 = arith.constant 5 : index
    %c0_101 = arith.constant 0 : index
    %c0_102 = arith.constant 0 : index
    %314 = vector.load %arg7[%c5_100, %c0_101, %c0_102] : memref<8x8x32xf32, #tpu.memory_space<vmem>>, vector<1x8x32xf32>
    %315 = vector.shape_cast %314 : vector<1x8x32xf32> to vector<8x32xf32>
    %316 = vector.shape_cast %313 : vector<8x32xf32> to vector<1x8x32xf32>
    tpu.vector_store %arg7[%c5_100, %c0_101, %c0_102], %316 {strides = array<i32>} : memref<8x8x32xf32, #tpu.memory_space<vmem>>, vector<1x8x32xf32>,
    %c2_103 = arith.constant 2 : index
    %c0_104 = arith.constant 0 : index
    %c0_105 = arith.constant 0 : index
    %317 = vector.load %arg2[%c2_103, %c0_104, %c0_105] : memref<8x8x96xf32, #tpu.memory_space<vmem>>, vector<1x8x96xf32>
    %318 = vector.shape_cast %317 : vector<1x8x96xf32> to vector<8x96xf32>
    %cst_106 = arith.constant dense<0.000000e+00> : vector<8x96xf32>
    %319 = tpu.matmul %285, %4, %cst_106 {dimension_numbers = #tpu.dot_dimension_numbers<[1], [0], [0], [1], [0, 0, 1, 1], [], []>} : vector<8x32xf32>, vector<32x96xf32>, vector<8x96xf32> -> vector<8x96xf32>
    %320 = vector.broadcast %6 : vector<1x96xf32> to vector<8x96xf32>
    %321 = arith.addf %319, %320 : vector<8x96xf32>
    %322 = vector.extract_strided_slice %318 {offsets = [0, 0], sizes = [8, 64], strides = [1, 1]} : vector<8x96xf32> to vector<8x64xf32>
    %323 = vector.extract_strided_slice %321 {offsets = [0, 0], sizes = [8, 64], strides = [1, 1]} : vector<8x96xf32> to vector<8x64xf32>
    %324 = arith.addf %322, %323 : vector<8x64xf32>
    %325 = arith.negf %324 : vector<8x64xf32>
    %326 = math.exp %325 : vector<8x64xf32>
    %cst_107 = arith.constant 1.000000e+00 : f32
    %327 = vector.broadcast %cst_107 : f32 to vector<8x64xf32>
    %328 = arith.addf %327, %326 : vector<8x64xf32>
    %329 = arith.divf %327, %328 : vector<8x64xf32>
    %330 = vector.extract_strided_slice %329 {offsets = [0, 0], sizes = [8, 32], strides = [1, 1]} : vector<8x64xf32> to vector<8x32xf32>
    %331 = vector.extract_strided_slice %329 {offsets = [0, 32], sizes = [8, 32], strides = [1, 1]} : vector<8x64xf32> to vector<8x32xf32>
    %332 = vector.extract_strided_slice %318 {offsets = [0, 64], sizes = [8, 32], strides = [1, 1]} : vector<8x96xf32> to vector<8x32xf32>
    %333 = vector.extract_strided_slice %321 {offsets = [0, 64], sizes = [8, 32], strides = [1, 1]} : vector<8x96xf32> to vector<8x32xf32>
    %334 = arith.mulf %330, %333 : vector<8x32xf32>
    %335 = arith.addf %332, %334 : vector<8x32xf32>
    %336 = math.tanh %335 : vector<8x32xf32>
    %cst_108 = arith.constant 1.000000e+00 : f32
    %337 = vector.broadcast %cst_108 : f32 to vector<8x32xf32>
    %338 = arith.subf %337, %331 : vector<8x32xf32>
    %339 = arith.mulf %338, %336 : vector<8x32xf32>
    %340 = arith.mulf %331, %285 : vector<8x32xf32>
    %341 = arith.addf %339, %340 : vector<8x32xf32>
    %c2_109 = arith.constant 2 : index
    %c0_110 = arith.constant 0 : index
    %c0_111 = arith.constant 0 : index
    %342 = vector.load %arg8[%c2_109, %c0_110, %c0_111] : memref<8x8x32xf32, #tpu.memory_space<vmem>>, vector<1x8x32xf32>
    %343 = vector.shape_cast %342 : vector<1x8x32xf32> to vector<8x32xf32>
    %344 = vector.shape_cast %341 : vector<8x32xf32> to vector<1x8x32xf32>
    tpu.vector_store %arg8[%c2_109, %c0_110, %c0_111], %344 {strides = array<i32>} : memref<8x8x32xf32, #tpu.memory_space<vmem>>, vector<1x8x32xf32>,
    %c6_112 = arith.constant 6 : index
    %c0_113 = arith.constant 0 : index
    %c0_114 = arith.constant 0 : index
    %345 = vector.load %arg1[%c6_112, %c0_113, %c0_114] : memref<8x8x96xf32, #tpu.memory_space<vmem>>, vector<1x8x96xf32>
    %346 = vector.shape_cast %345 : vector<1x8x96xf32> to vector<8x96xf32>
    %cst_115 = arith.constant dense<0.000000e+00> : vector<8x96xf32>
    %347 = tpu.matmul %313, %3, %cst_115 {dimension_numbers = #tpu.dot_dimension_numbers<[1], [0], [0], [1], [0, 0, 1, 1], [], []>} : vector<8x32xf32>, vector<32x96xf32>, vector<8x96xf32> -> vector<8x96xf32>
    %348 = vector.broadcast %5 : vector<1x96xf32> to vector<8x96xf32>
    %349 = arith.addf %347, %348 : vector<8x96xf32>
    %350 = vector.extract_strided_slice %346 {offsets = [0, 0], sizes = [8, 64], strides = [1, 1]} : vector<8x96xf32> to vector<8x64xf32>
    %351 = vector.extract_strided_slice %349 {offsets = [0, 0], sizes = [8, 64], strides = [1, 1]} : vector<8x96xf32> to vector<8x64xf32>
    %352 = arith.addf %350, %351 : vector<8x64xf32>
    %353 = arith.negf %352 : vector<8x64xf32>
    %354 = math.exp %353 : vector<8x64xf32>
    %cst_116 = arith.constant 1.000000e+00 : f32
    %355 = vector.broadcast %cst_116 : f32 to vector<8x64xf32>
    %356 = arith.addf %355, %354 : vector<8x64xf32>
    %357 = arith.divf %355, %356 : vector<8x64xf32>
    %358 = vector.extract_strided_slice %357 {offsets = [0, 0], sizes = [8, 32], strides = [1, 1]} : vector<8x64xf32> to vector<8x32xf32>
    %359 = vector.extract_strided_slice %357 {offsets = [0, 32], sizes = [8, 32], strides = [1, 1]} : vector<8x64xf32> to vector<8x32xf32>
    %360 = vector.extract_strided_slice %346 {offsets = [0, 64], sizes = [8, 32], strides = [1, 1]} : vector<8x96xf32> to vector<8x32xf32>
    %361 = vector.extract_strided_slice %349 {offsets = [0, 64], sizes = [8, 32], strides = [1, 1]} : vector<8x96xf32> to vector<8x32xf32>
    %362 = arith.mulf %358, %361 : vector<8x32xf32>
    %363 = arith.addf %360, %362 : vector<8x32xf32>
    %364 = math.tanh %363 : vector<8x32xf32>
    %cst_117 = arith.constant 1.000000e+00 : f32
    %365 = vector.broadcast %cst_117 : f32 to vector<8x32xf32>
    %366 = arith.subf %365, %359 : vector<8x32xf32>
    %367 = arith.mulf %366, %364 : vector<8x32xf32>
    %368 = arith.mulf %359, %313 : vector<8x32xf32>
    %369 = arith.addf %367, %368 : vector<8x32xf32>
    %c6_118 = arith.constant 6 : index
    %c0_119 = arith.constant 0 : index
    %c0_120 = arith.constant 0 : index
    %370 = vector.load %arg7[%c6_118, %c0_119, %c0_120] : memref<8x8x32xf32, #tpu.memory_space<vmem>>, vector<1x8x32xf32>
    %371 = vector.shape_cast %370 : vector<1x8x32xf32> to vector<8x32xf32>
    %372 = vector.shape_cast %369 : vector<8x32xf32> to vector<1x8x32xf32>
    tpu.vector_store %arg7[%c6_118, %c0_119, %c0_120], %372 {strides = array<i32>} : memref<8x8x32xf32, #tpu.memory_space<vmem>>, vector<1x8x32xf32>,
    %c1_121 = arith.constant 1 : index
    %c0_122 = arith.constant 0 : index
    %c0_123 = arith.constant 0 : index
    %373 = vector.load %arg2[%c1_121, %c0_122, %c0_123] : memref<8x8x96xf32, #tpu.memory_space<vmem>>, vector<1x8x96xf32>
    %374 = vector.shape_cast %373 : vector<1x8x96xf32> to vector<8x96xf32>
    %cst_124 = arith.constant dense<0.000000e+00> : vector<8x96xf32>
    %375 = tpu.matmul %341, %4, %cst_124 {dimension_numbers = #tpu.dot_dimension_numbers<[1], [0], [0], [1], [0, 0, 1, 1], [], []>} : vector<8x32xf32>, vector<32x96xf32>, vector<8x96xf32> -> vector<8x96xf32>
    %376 = vector.broadcast %6 : vector<1x96xf32> to vector<8x96xf32>
    %377 = arith.addf %375, %376 : vector<8x96xf32>
    %378 = vector.extract_strided_slice %374 {offsets = [0, 0], sizes = [8, 64], strides = [1, 1]} : vector<8x96xf32> to vector<8x64xf32>
    %379 = vector.extract_strided_slice %377 {offsets = [0, 0], sizes = [8, 64], strides = [1, 1]} : vector<8x96xf32> to vector<8x64xf32>
    %380 = arith.addf %378, %379 : vector<8x64xf32>
    %381 = arith.negf %380 : vector<8x64xf32>
    %382 = math.exp %381 : vector<8x64xf32>
    %cst_125 = arith.constant 1.000000e+00 : f32
    %383 = vector.broadcast %cst_125 : f32 to vector<8x64xf32>
    %384 = arith.addf %383, %382 : vector<8x64xf32>
    %385 = arith.divf %383, %384 : vector<8x64xf32>
    %386 = vector.extract_strided_slice %385 {offsets = [0, 0], sizes = [8, 32], strides = [1, 1]} : vector<8x64xf32> to vector<8x32xf32>
    %387 = vector.extract_strided_slice %385 {offsets = [0, 32], sizes = [8, 32], strides = [1, 1]} : vector<8x64xf32> to vector<8x32xf32>
    %388 = vector.extract_strided_slice %374 {offsets = [0, 64], sizes = [8, 32], strides = [1, 1]} : vector<8x96xf32> to vector<8x32xf32>
    %389 = vector.extract_strided_slice %377 {offsets = [0, 64], sizes = [8, 32], strides = [1, 1]} : vector<8x96xf32> to vector<8x32xf32>
    %390 = arith.mulf %386, %389 : vector<8x32xf32>
    %391 = arith.addf %388, %390 : vector<8x32xf32>
    %392 = math.tanh %391 : vector<8x32xf32>
    %cst_126 = arith.constant 1.000000e+00 : f32
    %393 = vector.broadcast %cst_126 : f32 to vector<8x32xf32>
    %394 = arith.subf %393, %387 : vector<8x32xf32>
    %395 = arith.mulf %394, %392 : vector<8x32xf32>
    %396 = arith.mulf %387, %341 : vector<8x32xf32>
    %397 = arith.addf %395, %396 : vector<8x32xf32>
    %c1_127 = arith.constant 1 : index
    %c0_128 = arith.constant 0 : index
    %c0_129 = arith.constant 0 : index
    %398 = vector.load %arg8[%c1_127, %c0_128, %c0_129] : memref<8x8x32xf32, #tpu.memory_space<vmem>>, vector<1x8x32xf32>
    %399 = vector.shape_cast %398 : vector<1x8x32xf32> to vector<8x32xf32>
    %400 = vector.shape_cast %397 : vector<8x32xf32> to vector<1x8x32xf32>
    tpu.vector_store %arg8[%c1_127, %c0_128, %c0_129], %400 {strides = array<i32>} : memref<8x8x32xf32, #tpu.memory_space<vmem>>, vector<1x8x32xf32>,
    %c7_130 = arith.constant 7 : index
    %c0_131 = arith.constant 0 : index
    %c0_132 = arith.constant 0 : index
    %401 = vector.load %arg1[%c7_130, %c0_131, %c0_132] : memref<8x8x96xf32, #tpu.memory_space<vmem>>, vector<1x8x96xf32>
    %402 = vector.shape_cast %401 : vector<1x8x96xf32> to vector<8x96xf32>
    %cst_133 = arith.constant dense<0.000000e+00> : vector<8x96xf32>
    %403 = tpu.matmul %369, %3, %cst_133 {dimension_numbers = #tpu.dot_dimension_numbers<[1], [0], [0], [1], [0, 0, 1, 1], [], []>} : vector<8x32xf32>, vector<32x96xf32>, vector<8x96xf32> -> vector<8x96xf32>
    %404 = vector.broadcast %5 : vector<1x96xf32> to vector<8x96xf32>
    %405 = arith.addf %403, %404 : vector<8x96xf32>
    %406 = vector.extract_strided_slice %402 {offsets = [0, 0], sizes = [8, 64], strides = [1, 1]} : vector<8x96xf32> to vector<8x64xf32>
    %407 = vector.extract_strided_slice %405 {offsets = [0, 0], sizes = [8, 64], strides = [1, 1]} : vector<8x96xf32> to vector<8x64xf32>
    %408 = arith.addf %406, %407 : vector<8x64xf32>
    %409 = arith.negf %408 : vector<8x64xf32>
    %410 = math.exp %409 : vector<8x64xf32>
    %cst_134 = arith.constant 1.000000e+00 : f32
    %411 = vector.broadcast %cst_134 : f32 to vector<8x64xf32>
    %412 = arith.addf %411, %410 : vector<8x64xf32>
    %413 = arith.divf %411, %412 : vector<8x64xf32>
    %414 = vector.extract_strided_slice %413 {offsets = [0, 0], sizes = [8, 32], strides = [1, 1]} : vector<8x64xf32> to vector<8x32xf32>
    %415 = vector.extract_strided_slice %413 {offsets = [0, 32], sizes = [8, 32], strides = [1, 1]} : vector<8x64xf32> to vector<8x32xf32>
    %416 = vector.extract_strided_slice %402 {offsets = [0, 64], sizes = [8, 32], strides = [1, 1]} : vector<8x96xf32> to vector<8x32xf32>
    %417 = vector.extract_strided_slice %405 {offsets = [0, 64], sizes = [8, 32], strides = [1, 1]} : vector<8x96xf32> to vector<8x32xf32>
    %418 = arith.mulf %414, %417 : vector<8x32xf32>
    %419 = arith.addf %416, %418 : vector<8x32xf32>
    %420 = math.tanh %419 : vector<8x32xf32>
    %cst_135 = arith.constant 1.000000e+00 : f32
    %421 = vector.broadcast %cst_135 : f32 to vector<8x32xf32>
    %422 = arith.subf %421, %415 : vector<8x32xf32>
    %423 = arith.mulf %422, %420 : vector<8x32xf32>
    %424 = arith.mulf %415, %369 : vector<8x32xf32>
    %425 = arith.addf %423, %424 : vector<8x32xf32>
    %c7_136 = arith.constant 7 : index
    %c0_137 = arith.constant 0 : index
    %c0_138 = arith.constant 0 : index
    %426 = vector.load %arg7[%c7_136, %c0_137, %c0_138] : memref<8x8x32xf32, #tpu.memory_space<vmem>>, vector<1x8x32xf32>
    %427 = vector.shape_cast %426 : vector<1x8x32xf32> to vector<8x32xf32>
    %428 = vector.shape_cast %425 : vector<8x32xf32> to vector<1x8x32xf32>
    tpu.vector_store %arg7[%c7_136, %c0_137, %c0_138], %428 {strides = array<i32>} : memref<8x8x32xf32, #tpu.memory_space<vmem>>, vector<1x8x32xf32>,
    %c0_139 = arith.constant 0 : index
    %c0_140 = arith.constant 0 : index
    %c0_141 = arith.constant 0 : index
    %429 = vector.load %arg2[%c0_139, %c0_140, %c0_141] : memref<8x8x96xf32, #tpu.memory_space<vmem>>, vector<1x8x96xf32>
    %430 = vector.shape_cast %429 : vector<1x8x96xf32> to vector<8x96xf32>
    %cst_142 = arith.constant dense<0.000000e+00> : vector<8x96xf32>
    %431 = tpu.matmul %397, %4, %cst_142 {dimension_numbers = #tpu.dot_dimension_numbers<[1], [0], [0], [1], [0, 0, 1, 1], [], []>} : vector<8x32xf32>, vector<32x96xf32>, vector<8x96xf32> -> vector<8x96xf32>
    %432 = vector.broadcast %6 : vector<1x96xf32> to vector<8x96xf32>
    %433 = arith.addf %431, %432 : vector<8x96xf32>
    %434 = vector.extract_strided_slice %430 {offsets = [0, 0], sizes = [8, 64], strides = [1, 1]} : vector<8x96xf32> to vector<8x64xf32>
    %435 = vector.extract_strided_slice %433 {offsets = [0, 0], sizes = [8, 64], strides = [1, 1]} : vector<8x96xf32> to vector<8x64xf32>
    %436 = arith.addf %434, %435 : vector<8x64xf32>
    %437 = arith.negf %436 : vector<8x64xf32>
    %438 = math.exp %437 : vector<8x64xf32>
    %cst_143 = arith.constant 1.000000e+00 : f32
    %439 = vector.broadcast %cst_143 : f32 to vector<8x64xf32>
    %440 = arith.addf %439, %438 : vector<8x64xf32>
    %441 = arith.divf %439, %440 : vector<8x64xf32>
    %442 = vector.extract_strided_slice %441 {offsets = [0, 0], sizes = [8, 32], strides = [1, 1]} : vector<8x64xf32> to vector<8x32xf32>
    %443 = vector.extract_strided_slice %441 {offsets = [0, 32], sizes = [8, 32], strides = [1, 1]} : vector<8x64xf32> to vector<8x32xf32>
    %444 = vector.extract_strided_slice %430 {offsets = [0, 64], sizes = [8, 32], strides = [1, 1]} : vector<8x96xf32> to vector<8x32xf32>
    %445 = vector.extract_strided_slice %433 {offsets = [0, 64], sizes = [8, 32], strides = [1, 1]} : vector<8x96xf32> to vector<8x32xf32>
    %446 = arith.mulf %442, %445 : vector<8x32xf32>
    %447 = arith.addf %444, %446 : vector<8x32xf32>
    %448 = math.tanh %447 : vector<8x32xf32>
    %cst_144 = arith.constant 1.000000e+00 : f32
    %449 = vector.broadcast %cst_144 : f32 to vector<8x32xf32>
    %450 = arith.subf %449, %443 : vector<8x32xf32>
    %451 = arith.mulf %450, %448 : vector<8x32xf32>
    %452 = arith.mulf %443, %397 : vector<8x32xf32>
    %453 = arith.addf %451, %452 : vector<8x32xf32>
    %c0_145 = arith.constant 0 : index
    %c0_146 = arith.constant 0 : index
    %c0_147 = arith.constant 0 : index
    %454 = vector.load %arg8[%c0_145, %c0_146, %c0_147] : memref<8x8x32xf32, #tpu.memory_space<vmem>>, vector<1x8x32xf32>
    %455 = vector.shape_cast %454 : vector<1x8x32xf32> to vector<8x32xf32>
    %456 = vector.shape_cast %453 : vector<8x32xf32> to vector<1x8x32xf32>
    tpu.vector_store %arg8[%c0_145, %c0_146, %c0_147], %456 {strides = array<i32>} : memref<8x8x32xf32, #tpu.memory_space<vmem>>, vector<1x8x32xf32>,
    %c0_148 = arith.constant 0 : index
    %c0_149 = arith.constant 0 : index
    %457 = vector.load %arg9[%c0_148, %c0_149] : memref<8x32xf32, #tpu.memory_space<vmem>>, vector<8x32xf32>
    tpu.vector_store %arg9[%c0_148, %c0_149], %425 {strides = array<i32>} : memref<8x32xf32, #tpu.memory_space<vmem>>, vector<8x32xf32>,
    %c0_150 = arith.constant 0 : index
    %c0_151 = arith.constant 0 : index
    %458 = vector.load %arg10[%c0_150, %c0_151] : memref<8x32xf32, #tpu.memory_space<vmem>>, vector<8x32xf32>
    tpu.vector_store %arg10[%c0_150, %c0_151], %453 {strides = array<i32>} : memref<8x32xf32, #tpu.memory_space<vmem>>, vector<8x32xf32>,
    return
  }
  func.func @transform_0(%arg0: i32) -> (i32, i32, i32) {
    %c0_i32 = arith.constant 0 : i32
    %c0_i32_0 = arith.constant 0 : i32
    %c0_i32_1 = arith.constant 0 : i32
    return %arg0, %c0_i32, %c0_i32_0 : i32, i32, i32
  }
  func.func @transform_1(%arg0: i32) -> (i32, i32, i32) {
    %c0_i32 = arith.constant 0 : i32
    %0 = arith.subi %c0_i32, %arg0 : i32
    %c0_i32_0 = arith.constant 0 : i32
    %c0_i32_1 = arith.constant 0 : i32
    %c0_i32_2 = arith.constant 0 : i32
    return %0, %c0_i32_0, %c0_i32_1 : i32, i32, i32
  }
  func.func @transform_2(%arg0: i32) -> (i32, i32) {
    %c0_i32 = arith.constant 0 : i32
    %c0_i32_0 = arith.constant 0 : i32
    %c0_i32_1 = arith.constant 0 : i32
    return %c0_i32, %c0_i32_0 : i32, i32
  }
  func.func @transform_3(%arg0: i32) -> (i32, i32) {
    %c0_i32 = arith.constant 0 : i32
    %c0_i32_0 = arith.constant 0 : i32
    %c0_i32_1 = arith.constant 0 : i32
    return %c0_i32, %c0_i32_0 : i32, i32
  }
  func.func @transform_4(%arg0: i32) -> (i32, i32) {
    %c0_i32 = arith.constant 0 : i32
    %c0_i32_0 = arith.constant 0 : i32
    %c0_i32_1 = arith.constant 0 : i32
    return %c0_i32, %c0_i32_0 : i32, i32
  }
  func.func @transform_5(%arg0: i32) -> (i32, i32) {
    %c0_i32 = arith.constant 0 : i32
    %c0_i32_0 = arith.constant 0 : i32
    %c0_i32_1 = arith.constant 0 : i32
    return %c0_i32, %c0_i32_0 : i32, i32
  }
  func.func @transform_6(%arg0: i32) -> (i32, i32, i32) {
    %c0_i32 = arith.constant 0 : i32
    %c0_i32_0 = arith.constant 0 : i32
    %c0_i32_1 = arith.constant 0 : i32
    return %arg0, %c0_i32, %c0_i32_0 : i32, i32, i32
  }
  func.func @transform_7(%arg0: i32) -> (i32, i32, i32) {
    %c0_i32 = arith.constant 0 : i32
    %0 = arith.subi %c0_i32, %arg0 : i32
    %c0_i32_0 = arith.constant 0 : i32
    %c0_i32_1 = arith.constant 0 : i32
    %c0_i32_2 = arith.constant 0 : i32
    return %0, %c0_i32_0, %c0_i32_1 : i32, i32, i32
  }
}

module attributes {stable_mosaic.version = 11 : i64} {
  func.func @_classifier_kernel(%arg0: i32, %arg1: memref<64x32xf32, #tpu.memory_space<vmem>>, %arg2: memref<64x32xf32, #tpu.memory_space<vmem>>, %arg3: memref<32x32xbf16, #tpu.memory_space<vmem>>, %arg4: memref<32x32xbf16, #tpu.memory_space<vmem>>, %arg5: memref<1x32xf32, #tpu.memory_space<vmem>>, %arg6: memref<32x128xbf16, #tpu.memory_space<vmem>>, %arg7: memref<1x128xf32, #tpu.memory_space<vmem>>, %arg8: memref<64x128xf32, #tpu.memory_space<vmem>>) attributes {dimension_semantics = [#tpu.dimension_semantics<parallel>], iteration_bounds = array<i64: 1>, scalar_prefetch = 0 : i64, scratch_operands = 0 : i64, tpu.core_type = #tpu.core_type<tc>, window_params = [{transform_indices = @transform_0, window_bounds = array<i64: 64, 32>}, {transform_indices = @transform_1, window_bounds = array<i64: 64, 32>}, {pipeline_mode = #tpu.pipeline_mode<synchronous>, transform_indices = @transform_2, window_bounds = array<i64: 32, 32>}, {pipeline_mode = #tpu.pipeline_mode<synchronous>, transform_indices = @transform_3, window_bounds = array<i64: 32, 32>}, {pipeline_mode = #tpu.pipeline_mode<synchronous>, transform_indices = @transform_4, window_bounds = array<i64: 1, 32>}, {pipeline_mode = #tpu.pipeline_mode<synchronous>, transform_indices = @transform_5, window_bounds = array<i64: 32, 128>}, {pipeline_mode = #tpu.pipeline_mode<synchronous>, transform_indices = @transform_6, window_bounds = array<i64: 1, 128>}, {transform_indices = @transform_7, window_bounds = array<i64: 64, 128>}]} {
    %c0 = arith.constant 0 : index
    %c0_0 = arith.constant 0 : index
    %0 = vector.load %arg1[%c0, %c0_0] : memref<64x32xf32, #tpu.memory_space<vmem>>, vector<64x32xf32>
    %c0_1 = arith.constant 0 : index
    %c0_2 = arith.constant 0 : index
    %1 = vector.load %arg3[%c0_1, %c0_2] : memref<32x32xbf16, #tpu.memory_space<vmem>>, vector<32x32xbf16>
    %2 = arith.truncf %0 : vector<64x32xf32> to vector<64x32xbf16>
    %cst = arith.constant dense<0.000000e+00> : vector<64x32xf32>
    %3 = tpu.matmul %2, %1, %cst {dimension_numbers = #tpu.dot_dimension_numbers<[1], [0], [0], [1], [0, 0, 1, 1], [], []>} : vector<64x32xbf16>, vector<32x32xbf16>, vector<64x32xf32> -> vector<64x32xf32>
    %c0_3 = arith.constant 0 : index
    %c0_4 = arith.constant 0 : index
    %4 = vector.load %arg2[%c0_3, %c0_4] : memref<64x32xf32, #tpu.memory_space<vmem>>, vector<64x32xf32>
    %c0_5 = arith.constant 0 : index
    %c0_6 = arith.constant 0 : index
    %5 = vector.load %arg4[%c0_5, %c0_6] : memref<32x32xbf16, #tpu.memory_space<vmem>>, vector<32x32xbf16>
    %6 = arith.truncf %4 : vector<64x32xf32> to vector<64x32xbf16>
    %cst_7 = arith.constant dense<0.000000e+00> : vector<64x32xf32>
    %7 = tpu.matmul %6, %5, %cst_7 {dimension_numbers = #tpu.dot_dimension_numbers<[1], [0], [0], [1], [0, 0, 1, 1], [], []>} : vector<64x32xbf16>, vector<32x32xbf16>, vector<64x32xf32> -> vector<64x32xf32>
    %8 = arith.addf %3, %7 : vector<64x32xf32>
    %c0_8 = arith.constant 0 : index
    %c0_9 = arith.constant 0 : index
    %9 = vector.load %arg5[%c0_8, %c0_9] : memref<1x32xf32, #tpu.memory_space<vmem>>, vector<1x32xf32>
    %10 = vector.broadcast %9 : vector<1x32xf32> to vector<64x32xf32>
    %11 = arith.addf %8, %10 : vector<64x32xf32>
    %cst_10 = arith.constant 0.000000e+00 : f32
    %12 = vector.broadcast %cst_10 : f32 to vector<64x32xf32>
    %13 = arith.maximumf %11, %12 : vector<64x32xf32>
    %c0_11 = arith.constant 0 : index
    %c0_12 = arith.constant 0 : index
    %14 = vector.load %arg6[%c0_11, %c0_12] : memref<32x128xbf16, #tpu.memory_space<vmem>>, vector<32x128xbf16>
    %15 = arith.truncf %13 : vector<64x32xf32> to vector<64x32xbf16>
    %cst_13 = arith.constant dense<0.000000e+00> : vector<64x128xf32>
    %16 = tpu.matmul %15, %14, %cst_13 {dimension_numbers = #tpu.dot_dimension_numbers<[1], [0], [0], [1], [0, 0, 1, 1], [], []>} : vector<64x32xbf16>, vector<32x128xbf16>, vector<64x128xf32> -> vector<64x128xf32>
    %c0_14 = arith.constant 0 : index
    %c0_15 = arith.constant 0 : index
    %17 = vector.load %arg7[%c0_14, %c0_15] : memref<1x128xf32, #tpu.memory_space<vmem>>, vector<1x128xf32>
    %18 = vector.broadcast %17 : vector<1x128xf32> to vector<64x128xf32>
    %19 = arith.addf %16, %18 : vector<64x128xf32>
    %c0_16 = arith.constant 0 : index
    %c0_17 = arith.constant 0 : index
    %20 = vector.load %arg8[%c0_16, %c0_17] : memref<64x128xf32, #tpu.memory_space<vmem>>, vector<64x128xf32>
    tpu.vector_store %arg8[%c0_16, %c0_17], %19 {strides = array<i32>} : memref<64x128xf32, #tpu.memory_space<vmem>>, vector<64x128xf32>,
    return
  }
  func.func @transform_0(%arg0: i32) -> (i32, i32) {
    %c0_i32 = arith.constant 0 : i32
    %c0_i32_0 = arith.constant 0 : i32
    return %arg0, %c0_i32 : i32, i32
  }
  func.func @transform_1(%arg0: i32) -> (i32, i32) {
    %c0_i32 = arith.constant 0 : i32
    %c0_i32_0 = arith.constant 0 : i32
    return %arg0, %c0_i32 : i32, i32
  }
  func.func @transform_2(%arg0: i32) -> (i32, i32) {
    %c0_i32 = arith.constant 0 : i32
    %c0_i32_0 = arith.constant 0 : i32
    %c0_i32_1 = arith.constant 0 : i32
    return %c0_i32, %c0_i32_0 : i32, i32
  }
  func.func @transform_3(%arg0: i32) -> (i32, i32) {
    %c0_i32 = arith.constant 0 : i32
    %c0_i32_0 = arith.constant 0 : i32
    %c0_i32_1 = arith.constant 0 : i32
    return %c0_i32, %c0_i32_0 : i32, i32
  }
  func.func @transform_4(%arg0: i32) -> (i32, i32) {
    %c0_i32 = arith.constant 0 : i32
    %c0_i32_0 = arith.constant 0 : i32
    %c0_i32_1 = arith.constant 0 : i32
    return %c0_i32, %c0_i32_0 : i32, i32
  }
  func.func @transform_5(%arg0: i32) -> (i32, i32) {
    %c0_i32 = arith.constant 0 : i32
    %c0_i32_0 = arith.constant 0 : i32
    %c0_i32_1 = arith.constant 0 : i32
    return %c0_i32, %c0_i32_0 : i32, i32
  }
  func.func @transform_6(%arg0: i32) -> (i32, i32) {
    %c0_i32 = arith.constant 0 : i32
    %c0_i32_0 = arith.constant 0 : i32
    %c0_i32_1 = arith.constant 0 : i32
    return %c0_i32, %c0_i32_0 : i32, i32
  }
  func.func @transform_7(%arg0: i32) -> (i32, i32) {
    %c0_i32 = arith.constant 0 : i32
    %c0_i32_0 = arith.constant 0 : i32
    return %arg0, %c0_i32 : i32, i32
  }
}

</mosaic_0001>

<bundles_post_ra>
// kernel: _lambda_.11
= control target key start
LH: loop header
LB: loop body
LE: loop exit
PB: predicated region body
PF: predicated region fallthrough
CT: control target
= control target key end

     0   :  { %vm78_vm0 = vcmask 1043456   ;;  %vm79_vm1 = vcmask 1044480   ;;  %v244_v1 = vmov 65535   ;;  %vm53_vm2 = vcmask 72704   ;;  %s391_s1 = inlined_call_operand.vmem [shape: bf16[9,32], index: 1, kind: input, shape index: {}]   ;;  %s392_s0 = inlined_call_operand.vmem [shape: f32[128,9], index: 0, kind: input, shape index: {}]   ;;  %s393_s2 = inlined_call_operand.vmem [shape: f32[1,32], index: 2, kind: input, shape index: {}]   ;;  %s394_s3 = inlined_call_operand.vmem [shape: f32[128,32], index: 3, kind: output, shape index: {}]  }
   0x1   :  { %v243_v0 = vld [vmem:[%s391_s1] sm:$0x1f]   ;;  %v80_v2 = vsel %vm78_vm0, 4294967295, %v244_v1  ;;  %v16_v4 = vld [vmem:[%s392_s0 + $0x8] sm:$0xff]  ;;  %v17_v9 = vld [vmem:[%s392_s0 + $0x10] sm:$0xff]  ;;  %vm182_vm3 = vcmask 261120  }
   0x2   :  { %v15_v3 = vld [vmem:[%s392_s0] sm:$0xff]  ;;  %v81_v6 = vsel %vm79_vm1, %v80_v2, 0  ;;  %v24_v8 = vld [vmem:[%s392_s0 + $0x48] sm:$0xff]  ;;  %v18_v10 = vld [vmem:[%s392_s0 + $0x18] sm:$0xff] }
   0x3   :  { %v23_v5 = vld [vmem:[%s392_s0 + $0x40] sm:$0xff]  ;;  %v33_v7 = vpack.c.bf16 %v16_v4, %v15_v3  ;;  %v83_v11 = vand.u32 %v243_v0, %v81_v6  ;;  %v25_v13 = vld [vmem:[%s392_s0 + $0x50] sm:$0xff]  ;;  %v26_v14 = vld [vmem:[%s392_s0 + $0x58] sm:$0xff]  ;;  %v34_v19 = vpack.c.bf16 %v18_v10, %v17_v9 }
   0x4   :  { %v37_v12 = vpack.c.bf16 %v24_v8, %v23_v5  ;;  %v19_v15 = vld [vmem:[%s392_s0 + $0x20] sm:$0xff]  ;;  %v20_v16 = vld [vmem:[%s392_s0 + $0x28] sm:$0xff]  ;;  %v38_v20 = vpack.c.bf16 %v26_v14, %v25_v13  ;;  %v21_v23 = vld [vmem:[%s392_s0 + $0x30] sm:$0xff] }
   0x5   :  { %224 = vmatprep.mubr.msk.bf16.mxu0 %vm53_vm2, %v33_v7  ;;  %v27_v17 = vld [vmem:[%s392_s0 + $0x60] sm:$0xff]  ;;  %v28_v18 = vld [vmem:[%s392_s0 + $0x68] sm:$0xff]  ;;  %222 = vmatprep.subr.bf16.mxu0 %v83_v11  ;;  %v35_v21 = vpack.c.bf16 %v20_v16, %v19_v15  ;;  %v22_v24 = vld [vmem:[%s392_s0 + $0x38] sm:$0xff] }
   0x6   :  { %240 = vmatprep.subr.bf16.mxu1 %v83_v11  ;;  %223 = vmatpush3.bf16.msra.mxu0 %v83_v11  ;;  %v39_v22 = vpack.c.bf16 %v28_v18, %v27_v17  ;;  %v29_v25 = vld [vmem:[%s392_s0 + $0x70] sm:$0xff]  ;;  %v30_v26 = vld [vmem:[%s392_s0 + $0x78] sm:$0xff]  ;;  %v36_v27 = vpack.c.bf16 %v22_v24, %v21_v23  ;;  %v203_v29 = vld [vmem:[%s393_s2] ss:$0 sm:$0xff] }
   0x7   :  { %241 = vmatpush3.bf16.msra.mxu1 %v83_v11  ;;  %232 = vmatprep.mubr.msk.bf16.mxu1 %vm53_vm2, %v37_v12  ;;  %v40_v28 = vpack.c.bf16 %v30_v26, %v29_v25 }
   0x9   :  { %225 = vmatmul.mubr.msk.bf16.vlgmr.msra.gmra.mrb[0].mxu0 %vm53_vm2, %v34_v19 }
   0xa   :  { %233 = vmatmul.mubr.msk.bf16.vlgmr.msra.gmra.mrb[0].mxu1 %vm53_vm2, %v38_v20  ;;  %228 = vmatprep.mubr.msk.bf16.mxu0 %vm53_vm2, %v35_v21 }
   0xb   :  { %236 = vmatprep.mubr.msk.bf16.mxu1 %vm53_vm2, %v39_v22 }
  0x11   :  { %229 = vmatmul.mubr.msk.bf16.gmra.mrb[4].mxu0 %vm53_vm2, %v36_v27 }
  0x12   :  { %237 = vmatmul.mubr.msk.bf16.gmra.mrb[4].mxu1 %vm53_vm2, %v40_v28 }
  0xdc   :  { %v226_v30 = vpop.f32.mrb[0].mxu0 }
  0xdd   :  { %v234_v31 = vpop.f32.mrb[0].mxu1  ;;  %v128_v32 = vadd.f32 %v226_v30, %v203_v29  ;;  %v119_v34 = vpop.f32.mrb[1].mxu0 }
  0xde   :  { %v160_v33 = vadd.f32 %v234_v31, %v203_v29  ;;  %v151_v35 = vpop.f32.mrb[1].mxu1  ;;  %v120_v36 = vadd.f32 %v203_v29, %v119_v34  ;;  %v227_v38 = vpop.f32.mrb[2].mxu0 }
  0xdf   :  { %v152_v37 = vadd.f32 %v203_v29, %v151_v35  ;;  %v235_v39 = vpop.f32.mrb[2].mxu1  ;;  %185 = vst.msk [vmem:[%s394_s3 + $0x10] sm:$0xff] %vm182_vm3, %v128_v32  ;;  %v131_v40 = vadd.f32 %v227_v38, %v203_v29  ;;  %v122_v42 = vpop.f32.mrb[3].mxu0 }
  0xe0   :  { %193 = vst.msk [vmem:[%s394_s3 + $0x50] sm:$0xff] %vm182_vm3, %v160_v33  ;;  %v163_v41 = vadd.f32 %v235_v39, %v203_v29  ;;  %v154_v43 = vpop.f32.mrb[3].mxu1  ;;  %183 = vst.msk [vmem:[%s394_s3] sm:$0xff] %vm182_vm3, %v120_v36  ;;  %v123_v44 = vadd.f32 %v203_v29, %v122_v42 }
  0xe1   :  { %191 = vst.msk [vmem:[%s394_s3 + $0x40] sm:$0xff] %vm182_vm3, %v152_v37  ;;  %v155_v45 = vadd.f32 %v203_v29, %v154_v43  ;;  %186 = vst.msk [vmem:[%s394_s3 + $0x18] sm:$0xff] %vm182_vm3, %v131_v40 }
  0xe2   :  { %194 = vst.msk [vmem:[%s394_s3 + $0x58] sm:$0xff] %vm182_vm3, %v163_v41  ;;  %184 = vst.msk [vmem:[%s394_s3 + $0x8] sm:$0xff] %vm182_vm3, %v123_v44 }
  0xe3   :  { %192 = vst.msk [vmem:[%s394_s3 + $0x48] sm:$0xff] %vm182_vm3, %v155_v45 }
  0xe4   :  { %v230_v46 = vpop.f32.mrb[4].mxu0 }
  0xe5   :  { %v238_v47 = vpop.f32.mrb[4].mxu1  ;;  %v144_v48 = vadd.f32 %v230_v46, %v203_v29  ;;  %v135_v50 = vpop.f32.mrb[5].mxu0 }
  0xe6   :  { %v176_v49 = vadd.f32 %v238_v47, %v203_v29  ;;  %v167_v51 = vpop.f32.mrb[5].mxu1  ;;  %v136_v52 = vadd.f32 %v203_v29, %v135_v50  ;;  %v231_v54 = vpop.f32.mrb[6].mxu0 }
  0xe7   :  { %v168_v53 = vadd.f32 %v203_v29, %v167_v51  ;;  %v239_v55 = vpop.f32.mrb[6].mxu1  ;;  %189 = vst.msk [vmem:[%s394_s3 + $0x30] sm:$0xff] %vm182_vm3, %v144_v48  ;;  %v147_v56 = vadd.f32 %v231_v54, %v203_v29  ;;  %v138_v58 = vpop.f32.mrb[7].mxu0 }
  0xe8   :  { %197 = vst.msk [vmem:[%s394_s3 + $0x70] sm:$0xff] %vm182_vm3, %v176_v49  ;;  %v179_v57 = vadd.f32 %v239_v55, %v203_v29  ;;  %v170_v59 = vpop.f32.mrb[7].mxu1  ;;  %187 = vst.msk [vmem:[%s394_s3 + $0x20] sm:$0xff] %vm182_vm3, %v136_v52  ;;  %v139_v60 = vadd.f32 %v203_v29, %v138_v58 }
  0xe9   :  { %195 = vst.msk [vmem:[%s394_s3 + $0x60] sm:$0xff] %vm182_vm3, %v168_v53  ;;  %v171_v61 = vadd.f32 %v203_v29, %v170_v59  ;;  %190 = vst.msk [vmem:[%s394_s3 + $0x38] sm:$0xff] %vm182_vm3, %v147_v56 }
  0xea   :  { %198 = vst.msk [vmem:[%s394_s3 + $0x78] sm:$0xff] %vm182_vm3, %v179_v57  ;;  %188 = vst.msk [vmem:[%s394_s3 + $0x28] sm:$0xff] %vm182_vm3, %v139_v60 }
  0xeb   :  { %196 = vst.msk [vmem:[%s394_s3 + $0x68] sm:$0xff] %vm182_vm3, %v171_v61 }

// kernel: _lambda_.14
= control target key start
LH: loop header
LB: loop body
LE: loop exit
PB: predicated region body
PF: predicated region fallthrough
CT: control target
= control target key end

     0   :  { %vm239_vm0 = vcmask 261120   ;;  %s492_s1 = inlined_call_operand.vmem [shape: bf16[256,32], index: 1, kind: input, shape index: {}]   ;;  %s493_s0 = inlined_call_operand.vmem [shape: f32[64,256], index: 0, kind: input, shape index: {}]   ;;  %s494_s2 = inlined_call_operand.vmem [shape: f32[1,32], index: 2, kind: input, shape index: {}]   ;;  %s495_s3 = inlined_call_operand.vmem [shape: f32[64,32], index: 3, kind: output, shape index: {}]  }
   0x1   :  { %v325_v0 = vld [vmem:[%s492_s1 + $0x40] sm:$0xff]   ;;  %v327_v2 = vld [vmem:[%s492_s1 + $0x48] sm:$0xff]   ;;  %v329_v4 = vld [vmem:[%s492_s1 + $0x50] sm:$0xff]  }
   0x2   :  { %v326_v1 = vld [vmem:[%s492_s1] sm:$0xff]   ;;  %269 = vmatprep.subr.bf16.mxu0 %v325_v0  ;;  %309 = vmatprep.subr.bf16.mxu1 %v325_v0  ;;  %v328_v3 = vld [vmem:[%s492_s1 + $0x8] sm:$0xff]   ;;  %v330_v5 = vld [vmem:[%s492_s1 + $0x10] sm:$0xff]  }
   0x3   :  { %270 = vmatpush3.bf16.msra.mxu0 %v326_v1  ;;  %317 = vmatpush3.bf16.msra.mxu1 %v326_v1  ;;  %v331_v6 = vld [vmem:[%s492_s1 + $0x58] sm:$0xff]   ;;  %v333_v8 = vld [vmem:[%s492_s1 + $0x60] sm:$0xff]   ;;  %v335_v10 = vld [vmem:[%s492_s1 + $0x68] sm:$0xff]  }
   0x4   :  { %271 = vmatprep.subr.bf16.mxu0 %v327_v2  ;;  %310 = vmatprep.subr.bf16.mxu1 %v327_v2  ;;  %v332_v7 = vld [vmem:[%s492_s1 + $0x18] sm:$0xff]   ;;  %v334_v9 = vld [vmem:[%s492_s1 + $0x20] sm:$0xff]   ;;  %v16_v11 = vld [vmem:[%s493_s0 + $0x8] sm:$0xff] }
   0x5   :  { %v18_v12 = vld [vmem:[%s493_s0 + $0x18] sm:$0xff]  ;;  %v24_v13 = vld [vmem:[%s493_s0 + $0x48] sm:$0xff]  ;;  %v337_v18 = vld [vmem:[%s492_s1 + $0x70] sm:$0xff]  }
   0x6   :  { %v64_v14 = vpack.c.bf16 %v18_v12, %v16_v11  ;;  %v26_v15 = vld [vmem:[%s493_s0 + $0x58] sm:$0xff]  ;;  %v336_v17 = vld [vmem:[%s492_s1 + $0x28] sm:$0xff]   ;;  %v338_v19 = vld [vmem:[%s492_s1 + $0x30] sm:$0xff]  }
   0x7   :  { %272 = vmatpush3.bf16.msra.mxu0 %v328_v3  ;;  %318 = vmatpush3.bf16.msra.mxu1 %v328_v3  ;;  %v68_v16 = vpack.c.bf16 %v26_v15, %v24_v13  ;;  %v339_v20 = vld [vmem:[%s492_s1 + $0x78] sm:$0xff]   ;;  %v15_v22 = vld [vmem:[%s493_s0] sm:$0xff]  ;;  %v17_v23 = vld [vmem:[%s493_s0 + $0x10] sm:$0xff] }
   0x8   :  { %273 = vmatprep.subr.bf16.mxu0 %v329_v4  ;;  %311 = vmatprep.subr.bf16.mxu1 %v329_v4  ;;  %v340_v21 = vld [vmem:[%s492_s1 + $0x38] sm:$0xff]   ;;  %v23_v24 = vld [vmem:[%s493_s0 + $0x40] sm:$0xff]  ;;  %v25_v25 = vld [vmem:[%s493_s0 + $0x50] sm:$0xff]  ;;  %v63_v30 = vpack.c.bf16 %v17_v23, %v15_v22 }
   0x9   :  { %206 = vmatprep.mubr.bf16.mxu0 %v64_v14  ;;  %222 = vmatprep.mubr.bf16.mxu1 %v68_v16  ;;  %v20_v26 = vld [vmem:[%s493_s0 + $0x28] sm:$0xff]  ;;  %v22_v27 = vld [vmem:[%s493_s0 + $0x38] sm:$0xff]  ;;  %v67_v31 = vpack.c.bf16 %v25_v25, %v23_v24  ;;  %v19_v34 = vld [vmem:[%s493_s0 + $0x20] sm:$0xff] }
   0xa   :  { %v28_v28 = vld [vmem:[%s493_s0 + $0x68] sm:$0xff]  ;;  %v30_v29 = vld [vmem:[%s493_s0 + $0x78] sm:$0xff]  ;;  %v66_v32 = vpack.c.bf16 %v22_v27, %v20_v26  ;;  %v21_v35 = vld [vmem:[%s493_s0 + $0x30] sm:$0xff] }
   0xb   :  { %274 = vmatpush3.bf16.msra.mxu0 %v330_v5  ;;  %319 = vmatpush3.bf16.msra.mxu1 %v330_v5  ;;  %v70_v33 = vpack.c.bf16 %v30_v29, %v28_v28  ;;  %v27_v36 = vld [vmem:[%s493_s0 + $0x60] sm:$0xff]  ;;  %v29_v37 = vld [vmem:[%s493_s0 + $0x70] sm:$0xff]  ;;  %v65_v38 = vpack.c.bf16 %v21_v35, %v19_v34 }
   0xc   :  { %275 = vmatprep.subr.bf16.mxu0 %v331_v6  ;;  %312 = vmatprep.subr.bf16.mxu1 %v331_v6  ;;  %v69_v39 = vpack.c.bf16 %v29_v37, %v27_v36  ;;  %v252_v42 = vld [vmem:[%s494_s2] ss:$0 sm:$0xff] }
   0xf   :  { %276 = vmatpush3.bf16.msra.mxu0 %v332_v7  ;;  %320 = vmatpush3.bf16.msra.mxu1 %v332_v7 }
  0x10   :  { %277 = vmatprep.subr.bf16.mxu0 %v333_v8  ;;  %313 = vmatprep.subr.bf16.mxu1 %v333_v8 }
  0x13   :  { %278 = vmatpush3.bf16.msra.mxu0 %v334_v9  ;;  %321 = vmatpush3.bf16.msra.mxu1 %v334_v9 }
  0x14   :  { %279 = vmatprep.subr.bf16.mxu0 %v335_v10  ;;  %314 = vmatprep.subr.bf16.mxu1 %v335_v10 }
  0x17   :  { %280 = vmatpush3.bf16.msra.mxu0 %v336_v17  ;;  %322 = vmatpush3.bf16.msra.mxu1 %v336_v17 }
  0x18   :  { %281 = vmatprep.subr.bf16.mxu0 %v337_v18  ;;  %315 = vmatprep.subr.bf16.mxu1 %v337_v18 }
  0x1b   :  { %282 = vmatpush3.bf16.msra.mxu0 %v338_v19  ;;  %323 = vmatpush3.bf16.msra.mxu1 %v338_v19 }
  0x1c   :  { %283 = vmatprep.subr.bf16.mxu0 %v339_v20  ;;  %316 = vmatprep.subr.bf16.mxu1 %v339_v20 }
  0x1f   :  { %284 = vmatpush3.bf16.msra.mxu0 %v340_v21  ;;  %324 = vmatpush3.bf16.msra.mxu1 %v340_v21 }
  0x22   :  { %207 = vmatmul.mubr.bf16.vlgmr.msra.gmra.mrb[0].mxu0 %v63_v30  ;;  %223 = vmatmul.mubr.bf16.vlgmr.msra.gmra.mrb[0].mxu1 %v67_v31 }
  0x23   :  { %214 = vmatprep.mubr.bf16.mxu0 %v66_v32  ;;  %230 = vmatprep.mubr.bf16.mxu1 %v70_v33 }
  0x2a   :  { %215 = vmatmul.mubr.bf16.gmra.mrb[4].mxu0 %v65_v38  ;;  %231 = vmatmul.mubr.bf16.gmra.mrb[4].mxu1 %v69_v39 }
  0xf5   :  { %v285_v40 = vpop.f32.mrb[0].mxu0  ;;  %v297_v41 = vpop.f32.mrb[0].mxu1 }
  0xf6   :  { %v286_v43 = vpop.f32.mrb[1].mxu0  ;;  %v298_v44 = vpop.f32.mrb[1].mxu1 }
  0xf7   :  { %v287_v45 = vadd.f32 %v286_v43, %v285_v40  ;;  %v299_v46 = vadd.f32 %v298_v44, %v297_v41  ;;  %v288_v47 = vpop.f32.mrb[2].mxu0  ;;  %v300_v48 = vpop.f32.mrb[2].mxu1 }
  0xf8   :  { %v289_v49 = vpop.f32.mrb[3].mxu0  ;;  %v301_v50 = vpop.f32.mrb[3].mxu1 }
  0xf9   :  { %v209_v51 = vadd.f32 %v287_v45, %v252_v42  ;;  %v225_v52 = vadd.f32 %v299_v46, %v252_v42  ;;  %v290_v53 = vadd.f32 %v289_v49, %v288_v47  ;;  %v302_v54 = vadd.f32 %v301_v50, %v300_v48 }
  0xfb   :  { %240 = vst.msk [vmem:[%s495_s3] sm:$0xff] %vm239_vm0, %v209_v51  ;;  %244 = vst.msk [vmem:[%s495_s3 + $0x20] sm:$0xff] %vm239_vm0, %v225_v52  ;;  %v212_v55 = vadd.f32 %v290_v53, %v252_v42  ;;  %v228_v56 = vadd.f32 %v302_v54, %v252_v42 }
  0xfd   :  { %241 = vst.msk [vmem:[%s495_s3 + $0x8] sm:$0xff] %vm239_vm0, %v212_v55  ;;  %245 = vst.msk [vmem:[%s495_s3 + $0x28] sm:$0xff] %vm239_vm0, %v228_v56  ;;  %v291_v57 = vpop.f32.mrb[4].mxu0  ;;  %v303_v58 = vpop.f32.mrb[4].mxu1 }
  0xfe   :  { %v292_v59 = vpop.f32.mrb[5].mxu0  ;;  %v304_v60 = vpop.f32.mrb[5].mxu1 }
  0xff   :  { %v293_v61 = vadd.f32 %v292_v59, %v291_v57  ;;  %v305_v62 = vadd.f32 %v304_v60, %v303_v58  ;;  %v294_v63 = vpop.f32.mrb[6].mxu0  ;;  %v306_v0 = vpop.f32.mrb[6].mxu1 }
 0x100   :  { %v295_v1 = vpop.f32.mrb[7].mxu0  ;;  %v307_v2 = vpop.f32.mrb[7].mxu1 }
 0x101   :  { %v217_v3 = vadd.f32 %v293_v61, %v252_v42  ;;  %v233_v4 = vadd.f32 %v305_v62, %v252_v42  ;;  %v296_v5 = vadd.f32 %v295_v1, %v294_v63  ;;  %v308_v6 = vadd.f32 %v307_v2, %v306_v0 }
 0x103   :  { %242 = vst.msk [vmem:[%s495_s3 + $0x10] sm:$0xff] %vm239_vm0, %v217_v3  ;;  %246 = vst.msk [vmem:[%s495_s3 + $0x30] sm:$0xff] %vm239_vm0, %v233_v4  ;;  %v220_v7 = vadd.f32 %v296_v5, %v252_v42  ;;  %v236_v8 = vadd.f32 %v308_v6, %v252_v42 }
 0x105   :  { %243 = vst.msk [vmem:[%s495_s3 + $0x18] sm:$0xff] %vm239_vm0, %v220_v7  ;;  %247 = vst.msk [vmem:[%s495_s3 + $0x38] sm:$0xff] %vm239_vm0, %v236_v8 }

// kernel: _lambda_.15
= control target key start
LH: loop header
LB: loop body
LE: loop exit
PB: predicated region body
PF: predicated region fallthrough
CT: control target
= control target key end

     0   :  { %vm66_vm0 = vcmask 261120   ;;  %vm144_vm1 = vcmask 785408   ;;  %s460_s1 = inlined_call_operand.vmem [shape: bf16[32,96], index: 1, kind: input, shape index: {}]   ;;  %s461_s2 = inlined_call_operand.vmem [shape: bf16[32,96], index: 2, kind: input, shape index: {}]   ;;  %s462_s0 = inlined_call_operand.vmem [shape: f32[64,32], index: 0, kind: input, shape index: {}]   ;;  %s463_s3 = inlined_call_operand.vmem [shape: f32[1,96], index: 3, kind: input, shape index: {}]   ;;  %s464_s4 = inlined_call_operand.vmem [shape: f32[1,96], index: 4, kind: input, shape index: {}]   ;;  %s465_s5 = inlined_call_operand.vmem [shape: f32[64,96], index: 5, kind: output, shape index: {0}]   ;;  %s466_s6 = inlined_call_operand.vmem [shape: f32[64,96], index: 6, kind: output, shape index: {1}]  }
   0x1   :  { %v307_v0 = vld [vmem:[%s460_s1] sm:$0xff]   ;;  %v309_v2 = vld [vmem:[%s460_s1 + $0x8] sm:$0xff]   ;;  %v25_v6 = vld [vmem:[%s462_s0 + $0x10] sm:$0xff] }
   0x2   :  { %v308_v1 = vld [vmem:[%s461_s2] sm:$0xff]   ;;  %283 = vmatprep.subr.bf16.mxu0 %v307_v0  ;;  %v310_v3 = vld [vmem:[%s461_s2 + $0x8] sm:$0xff]   ;;  %v26_v9 = vld [vmem:[%s462_s0 + $0x18] sm:$0xff]  ;;  %v33_v10 = vmax.f32 %v25_v6, 0.0 }
   0x3   :  { %295 = vmatprep.subr.bf16.mxu1 %v308_v1  ;;  %284 = vmatpush3.bf16.msra.mxu0 %v307_v0  ;;  %v23_v4 = vld [vmem:[%s462_s0] sm:$0xff]  ;;  %v24_v5 = vld [vmem:[%s462_s0 + $0x8] sm:$0xff]  ;;  %v34_v13 = vmax.f32 %v26_v9, 0.0  ;;  %v29_v17 = vld [vmem:[%s462_s0 + $0x30] sm:$0xff] }
   0x4   :  { %296 = vmatpush3.bf16.msra.mxu1 %v308_v1  ;;  %285 = vmatprep.subr.bf16.mxu0 %v309_v2  ;;  %v31_v7 = vmax.f32 %v23_v4, 0.0  ;;  %v32_v8 = vmax.f32 %v24_v5, 0.0  ;;  %v27_v11 = vld [vmem:[%s462_s0 + $0x20] sm:$0xff]  ;;  %v28_v12 = vld [vmem:[%s462_s0 + $0x28] sm:$0xff]  ;;  %v30_v18 = vld [vmem:[%s462_s0 + $0x38] sm:$0xff]  ;;  %v37_v21 = vmax.f32 %v29_v17, 0.0 }
   0x5   :  { %297 = vmatprep.subr.bf16.mxu1 %v310_v3  ;;  %v35_v14 = vmax.f32 %v27_v11, 0.0  ;;  %v36_v15 = vmax.f32 %v28_v12, 0.0  ;;  %v44_v19 = vpack.c.bf16 %v34_v13, %v33_v10  ;;  %v38_v22 = vmax.f32 %v30_v18, 0.0  ;;  %v257_v24 = vld [vmem:[%s463_s3] ss:$0 sm:$0xff] }
   0x6   :  { %v43_v16 = vpack.c.bf16 %v32_v8, %v31_v7  ;;  %v264_v25 = vld [vmem:[%s464_s4] ss:$0 sm:$0xff] }
   0x7   :  { %286 = vmatpush3.bf16.msra.mxu0 %v309_v2  ;;  %v45_v20 = vpack.c.bf16 %v36_v15, %v35_v14  ;;  %v46_v23 = vpack.c.bf16 %v38_v22, %v37_v21 }
   0x8   :  { %298 = vmatpush3.bf16.msra.mxu1 %v310_v3  ;;  %287 = vmatprep.mubr.msk.bf16.mxu0 %vm66_vm0, %v43_v16 }
   0x9   :  { %299 = vmatprep.mubr.msk.bf16.mxu1 %vm66_vm0, %v43_v16 }
   0xa   :  { %288 = vmatmul.mubr.msk.bf16.vlgmr.msra.gmra.mrb[0].mxu0 %vm66_vm0, %v44_v19 }
   0xb   :  { %300 = vmatmul.mubr.msk.bf16.vlgmr.msra.gmra.mrb[0].mxu1 %vm66_vm0, %v44_v19  ;;  %291 = vmatprep.mubr.msk.bf16.mxu0 %vm66_vm0, %v45_v20 }
   0xc   :  { %303 = vmatprep.mubr.msk.bf16.mxu1 %vm66_vm0, %v45_v20 }
  0x12   :  { %292 = vmatmul.mubr.msk.bf16.gmra.mrb[4].mxu0 %vm66_vm0, %v46_v23 }
  0x13   :  { %304 = vmatmul.mubr.msk.bf16.gmra.mrb[4].mxu1 %vm66_vm0, %v46_v23 }
  0xdd   :  { %v289_v26 = vpop.f32.mrb[0].mxu0 }
  0xde   :  { %v122_v27 = vadd.f32 %v289_v26, %v257_v24  ;;  %v301_v28 = vpop.f32.mrb[0].mxu1  ;;  %v113_v29 = vpop.f32.mrb[1].mxu0 }
  0xdf   :  { %v219_v30 = vadd.f32 %v301_v28, %v264_v25  ;;  %v114_v31 = vadd.f32 %v257_v24, %v113_v29  ;;  %v210_v32 = vpop.f32.mrb[1].mxu1  ;;  %v290_v33 = vpop.f32.mrb[2].mxu0 }
  0xe0   :  { %147 = vst.msk [vmem:[%s465_s5 + $0x10] sm:$0xff] %vm144_vm1, %v122_v27  ;;  %v211_v34 = vadd.f32 %v264_v25, %v210_v32  ;;  %v125_v35 = vadd.f32 %v290_v33, %v257_v24  ;;  %v302_v36 = vpop.f32.mrb[2].mxu1  ;;  %v116_v37 = vpop.f32.mrb[3].mxu0 }
  0xe1   :  { %243 = vst.msk [vmem:[%s466_s6 + $0x10] sm:$0xff] %vm144_vm1, %v219_v30  ;;  %145 = vst.msk [vmem:[%s465_s5] sm:$0xff] %vm144_vm1, %v114_v31  ;;  %v222_v38 = vadd.f32 %v302_v36, %v264_v25  ;;  %v117_v39 = vadd.f32 %v257_v24, %v116_v37  ;;  %v213_v40 = vpop.f32.mrb[3].mxu1 }
  0xe2   :  { %241 = vst.msk [vmem:[%s466_s6] sm:$0xff] %vm144_vm1, %v211_v34  ;;  %148 = vst.msk [vmem:[%s465_s5 + $0x18] sm:$0xff] %vm144_vm1, %v125_v35  ;;  %v214_v41 = vadd.f32 %v264_v25, %v213_v40 }
  0xe3   :  { %244 = vst.msk [vmem:[%s466_s6 + $0x18] sm:$0xff] %vm144_vm1, %v222_v38  ;;  %146 = vst.msk [vmem:[%s465_s5 + $0x8] sm:$0xff] %vm144_vm1, %v117_v39 }
  0xe4   :  { %242 = vst.msk [vmem:[%s466_s6 + $0x8] sm:$0xff] %vm144_vm1, %v214_v41 }
  0xe5   :  { %v293_v42 = vpop.f32.mrb[4].mxu0 }
  0xe6   :  { %v138_v43 = vadd.f32 %v293_v42, %v257_v24  ;;  %v305_v44 = vpop.f32.mrb[4].mxu1  ;;  %v129_v45 = vpop.f32.mrb[5].mxu0 }
  0xe7   :  { %v235_v46 = vadd.f32 %v305_v44, %v264_v25  ;;  %v130_v47 = vadd.f32 %v257_v24, %v129_v45  ;;  %v226_v48 = vpop.f32.mrb[5].mxu1  ;;  %v294_v49 = vpop.f32.mrb[6].mxu0 }
  0xe8   :  { %151 = vst.msk [vmem:[%s465_s5 + $0x30] sm:$0xff] %vm144_vm1, %v138_v43  ;;  %v227_v50 = vadd.f32 %v264_v25, %v226_v48  ;;  %v141_v51 = vadd.f32 %v294_v49, %v257_v24  ;;  %v306_v52 = vpop.f32.mrb[6].mxu1  ;;  %v132_v53 = vpop.f32.mrb[7].mxu0 }
  0xe9   :  { %247 = vst.msk [vmem:[%s466_s6 + $0x30] sm:$0xff] %vm144_vm1, %v235_v46  ;;  %149 = vst.msk [vmem:[%s465_s5 + $0x20] sm:$0xff] %vm144_vm1, %v130_v47  ;;  %v238_v54 = vadd.f32 %v306_v52, %v264_v25  ;;  %v133_v55 = vadd.f32 %v257_v24, %v132_v53  ;;  %v229_v56 = vpop.f32.mrb[7].mxu1 }
  0xea   :  { %245 = vst.msk [vmem:[%s466_s6 + $0x20] sm:$0xff] %vm144_vm1, %v227_v50  ;;  %152 = vst.msk [vmem:[%s465_s5 + $0x38] sm:$0xff] %vm144_vm1, %v141_v51  ;;  %v230_v57 = vadd.f32 %v264_v25, %v229_v56 }
  0xeb   :  { %248 = vst.msk [vmem:[%s466_s6 + $0x38] sm:$0xff] %vm144_vm1, %v238_v54  ;;  %150 = vst.msk [vmem:[%s465_s5 + $0x28] sm:$0xff] %vm144_vm1, %v133_v55 }
  0xec   :  { %246 = vst.msk [vmem:[%s466_s6 + $0x28] sm:$0xff] %vm144_vm1, %v230_v57 }

// kernel: _lambda_.12
= control target key start
LH: loop header
LB: loop body
LE: loop exit
PB: predicated region body
PF: predicated region fallthrough
CT: control target
= control target key end

     0   :  { %s3226_s24 = smov 0   ;;  %s3920_s0 = inlined_call_operand.vmem [shape: f32[2,8,8,32], index: 0, kind: input, shape index: {}]   ;;  %s3921_s1 = inlined_call_operand.vmem [shape: bf16[9,32,32], index: 1, kind: input, shape index: {}]   ;;  %s3922_s2 = inlined_call_operand.vmem [shape: f32[1,1,32], index: 2, kind: input, shape index: {}]   ;;  %s3923_s3 = inlined_call_operand.vmem [shape: bf16[9,32,32], index: 3, kind: input, shape index: {}]   ;;  %s3924_s4 = inlined_call_operand.vmem [shape: f32[1,1,32], index: 4, kind: input, shape index: {}]   ;;  %s3925_s5 = inlined_call_operand.vmem [shape: f32[1,1,32], index: 5, kind: input, shape index: {}]   ;;  %s3926_s6 = inlined_call_operand.vmem [shape: f32[1,1,32], index: 6, kind: input, shape index: {}]   ;;  %s3927_s7 = inlined_call_operand.vmem [shape: f32[2,8,8,32], index: 7, kind: output, shape index: {}]  }
   0x1 LB: > { %s2488_s25 = sadd.s32 4294967295, %s3183_s24   ;;  %p2492_p0 = scmp.ge.s32.totalorder %s3183_s24, 1  ;;  %s3183_s24 = sphi %s3226_s24, %s17_s24  }
   0x2   : > { %p237_p1 = scmp.lt.s32.totalorder %s3183_s24, 3 }
   0x4   : > { %p238_p2 = pnand %p2492_p0, %p237_p1 }
   0x5   : > { %v3138_v0 = vld [vmem:[%s3921_s1 + $0x10] sm:$0xff] (!%p238_p2)   ;;  %p269_p3 = scmp.lt.s32.totalorder (!%p238_p2), %s2488_s25, 1  ;;  %v3139_v1 = vld [vmem:[%s3921_s1 + $0x18] sm:$0xff] (!%p238_p2)   ;;  %v3245_v2 = vld [vmem:[%s3925_s5] ss:$0 sm:$0xff] (!%p238_p2)  ;;  %vm351_vm0 = vcmask (!%p238_p2), 1040384  }
   0x6   : > { %241 = sbr.rel (%p238_p2) target bundleno = 752 (0x2f0), region = 48  ;;  %2785 = vmatprep.subr.bf16.mxu0 (!%p238_p2), %v3138_v0  ;;  %v3251_v3 = vld [vmem:[%s3921_s1] sm:$0xff] (!%p238_p2)   ;;  %vm391_vm1 = vcmask (!%p238_p2), 1046528   ;;  %v3185_v32 = vmov (!%p238_p2), 0.0   ;;  %vm444_vm2 = vcmask (!%p238_p2), 261120   ;;  %v3141_v62 = vld [vmem:[%s3921_s1 + $0x8] sm:$0xff] (!%p238_p2)  }
   0x7   : > { %2786 = vmatpush3.bf16.msra.mxu0 (!%p238_p2), %v3138_v0  ;;  %v3263_v4 = vld [vmem:[%s3926_s6] ss:$0 sm:$0xff] (!%p238_p2)  ;;  %v3299_v33 = vrot.slane (!%p238_p2), %v3185_v32, 1  ;;  %vm611_vm3 = vcmask (!%p238_p2), 1045504  }
   0x8   : > { %2787 = vmatprep.subr.bf16.mxu0 (!%p238_p2), %v3139_v1 }
   0xb   : > { %2788 = vmatpush3.bf16.msra.mxu0 (!%p238_p2), %v3139_v1 }
   0xc   : > { %2797 = vmatprep.subr.bf16.mxu0 (!%p238_p2), %v3251_v3 }
   0xd   : > { %s3929_s25 = smov (!%p269_p3, %s2488_s25), 1 }
   0xe   : > { %s2675_s9 = sshll.u32 %s3929_s25, 6 }
   0xf   : > { %s3258_s14 = scalar_lea.vmem %s3920_s0, %s2675_s9  ;;  %s3891_s12 = scalar_lea.vmem %s3927_s7, %s2675_s9 }
  0x10   : > { %v3266_v5 = vld [vmem:[%s3258_s14] sm:$0xff]  ;;  %v281_v6 = vld [vmem:[%s3258_s14 + $0x8] sm:$0xff]  ;;  %v3270_v7 = vld [vmem:[%s3258_s14 + $0x10] sm:$0xff] }
  0x11   : > { %v3273_v8 = vld [vmem:[%s3258_s14 + $0x18] sm:$0xff]  ;;  %v295_v9 = vmul.f32 %v3245_v2, %v3266_v5  ;;  %v296_v10 = vmul.f32 %v3245_v2, %v281_v6  ;;  %v297_v11 = vmul.f32 %v3245_v2, %v3270_v7  ;;  %v284_v12 = vld [vmem:[%s3258_s14 + $0x20] sm:$0xff]  ;;  %v285_v13 = vld [vmem:[%s3258_s14 + $0x28] sm:$0xff] }
  0x12   : > { %v298_v14 = vmul.f32 %v3245_v2, %v3273_v8  ;;  %v299_v15 = vmul.f32 %v3245_v2, %v284_v12  ;;  %v3287_v16 = vld [vmem:[%s3258_s14 + $0x30] sm:$0xff]  ;;  %v300_v17 = vmul.f32 %v3245_v2, %v285_v13  ;;  %v3142_v13 = vld [vmem:[%s3921_s1 + $0x20] sm:$0xff]  }
  0x13   : > { %v310_v18 = vadd.f32 %v3263_v4, %v295_v9  ;;  %v311_v19 = vadd.f32 %v3263_v4, %v296_v10  ;;  %v312_v20 = vadd.f32 %v3263_v4, %v297_v11  ;;  %v301_v23 = vmul.f32 %v3245_v2, %v3287_v16 }
  0x14   : > { %v313_v21 = vadd.f32 %v3263_v4, %v298_v14  ;;  %v314_v22 = vadd.f32 %v3263_v4, %v299_v15  ;;  %v315_v24 = vadd.f32 %v3263_v4, %v300_v17 }
  0x15   : > { %v318_v25 = vmax.f32 %v310_v18, 0.0  ;;  %v319_v26 = vmax.f32 %v311_v19, 0.0  ;;  %v320_v27 = vmax.f32 %v312_v20, 0.0  ;;  %v316_v36 = vadd.f32 %v3263_v4, %v301_v23 }
  0x16   : > { %v321_v28 = vmax.f32 %v313_v21, 0.0  ;;  %v322_v35 = vmax.f32 %v314_v22, 0.0  ;;  %v323_v37 = vmax.f32 %v315_v24, 0.0 }
  0x17   : > { %v335_v29 = vrot.slane %v318_v25, 7  ;;  %v336_v30 = vrot.slane %v319_v26, 7  ;;  %v337_v31 = vrot.slane %v320_v27, 7  ;;  %v324_v55 = vmax.f32 %v316_v36, 0.0  ;;  %v3143_v27 = vld [vmem:[%s3921_s1 + $0x28] sm:$0xff]  }
  0x18   : > { %v338_v34 = vrot.slane %v321_v28, 7  ;;  %v339_v52 = vrot.slane %v322_v35, 7  ;;  %v340_v56 = vrot.slane %v323_v37, 7  ;;  %v3144_v35 = vld [vmem:[%s3921_s1 + $0x30] sm:$0xff]  }
  0x19   : > { %v3303_v38 = vsel %vm351_vm0, 0.0, %v335_v29  ;;  %v3306_v39 = vsel %vm351_vm0, 0.0, %v336_v30  ;;  %v3309_v40 = vsel %vm351_vm0, 0.0, %v337_v31  ;;  %v3312_v41 = vsel %vm351_vm0, %v335_v29, 0.0 }
  0x1a   : > { %v3315_v42 = vsel %vm351_vm0, 0.0, %v338_v34  ;;  %v3318_v43 = vsel %vm351_vm0, %v336_v30, 0.0  ;;  %v3321_v44 = vsel %vm351_vm0, %v337_v31, 0.0  ;;  %v3324_v45 = vsel %vm351_vm0, %v338_v34, 0.0 }
  0x1b   : > { %v394_v46 = vrot.slane %v3303_v38, 1  ;;  %v395_v47 = vrot.slane %v3312_v41, 1  ;;  %v397_v48 = vrot.slane %v3306_v39, 1  ;;  %v398_v49 = vrot.slane %v3318_v43, 1 }
  0x1c   : > { %v400_v50 = vrot.slane %v3309_v40, 1  ;;  %v401_v51 = vrot.slane %v3321_v44, 1  ;;  %v403_v54 = vrot.slane %v3315_v42, 1  ;;  %v404_v59 = vrot.slane %v3324_v45, 1 }
  0x1d   : > { %v3333_v53 = vsel %vm391_vm1, %v394_v46, %v395_v47  ;;  %v3337_v57 = vsel %vm391_vm1, %v397_v48, %v398_v49  ;;  %v3354_v63 = vsel %vm351_vm0, 0.0, %v339_v52  ;;  %v364_v0 = vsel %vm351_vm0, %v339_v52, 0.0 }
  0x1e   : > { %v3340_v58 = vsel %vm391_vm1, %v400_v50, %v401_v51  ;;  %v428_v60 = vpack.c.bf16 %v3333_v53, %v3299_v33  ;;  %v406_v1 = vrot.slane %v3354_v63, 1  ;;  %v341_v6 = vrot.slane %v324_v55, 7 }
  0x1f   : > { %v3347_v61 = vpack.c.bf16 %v3340_v58, %v3337_v57  ;;  %v3361_v9 = vsel %vm391_vm1, %v403_v54, %v404_v59  ;;  %v407_v10 = vrot.slane %v364_v0, 1  ;;  %v3365_v11 = vsel %vm351_vm0, 0.0, %v340_v56 }
  0x20   : > { %2789 = vmatprep.mubr.msk.bf16.mxu0 %vm444_vm2, %v428_v60  ;;  %v3368_v12 = vsel %vm351_vm0, %v340_v56, 0.0  ;;  %v3374_v14 = vsel %vm351_vm0, 0.0, %v341_v6  ;;  %v366_v15 = vsel %vm351_vm0, %v341_v6, 0.0  ;;  %v409_v17 = vrot.slane %v3365_v11, 1  ;;  %v3473_v6 = vld [vmem:[%s3258_s14 + $0x38] sm:$0xff] }
  0x21   : > { %2790 = vmatmul.mubr.msk.bf16.vlgmr.msra.gmra.mrb[0].mxu0 %vm444_vm2, %v3347_v61  ;;  %v3380_v18 = vsel %vm391_vm1, %v406_v1, %v407_v10  ;;  %v412_v19 = vrot.slane %v3374_v14, 1  ;;  %v413_v20 = vrot.slane %v366_v15, 1  ;;  %v372_v24 = vpack.c.bf16 %v3303_v38, %v3185_v32  ;;  %v3145_v1 = vld [vmem:[%s3921_s1 + $0x38] sm:$0xff]  }
  0x22   : > { %2798 = vmatpush3.bf16.msra.mxu0 %v3251_v3  ;;  %v410_v3 = vrot.slane %v3368_v12, 1  ;;  %v3385_v21 = vpack.c.bf16 %v3380_v18, %v3361_v9  ;;  %v3406_v26 = vpack.c.bf16 %v3309_v40, %v3306_v39  ;;  %v3413_v28 = vpack.c.bf16 %v3354_v63, %v3315_v42 }
  0x23   : > { %2799 = vmatprep.subr.bf16.mxu0 %v3141_v62  ;;  %v3391_v23 = vsel %vm391_vm1, %v412_v19, %v413_v20  ;;  %v615_v29 = vrot.slane %v3312_v41, 2  ;;  %v614_v30 = vrot.slane %v3303_v38, 2  ;;  %v3420_v31 = vrot.slane %v3185_v32, 2 }
  0x24   : > { %v3388_v22 = vsel %vm391_vm1, %v409_v17, %v410_v3  ;;  %2793 = vmatprep.mubr.msk.bf16.mxu0 %vm444_vm2, %v3385_v21  ;;  %v617_v36 = vrot.slane %v3306_v39, 2  ;;  %v3433_v37 = vpack.c.bf16 %v3374_v14, %v3365_v11  ;;  %v618_v41 = vrot.slane %v3318_v43, 2 }
  0x25   : > { %v3399_v25 = vpack.c.bf16 %v3391_v23, %v3388_v22  ;;  %v3425_v34 = vsel %vm611_vm3, %v614_v30, %v615_v29  ;;  %v620_v46 = vrot.slane %v3309_v40, 2  ;;  %v621_v47 = vrot.slane %v3321_v44, 2 }
  0x26   : > { %2800 = vmatpush3.bf16.msra.mxu0 %v3141_v62  ;;  %v648_v48 = vpack.c.bf16 %v3425_v34, %v3420_v31  ;;  %v623_v49 = vrot.slane %v3315_v42, 2  ;;  %v624_v50 = vrot.slane %v3324_v45, 2  ;;  %v626_v51 = vrot.slane %v3354_v63, 2 }
  0x27   : > { %2809 = vmatprep.subr.bf16.mxu0 %v3142_v13  ;;  %v627_v52 = vrot.slane %v364_v0, 2  ;;  %v3446_v43 = vsel %vm611_vm3, %v617_v36, %v618_v41  ;;  %v3449_v44 = vsel %vm611_vm3, %v620_v46, %v621_v47  ;;  %v629_v56 = vrot.slane %v3365_v11, 2  ;;  %v3152_v46 = vld [vmem:[%s3921_s1 + $0x70] sm:$0xff]  }
  0x28   : > { %v3453_v54 = vsel %vm611_vm3, %v623_v49, %v624_v50  ;;  %v3460_v55 = vpack.c.bf16 %v3449_v44, %v3446_v43  ;;  %v630_v60 = vrot.slane %v3368_v12, 2  ;;  %v632_v62 = vrot.slane %v3374_v14, 2  ;;  %v3154_v49 = vld [vmem:[%s3921_s1 + $0x80] sm:$0xff]  }
  0x29   : > { %2794 = vmatmul.mubr.msk.bf16.gmra.mrb[4].mxu0 %vm444_vm2, %v3399_v25  ;;  %v3456_v45 = vsel %vm611_vm3, %v626_v51, %v627_v52  ;;  %v633_v0 = vrot.slane %v366_v15, 2  ;;  %v3146_v15 = vld [vmem:[%s3921_s1 + $0x40] sm:$0xff]   ;;  %v754_v3 = vpack.c.bf16 %v3306_v39, %v3303_v38  ;;  %v755_v20 = vpack.c.bf16 %v3315_v42, %v3309_v40  ;;  %v3147_v38 = vld [vmem:[%s3921_s1 + $0x48] sm:$0xff]   ;;  %v3148_v39 = vld [vmem:[%s3921_s1 + $0x50] sm:$0xff]  }
  0x2a   : > { %2801 = vmatprep.mubr.msk.bf16.mxu0 %vm444_vm2, %v372_v24  ;;  %v3465_v59 = vpack.c.bf16 %v3456_v45, %v3453_v54  ;;  %v631_v10 = vsel %vm611_vm3, %v629_v56, %v630_v60  ;;  %v756_v24 = vpack.c.bf16 %v3365_v11, %v3354_v63  ;;  %v866_v42 = vpack.c.bf16 %v3337_v57, %v3333_v53  ;;  %v3149_v53 = vld [vmem:[%s3921_s1 + $0x58] sm:$0xff]   ;;  %v2585_v51 = vld [vmem:[%s3922_s2] ss:$0 sm:$0xff] }
  0x2b   : > { %v634_v12 = vsel %vm611_vm3, %v632_v62, %v633_v0  ;;  %v867_v11 = vpack.c.bf16 %v3361_v9, %v3340_v58  ;;  %v868_v29 = vpack.c.bf16 %v3388_v22, %v3380_v18  ;;  %v3150_v58 = vld [vmem:[%s3921_s1 + $0x60] sm:$0xff]   ;;  %v977_v18 = vpack.c.bf16 %v3453_v54, %v3449_v44 }
  0x2c   : > { %v3486_v17 = vpack.c.bf16 %v634_v12, %v631_v10  ;;  %v978_v22 = vpack.c.bf16 %v631_v10, %v3456_v45 }
  0x31   : > { %2802 = vmatmul.mubr.msk.bf16.vlgmr.msra.gmra.mrb[0].mxu0 %vm444_vm2, %v3406_v26 }
  0x32   : > { %2810 = vmatpush3.bf16.msra.mxu0 %v3142_v13  ;;  %2805 = vmatprep.mubr.msk.bf16.mxu0 %vm444_vm2, %v3413_v28  ;;  %v302_v13 = vmul.f32 %v3245_v2, %v3473_v6 }
  0x33   : > { %2811 = vmatprep.subr.bf16.mxu0 %v3143_v27 }
  0x34   : > { %v317_v19 = vadd.f32 %v3263_v4, %v302_v13 }
  0x36   : > { %2812 = vmatpush3.bf16.msra.mxu0 %v3143_v27  ;;  %v325_v2 = vmax.f32 %v317_v19, 0.0 }
  0x37   : > { %2821 = vmatprep.subr.bf16.mxu0 %v3144_v35 }
  0x38   : > { %v342_v27 = vrot.slane %v325_v2, 7 }
  0x39   : > { %2806 = vmatmul.mubr.msk.bf16.gmra.mrb[4].mxu0 %vm444_vm2, %v3433_v37 }
  0x3a   : > { %2813 = vmatprep.mubr.msk.bf16.mxu0 %vm444_vm2, %v648_v48  ;;  %v359_v4 = vsel %vm351_vm0, 0.0, %v342_v27  ;;  %v367_v63 = vsel %vm351_vm0, %v342_v27, 0.0  ;;  %v3153_v48 = vld [vmem:[%s3921_s1 + $0x78] sm:$0xff]  }
  0x3b   : > { %v757_v40 = vpack.c.bf16 %v359_v4, %v3374_v14  ;;  %v857_v30 = vrot.slane %v359_v4, 1  ;;  %v976_v14 = vpack.c.bf16 %v3446_v43, %v3425_v34  ;;  %v967_v36 = vrot.slane %v359_v4, 2 }
  0x3c   : > { %v968_v41 = vrot.slane %v367_v63, 2  ;;  %v1082_v50 = vpack.c.bf16 %v3185_v32, %v359_v4 }
  0x3e   : > { %v969_v34 = vsel %vm611_vm3, %v967_v36, %v968_v41 }
  0x3f   : > { %v979_v47 = vpack.c.bf16 %v969_v34, %v634_v12 }
  0x41   : > { %2814 = vmatmul.mubr.msk.bf16.vlgmr.msra.gmra.mrb[0].mxu0 %vm444_vm2, %v3460_v55 }
  0x42   : > { %2822 = vmatpush3.bf16.msra.mxu0 %v3144_v35  ;;  %2817 = vmatprep.mubr.msk.bf16.mxu0 %vm444_vm2, %v3465_v59  ;;  %v858_v35 = vrot.slane %v367_v63, 1 }
  0x43   : > { %2823 = vmatprep.subr.bf16.mxu0 %v3145_v1 }
  0x44   : > { %v859_v57 = vsel %vm391_vm1, %v857_v30, %v858_v35 }
  0x45   : > { %v869_v9 = vpack.c.bf16 %v859_v57, %v3391_v23  ;;  %v3151_v23 = vld [vmem:[%s3921_s1 + $0x68] sm:$0xff]  }
  0x46   : > { %2824 = vmatpush3.bf16.msra.mxu0 %v3145_v1 }
  0x47   : > { %2833 = vmatprep.subr.bf16.mxu0 %v3146_v15 }
  0x49   : > { %2818 = vmatmul.mubr.msk.bf16.gmra.mrb[4].mxu0 %vm444_vm2, %v3486_v17 }
  0x4a   : > { %2825 = vmatprep.mubr.msk.bf16.mxu0 %vm444_vm2, %v754_v3 }
  0x51   : > { %2826 = vmatmul.mubr.msk.bf16.vlgmr.msra.gmra.mrb[0].mxu0 %vm444_vm2, %v755_v20 }
  0x52   : > { %2834 = vmatpush3.bf16.msra.mxu0 %v3146_v15  ;;  %2829 = vmatprep.mubr.msk.bf16.mxu0 %vm444_vm2, %v756_v24 }
  0x53   : > { %2835 = vmatprep.subr.bf16.mxu0 %v3147_v38 }
  0x56   : > { %2836 = vmatpush3.bf16.msra.mxu0 %v3147_v38 }
  0x57   : > { %2845 = vmatprep.subr.bf16.mxu0 %v3148_v39 }
  0x59   : > { %2830 = vmatmul.mubr.msk.bf16.gmra.mrb[4].mxu0 %vm444_vm2, %v757_v40 }
  0x5a   : > { %2837 = vmatprep.mubr.msk.bf16.mxu0 %vm444_vm2, %v866_v42 }
  0x61   : > { %2838 = vmatmul.mubr.msk.bf16.vlgmr.msra.gmra.mrb[0].mxu0 %vm444_vm2, %v867_v11 }
  0x62   : > { %2846 = vmatpush3.bf16.msra.mxu0 %v3148_v39  ;;  %2841 = vmatprep.mubr.msk.bf16.mxu0 %vm444_vm2, %v868_v29 }
  0x63   : > { %2847 = vmatprep.subr.bf16.mxu0 %v3149_v53 }
  0x66   : > { %2848 = vmatpush3.bf16.msra.mxu0 %v3149_v53 }
  0x67   : > { %2857 = vmatprep.subr.bf16.mxu0 %v3150_v58 }
  0x69   : > { %2842 = vmatmul.mubr.msk.bf16.gmra.mrb[4].mxu0 %vm444_vm2, %v869_v9 }
  0x6a   : > { %2849 = vmatprep.mubr.msk.bf16.mxu0 %vm444_vm2, %v976_v14 }
  0x71   : > { %2850 = vmatmul.mubr.msk.bf16.vlgmr.msra.gmra.mrb[0].mxu0 %vm444_vm2, %v977_v18 }
  0x72   : > { %2858 = vmatpush3.bf16.msra.mxu0 %v3150_v58  ;;  %2853 = vmatprep.mubr.msk.bf16.mxu0 %vm444_vm2, %v978_v22 }
  0x73   : > { %2859 = vmatprep.subr.bf16.mxu0 %v3151_v23 }
  0x76   : > { %2860 = vmatpush3.bf16.msra.mxu0 %v3151_v23 }
  0x77   : > { %2869 = vmatprep.subr.bf16.mxu0 %v3152_v46 }
  0x79   : > { %2854 = vmatmul.mubr.msk.bf16.gmra.mrb[4].mxu0 %vm444_vm2, %v979_v47 }
  0x7a   : > { %2861 = vmatprep.mubr.msk.bf16.mxu0 %vm444_vm2, %v3406_v26  ;;  %v3155_v26 = vld [vmem:[%s3921_s1 + $0x88] sm:$0xff]  }
  0x81   : > { %2862 = vmatmul.mubr.msk.bf16.vlgmr.msra.gmra.mrb[0].mxu0 %vm444_vm2, %v3413_v28  ;;  %v1176_v28 = vpack.c.bf16 %v3299_v33, %v859_v57 }
  0x82   : > { %2870 = vmatpush3.bf16.msra.mxu0 %v3152_v46  ;;  %2865 = vmatprep.mubr.msk.bf16.mxu0 %vm444_vm2, %v3433_v37  ;;  %v3586_v37 = vld [vmem:[%s3923_s3] sm:$0xff]  }
  0x83   : > { %2871 = vmatprep.subr.bf16.mxu0 %v3153_v48 }
  0x86   : > { %2872 = vmatpush3.bf16.msra.mxu0 %v3153_v48 }
  0x87   : > { %2881 = vmatprep.subr.bf16.mxu0 %v3154_v49 }
  0x89   : > { %2866 = vmatmul.mubr.msk.bf16.gmra.mrb[4].mxu0 %vm444_vm2, %v1082_v50 }
  0x8a   : > { %2873 = vmatprep.mubr.msk.bf16.mxu0 %vm444_vm2, %v3347_v61  ;;  %v1270_v61 = vpack.c.bf16 %v3420_v31, %v969_v34 }
  0x91   : > { %2874 = vmatmul.mubr.msk.bf16.vlgmr.msra.gmra.mrb[0].mxu0 %vm444_vm2, %v3385_v21  ;;  %v3156_v21 = vld [vmem:[%s3923_s3 + $0x10] sm:$0xff]  }
  0x92   : > { %2882 = vmatpush3.bf16.msra.mxu0 %v3154_v49  ;;  %2877 = vmatprep.mubr.msk.bf16.mxu0 %vm444_vm2, %v3399_v25  ;;  %v3157_v25 = vld [vmem:[%s3923_s3 + $0x18] sm:$0xff]  }
  0x93   : > { %2883 = vmatprep.subr.bf16.mxu0 %v3155_v26  ;;  %2893 = vmatprep.subr.bf16.mxu1 %v3156_v21 }
  0x94   : > { %2894 = vmatpush3.bf16.msra.mxu1 %v3156_v21 }
  0x95   : > { %2895 = vmatprep.subr.bf16.mxu1 %v3157_v25 }
  0x96   : > { %2884 = vmatpush3.bf16.msra.mxu0 %v3155_v26 }
  0x98   : > { %2896 = vmatpush3.bf16.msra.mxu1 %v3157_v25 }
  0x99   : > { %2878 = vmatmul.mubr.msk.bf16.gmra.mrb[4].mxu0 %vm444_vm2, %v1176_v28  ;;  %2905 = vmatprep.subr.bf16.mxu1 %v3586_v37 }
  0x9a   : > { %2885 = vmatprep.mubr.msk.bf16.mxu0 %vm444_vm2, %v3460_v55 }
  0xa1   : > { %2886 = vmatmul.mubr.msk.bf16.vlgmr.msra.gmra.mrb[0].mxu0 %vm444_vm2, %v3465_v59 }
  0xa2   : > { %2889 = vmatprep.mubr.msk.bf16.mxu0 %vm444_vm2, %v3486_v17 }
  0xa9   : > { %2890 = vmatmul.mubr.msk.bf16.gmra.mrb[4].mxu0 %vm444_vm2, %v1270_v61 }
 0x174   : > { %v2887_v52 = vpop.f32.mrb[0].mxu0 }
 0x175   : > { %v1367_v43 = vadd.f32 %v2887_v52, %v2585_v51  ;;  %v1320_v44 = vpop.f32.mrb[1].mxu0 }
 0x176   : > { %v1365_v54 = vadd.f32 %v2585_v51, %v1320_v44  ;;  %v2888_v45 = vpop.f32.mrb[2].mxu0 }
 0x177   : > { %v1375_v55 = vmax.f32 %v1367_v43, 0.0  ;;  %v1368_v56 = vadd.f32 %v2888_v45, %v2585_v51  ;;  %v1323_v59 = vpop.f32.mrb[3].mxu0 }
 0x178   : > { %v1373_v60 = vmax.f32 %v1365_v54, 0.0  ;;  %v1366_v62 = vadd.f32 %v2585_v51, %v1323_v59 }
 0x179   : > { %v1392_v0 = vrot.slane %v1375_v55, 7  ;;  %v1376_v1 = vmax.f32 %v1368_v56, 0.0 }
 0x17a   : > { %v1390_v10 = vrot.slane %v1373_v60, 7  ;;  %v1374_v19 = vmax.f32 %v1366_v62, 0.0 }
 0x17b   : > { %v3593_v12 = vsel %vm351_vm0, 0.0, %v1392_v0  ;;  %v1416_v13 = vsel %vm351_vm0, %v1392_v0, 0.0  ;;  %v1393_v15 = vrot.slane %v1376_v1, 7 }
 0x17c   : > { %v1665_v17 = vrot.slane %v3593_v12, 2  ;;  %v1666_v3 = vrot.slane %v1416_v13, 2  ;;  %v2891_v2 = vpop.f32.mrb[4].mxu0  ;;  %v3598_v20 = vsel %vm351_vm0, 0.0, %v1390_v10  ;;  %v3601_v24 = vsel %vm351_vm0, %v1390_v10, 0.0 }
 0x17d   : > { %v3604_v27 = vsel %vm351_vm0, 0.0, %v1393_v15  ;;  %v3607_v38 = vsel %vm351_vm0, %v1393_v15, 0.0  ;;  %v1336_v4 = vpop.f32.mrb[5].mxu0  ;;  %v1450_v39 = vrot.slane %v3593_v12, 1  ;;  %v1451_v40 = vrot.slane %v1416_v13, 1 }
 0x17e   : > { %v3611_v42 = vsel %vm611_vm3, %v1665_v17, %v1666_v3  ;;  %v1445_v63 = vrot.slane %v3601_v24, 1  ;;  %v2892_v11 = vpop.f32.mrb[6].mxu0  ;;  %v1659_v29 = vrot.slane %v3598_v20, 2  ;;  %v1660_v30 = vrot.slane %v3601_v24, 2 }
 0x17f   : > { %v1453_v35 = vrot.slane %v3604_v27, 1  ;;  %v1454_v53 = vrot.slane %v3607_v38, 1  ;;  %v1339_v57 = vpop.f32.mrb[7].mxu0  ;;  %v1799_v58 = vpack.c.bf16 %v3604_v27, %v3593_v12  ;;  %v1391_v9 = vrot.slane %v1374_v19, 7 }
 0x180   : > { %v1371_v14 = vadd.f32 %v2891_v2, %v2585_v51  ;;  %v1369_v18 = vadd.f32 %v2585_v51, %v1336_v4  ;;  %v1668_v22 = vrot.slane %v3604_v27, 2  ;;  %v1372_v36 = vadd.f32 %v2892_v11, %v2585_v51 }
 0x181   : > { %v1370_v41 = vadd.f32 %v2585_v51, %v1339_v57  ;;  %v1444_v23 = vrot.slane %v3598_v20, 1  ;;  %v3623_v34 = vsel %vm351_vm0, 0.0, %v1391_v9  ;;  %v1415_v46 = vsel %vm351_vm0, %v1391_v9, 0.0  ;;  %v3159_v9 = vld [vmem:[%s3923_s3 + $0x8] sm:$0xff]  }
 0x182   : > { %v1379_v47 = vmax.f32 %v1371_v14, 0.0  ;;  %v1377_v48 = vmax.f32 %v1369_v18, 0.0  ;;  %v3628_v49 = vpack.c.bf16 %v3593_v12, %v3623_v34  ;;  %v1447_v50 = vrot.slane %v3623_v34, 1  ;;  %v3167_v12 = vld [vmem:[%s3923_s3 + $0x58] sm:$0xff]  }
 0x183   : > { %v1448_v26 = vrot.slane %v1415_v46, 1  ;;  %v1662_v28 = vrot.slane %v3623_v34, 2  ;;  %v1669_v61 = vrot.slane %v3607_v38, 2  ;;  %v1663_v21 = vrot.slane %v1415_v46, 2 }
 0x184   : > { %v1396_v25 = vrot.slane %v1379_v47, 7  ;;  %v1394_v51 = vrot.slane %v1377_v48, 7  ;;  %v1380_v52 = vmax.f32 %v1372_v36, 0.0  ;;  %v1378_v43 = vmax.f32 %v1370_v41, 0.0 }
 0x185   : > { %v3634_v44 = vsel %vm391_vm1, %v1444_v23, %v1445_v63  ;;  %v3637_v54 = vsel %vm391_vm1, %v1450_v39, %v1451_v40  ;;  %v3640_v45 = vsel %vm611_vm3, %v1662_v28, %v1663_v21  ;;  %v3655_v0 = vsel %vm391_vm1, %v1447_v50, %v1448_v26 }
 0x186   : > { %v3643_v55 = vsel %vm351_vm0, 0.0, %v1396_v25  ;;  %v1420_v56 = vsel %vm351_vm0, %v1396_v25, 0.0  ;;  %v3647_v59 = vsel %vm351_vm0, 0.0, %v1394_v51  ;;  %v3651_v60 = vpack.c.bf16 %v3611_v42, %v3640_v45 }
 0x187   : > { %v1462_v62 = vrot.slane %v3643_v55, 1  ;;  %v3658_v1 = vsel %vm391_vm1, %v1453_v35, %v1454_v53  ;;  %v1463_v10 = vrot.slane %v1420_v56, 1  ;;  %v1677_v13 = vrot.slane %v3643_v55, 2 }
 0x188   : > { %v1678_v15 = vrot.slane %v1420_v56, 2  ;;  %v1418_v17 = vsel %vm351_vm0, %v1394_v51, 0.0  ;;  %v1456_v3 = vrot.slane %v3647_v59, 1  ;;  %v1397_v2 = vrot.slane %v1380_v52, 7 }
 0x189   : > { %v1457_v19 = vrot.slane %v1418_v17, 1  ;;  %v1395_v38 = vrot.slane %v1378_v43, 7  ;;  %v1477_v4 = vpack.c.bf16 %v3634_v44, %v3299_v33  ;;  %v3667_v39 = vpack.c.bf16 %v3637_v54, %v3655_v0 }
 0x18a   : > { %v1910_v40 = vpack.c.bf16 %v3655_v0, %v3634_v44  ;;  %v1911_v63 = vpack.c.bf16 %v3658_v1, %v3637_v54  ;;  %v3674_v11 = vsel %vm351_vm0, 0.0, %v1397_v2  ;;  %v1421_v35 = vsel %vm351_vm0, %v1397_v2, 0.0  ;;  %v3170_v44 = vld [vmem:[%s3923_s3 + $0x70] sm:$0xff]   ;;  %v3171_v54 = vld [vmem:[%s3923_s3 + $0x78] sm:$0xff]   ;;  %v3172_v0 = vld [vmem:[%s3923_s3 + $0x80] sm:$0xff]  }
 0x18b   : > { %v3678_v53 = vsel %vm351_vm0, 0.0, %v1395_v38  ;;  %v1419_v57 = vsel %vm351_vm0, %v1395_v38, 0.0  ;;  %v1671_v14 = vrot.slane %v3647_v59, 2  ;;  %v1672_v18 = vrot.slane %v1418_v17, 2  ;;  %2897 = vmatprep.mubr.msk.bf16.mxu1 %vm444_vm2, %v1477_v4 }
 0x18c   : > { %v1901_v36 = vrot.slane %v3674_v11, 1  ;;  %v1902_v41 = vrot.slane %v1421_v35, 1  ;;  %v1459_v23 = vrot.slane %v3678_v53, 1  ;;  %v1460_v46 = vrot.slane %v1419_v57, 1  ;;  %2898 = vmatmul.mubr.msk.bf16.vlgmr.msra.gmra.mrb[0].mxu1 %vm444_vm2, %v3667_v39 }
 0x18d   : > { %v1674_v47 = vrot.slane %v3678_v53, 2  ;;  %v1675_v48 = vrot.slane %v1419_v57, 2  ;;  %v2011_v50 = vrot.slane %v3674_v11, 2  ;;  %v2012_v26 = vrot.slane %v1421_v35, 2  ;;  %2906 = vmatpush3.bf16.msra.mxu1 %v3586_v37  ;;  %v3160_v37 = vld [vmem:[%s3923_s3 + $0x20] sm:$0xff]  }
 0x18e   : > { %v3694_v28 = vsel %vm391_vm1, %v1456_v3, %v1457_v19  ;;  %v3698_v21 = vpack.c.bf16 %v3647_v59, %v3604_v27  ;;  %2907 = vmatprep.subr.bf16.mxu1 %v3159_v9  ;;  %v3705_v51 = vsel %vm391_vm1, %v1459_v23, %v1460_v46  ;;  %v3708_v52 = vsel %vm391_vm1, %v1462_v62, %v1463_v10  ;;  %v3164_v57 = vld [vmem:[%s3923_s3 + $0x40] sm:$0xff]  }
 0x18f   : > { %v3702_v25 = vpack.c.bf16 %v3694_v28, %v3658_v1  ;;  %v3715_v43 = vpack.c.bf16 %v3643_v55, %v3678_v53  ;;  %v3719_v56 = vpack.c.bf16 %v3708_v52, %v3705_v51  ;;  %v3726_v17 = vsel %vm611_vm3, %v1659_v29, %v1660_v30  ;;  %v3168_v27 = vld [vmem:[%s3923_s3 + $0x60] sm:$0xff]   ;;  %v3173_v1 = vld [vmem:[%s3923_s3 + $0x88] sm:$0xff]  }
 0x190   : > { %v3731_v62 = vsel %vm611_vm3, %v1668_v22, %v1669_v61  ;;  %v3734_v10 = vsel %vm611_vm3, %v1671_v14, %v1672_v18  ;;  %v3745_v29 = vsel %vm611_vm3, %v1674_v47, %v1675_v48  ;;  %v3748_v30 = vsel %vm611_vm3, %v1677_v13, %v1678_v15  ;;  %v3166_v14 = vld [vmem:[%s3923_s3 + $0x50] sm:$0xff]   ;;  %v3174_v48 = vld [vmem:[%s3258_s14 + $0x8] sm:$0xff] }
 0x191   : > { %2901 = vmatprep.mubr.msk.bf16.mxu1 %vm444_vm2, %v3702_v25  ;;  %v3740_v3 = vpack.c.bf16 %v3734_v10, %v3731_v62  ;;  %v2021_v24 = vpack.c.bf16 %v3731_v62, %v3611_v42  ;;  %2908 = vmatpush3.bf16.msra.mxu1 %v3159_v9  ;;  %v3752_v22 = vpack.c.bf16 %v3748_v30, %v3745_v29  ;;  %v3165_v9 = vld [vmem:[%s3923_s3 + $0x48] sm:$0xff]  }
 0x192   : > { %v1798_v61 = vpack.c.bf16 %v3623_v34, %v3598_v20  ;;  %v1800_v19 = vpack.c.bf16 %v3678_v53, %v3647_v59  ;;  %v1801_v42 = vpack.c.bf16 %v3674_v11, %v3643_v55  ;;  %2917 = vmatprep.subr.bf16.mxu1 %v3160_v37  ;;  %v1912_v2 = vpack.c.bf16 %v3705_v51, %v3694_v28  ;;  %v3163_v53 = vld [vmem:[%s3923_s3 + $0x38] sm:$0xff]  }
 0x193   : > { %v3763_v13 = vsel %vm391_vm1, %v1901_v36, %v1902_v41  ;;  %v2020_v15 = vpack.c.bf16 %v3640_v45, %v3726_v17  ;;  %v2022_v38 = vpack.c.bf16 %v3745_v29, %v3734_v10  ;;  %v1426_v34 = vpack.c.bf16 %v3598_v20, %v3185_v32  ;;  %v3161_v45 = vld [vmem:[%s3923_s3 + $0x28] sm:$0xff]   ;;  %v3162_v20 = vld [vmem:[%s3923_s3 + $0x30] sm:$0xff]  }
 0x194   : > { %v1913_v59 = vpack.c.bf16 %v3763_v13, %v3708_v52  ;;  %v3774_v55 = vsel %vm611_vm3, %v2011_v50, %v2012_v26  ;;  %2902 = vmatmul.mubr.msk.bf16.gmra.mrb[4].mxu1 %vm444_vm2, %v3719_v56  ;;  %v1692_v35 = vpack.c.bf16 %v3726_v17, %v3420_v31  ;;  %v3175_v52 = vld [vmem:[%s3258_s14 + $0x20] sm:$0xff]  ;;  %v3176_v17 = vld [vmem:[%s3258_s14 + $0x28] sm:$0xff] }
 0x195   : > { %v2023_v4 = vpack.c.bf16 %v3774_v55, %v3748_v30  ;;  %2909 = vmatprep.mubr.msk.bf16.mxu1 %vm444_vm2, %v1426_v34 }
 0x19c   : > { %2910 = vmatmul.mubr.msk.bf16.vlgmr.msra.gmra.mrb[0].mxu1 %vm444_vm2, %v3628_v49 }
 0x19d   : > { %2918 = vmatpush3.bf16.msra.mxu1 %v3160_v37  ;;  %2913 = vmatprep.mubr.msk.bf16.mxu1 %vm444_vm2, %v3698_v21 }
 0x19e   : > { %2919 = vmatprep.subr.bf16.mxu1 %v3161_v45 }
 0x1a1   : > { %2920 = vmatpush3.bf16.msra.mxu1 %v3161_v45 }
 0x1a2   : > { %2929 = vmatprep.subr.bf16.mxu1 %v3162_v20 }
 0x1a4   : > { %2914 = vmatmul.mubr.msk.bf16.gmra.mrb[4].mxu1 %vm444_vm2, %v3715_v43 }
 0x1a5   : > { %2921 = vmatprep.mubr.msk.bf16.mxu1 %vm444_vm2, %v1692_v35 }
 0x1ac   : > { %2922 = vmatmul.mubr.msk.bf16.vlgmr.msra.gmra.mrb[0].mxu1 %vm444_vm2, %v3651_v60 }
 0x1ad   : > { %2930 = vmatpush3.bf16.msra.mxu1 %v3162_v20  ;;  %2925 = vmatprep.mubr.msk.bf16.mxu1 %vm444_vm2, %v3740_v3 }
 0x1ae   : > { %2931 = vmatprep.subr.bf16.mxu1 %v3163_v53 }
 0x1b1   : > { %2932 = vmatpush3.bf16.msra.mxu1 %v3163_v53 }
 0x1b2   : > { %2941 = vmatprep.subr.bf16.mxu1 %v3164_v57 }
 0x1b4   : > { %2926 = vmatmul.mubr.msk.bf16.gmra.mrb[4].mxu1 %vm444_vm2, %v3752_v22 }
 0x1b5   : > { %2933 = vmatprep.mubr.msk.bf16.mxu1 %vm444_vm2, %v1798_v61 }
 0x1bc   : > { %2934 = vmatmul.mubr.msk.bf16.vlgmr.msra.gmra.mrb[0].mxu1 %vm444_vm2, %v1799_v58  ;;  %v3169_v58 = vld [vmem:[%s3923_s3 + $0x68] sm:$0xff]  }
 0x1bd   : > { %2942 = vmatpush3.bf16.msra.mxu1 %v3164_v57  ;;  %2937 = vmatprep.mubr.msk.bf16.mxu1 %vm444_vm2, %v1800_v19 }
 0x1be   : > { %2943 = vmatprep.subr.bf16.mxu1 %v3165_v9 }
 0x1c1   : > { %2944 = vmatpush3.bf16.msra.mxu1 %v3165_v9 }
 0x1c2   : > { %2953 = vmatprep.subr.bf16.mxu1 %v3166_v14 }
 0x1c4   : > { %2938 = vmatmul.mubr.msk.bf16.gmra.mrb[4].mxu1 %vm444_vm2, %v1801_v42 }
 0x1c5   : > { %2945 = vmatprep.mubr.msk.bf16.mxu1 %vm444_vm2, %v1910_v40 }
 0x1cc   : > { %2946 = vmatmul.mubr.msk.bf16.vlgmr.msra.gmra.mrb[0].mxu1 %vm444_vm2, %v1911_v63 }
 0x1cd   : > { %2954 = vmatpush3.bf16.msra.mxu1 %v3166_v14  ;;  %2949 = vmatprep.mubr.msk.bf16.mxu1 %vm444_vm2, %v1912_v2 }
 0x1ce   : > { %2955 = vmatprep.subr.bf16.mxu1 %v3167_v12 }
 0x1d1   : > { %2956 = vmatpush3.bf16.msra.mxu1 %v3167_v12 }
 0x1d2   : > { %2965 = vmatprep.subr.bf16.mxu1 %v3168_v27 }
 0x1d4   : > { %2950 = vmatmul.mubr.msk.bf16.gmra.mrb[4].mxu1 %vm444_vm2, %v1913_v59 }
 0x1d5   : > { %2957 = vmatprep.mubr.msk.bf16.mxu1 %vm444_vm2, %v2020_v15 }
 0x1dc   : > { %2958 = vmatmul.mubr.msk.bf16.vlgmr.msra.gmra.mrb[0].mxu1 %vm444_vm2, %v2021_v24 }
 0x1dd   : > { %2966 = vmatpush3.bf16.msra.mxu1 %v3168_v27  ;;  %2961 = vmatprep.mubr.msk.bf16.mxu1 %vm444_vm2, %v2022_v38 }
 0x1de   : > { %2967 = vmatprep.subr.bf16.mxu1 %v3169_v58 }
 0x1e1   : > { %2968 = vmatpush3.bf16.msra.mxu1 %v3169_v58 }
 0x1e2   : > { %2977 = vmatprep.subr.bf16.mxu1 %v3170_v44 }
 0x1e4   : > { %2962 = vmatmul.mubr.msk.bf16.gmra.mrb[4].mxu1 %vm444_vm2, %v2023_v4 }
 0x1e5   : > { %2969 = vmatprep.mubr.msk.bf16.mxu1 %vm444_vm2, %v3628_v49  ;;  %v2126_v49 = vpack.c.bf16 %v3185_v32, %v3674_v11  ;;  %v2220_v32 = vpack.c.bf16 %v3299_v33, %v3763_v13  ;;  %v2672_v33 = vld [vmem:[%s3924_s4] ss:$0 sm:$0xff] }
 0x1ec   : > { %2970 = vmatmul.mubr.msk.bf16.vlgmr.msra.gmra.mrb[0].mxu1 %vm444_vm2, %v3698_v21 }
 0x1ed   : > { %2978 = vmatpush3.bf16.msra.mxu1 %v3170_v44  ;;  %2973 = vmatprep.mubr.msk.bf16.mxu1 %vm444_vm2, %v3715_v43 }
 0x1ee   : > { %2979 = vmatprep.subr.bf16.mxu1 %v3171_v54 }
 0x1f1   : > { %2980 = vmatpush3.bf16.msra.mxu1 %v3171_v54 }
 0x1f2   : > { %2989 = vmatprep.subr.bf16.mxu1 %v3172_v0 }
 0x1f4   : > { %2974 = vmatmul.mubr.msk.bf16.gmra.mrb[4].mxu1 %vm444_vm2, %v2126_v49 }
 0x1f5   : > { %2981 = vmatprep.mubr.msk.bf16.mxu1 %vm444_vm2, %v3667_v39  ;;  %v2314_v39 = vpack.c.bf16 %v3420_v31, %v3774_v55 }
 0x1fc   : > { %2982 = vmatmul.mubr.msk.bf16.vlgmr.msra.gmra.mrb[0].mxu1 %vm444_vm2, %v3702_v25 }
 0x1fd   : > { %2990 = vmatpush3.bf16.msra.mxu1 %v3172_v0  ;;  %2985 = vmatprep.mubr.msk.bf16.mxu1 %vm444_vm2, %v3719_v56 }
 0x1fe   : > { %2991 = vmatprep.subr.bf16.mxu1 %v3173_v1 }
 0x201   : > { %2992 = vmatpush3.bf16.msra.mxu1 %v3173_v1 }
 0x204   : > { %2986 = vmatmul.mubr.msk.bf16.gmra.mrb[4].mxu1 %vm444_vm2, %v2220_v32 }
 0x205   : > { %2993 = vmatprep.mubr.msk.bf16.mxu1 %vm444_vm2, %v3651_v60 }
 0x20c   : > { %2994 = vmatmul.mubr.msk.bf16.vlgmr.msra.gmra.mrb[0].mxu1 %vm444_vm2, %v3740_v3 }
 0x20d   : > { %2997 = vmatprep.mubr.msk.bf16.mxu1 %vm444_vm2, %v3752_v22 }
 0x214   : > { %2998 = vmatmul.mubr.msk.bf16.gmra.mrb[4].mxu1 %vm444_vm2, %v2314_v39 }
 0x2df   : > { %v2995_v40 = vpop.f32.mrb[0].mxu1 }
 0x2e0   : > { %v2411_v63 = vadd.f32 %v2995_v40, %v2672_v33  ;;  %v2364_v11 = vpop.f32.mrb[1].mxu1 }
 0x2e1   : > { %v2409_v31 = vadd.f32 %v2672_v33, %v2364_v11  ;;  %v2996_v60 = vpop.f32.mrb[2].mxu1 }
 0x2e2   : > { %v2419_v18 = vadd.f32 %v2411_v63, %v3270_v7  ;;  %v2412_v36 = vadd.f32 %v2996_v60, %v2672_v33  ;;  %v2367_v41 = vpop.f32.mrb[3].mxu1 }
 0x2e3   : > { %v2417_v23 = vadd.f32 %v2409_v31, %v3266_v5  ;;  %v2410_v46 = vadd.f32 %v2672_v33, %v2367_v41 }
 0x2e4   : > { %2427 = vst.msk [vmem:[%s3891_s12 + $0x10] sm:$0xff] %vm444_vm2, %v2419_v18  ;;  %v2420_v47 = vadd.f32 %v2412_v36, %v3273_v8 }
 0x2e5   : > { %2425 = vst.msk [vmem:[%s3891_s12] sm:$0xff] %vm444_vm2, %v2417_v23  ;;  %v2418_v50 = vadd.f32 %v3174_v48, %v2410_v46 }
 0x2e6   : > { %2428 = vst.msk [vmem:[%s3891_s12 + $0x18] sm:$0xff] %vm444_vm2, %v2420_v47 }
 0x2e7   : > { %2426 = vst.msk [vmem:[%s3891_s12 + $0x8] sm:$0xff] %vm444_vm2, %v2418_v50  ;;  %v2999_v7 = vpop.f32.mrb[4].mxu1 }
 0x2e8   : > { %v2415_v5 = vadd.f32 %v2999_v7, %v2672_v33  ;;  %v2380_v26 = vpop.f32.mrb[5].mxu1 }
 0x2e9   : > { %v2413_v28 = vadd.f32 %v2672_v33, %v2380_v26  ;;  %v3000_v21 = vpop.f32.mrb[6].mxu1 }
 0x2ea   : > { %v2423_v8 = vadd.f32 %v2415_v5, %v3287_v16  ;;  %v2416_v25 = vadd.f32 %v3000_v21, %v2672_v33  ;;  %v2383_v51 = vpop.f32.mrb[7].mxu1 }
 0x2eb   : > { %v2421_v37 = vadd.f32 %v3175_v52, %v2413_v28  ;;  %v2414_v43 = vadd.f32 %v2672_v33, %v2383_v51 }
 0x2ec   : > { %2431 = vst.msk [vmem:[%s3891_s12 + $0x30] sm:$0xff] %vm444_vm2, %v2423_v8  ;;  %v2424_v56 = vadd.f32 %v2416_v25, %v3473_v6 }
 0x2ed   : > { %2429 = vst.msk [vmem:[%s3891_s12 + $0x20] sm:$0xff] %vm444_vm2, %v2421_v37  ;;  %v2422_v62 = vadd.f32 %v3176_v17, %v2414_v43 }
 0x2ee   : > { %2432 = vst.msk [vmem:[%s3891_s12 + $0x38] sm:$0xff] %vm444_vm2, %v2424_v56 }
 0x2ef   : > { %2430 = vst.msk [vmem:[%s3891_s12 + $0x28] sm:$0xff] %vm444_vm2, %v2422_v62 }
 0x2f0 PF: > { %s17_s24 = sadd.s32 1, %s3183_s24  }
 0x2f1   : > { %p14_p4 = scmp.ge.s32.totalorder %s17_s24, 4  }
 0x2f3   :  { %16 = sbr.rel (!%p14_p4) target bundleno = 1 (0x1), region = 94 }

// kernel: _lambda_.17
= control target key start
LH: loop header
LB: loop body
LE: loop exit
PB: predicated region body
PF: predicated region fallthrough
CT: control target
= control target key end

     0   :  { %vm92_vm0 = vcmask 261120   ;;  %vm274_vm1 = vcmask 785408   ;;  %s806_s3 = inlined_call_operand.vmem [shape: bf16[32,96], index: 3, kind: input, shape index: {}]   ;;  %s807_s5 = inlined_call_operand.vmem [shape: bf16[32,96], index: 5, kind: input, shape index: {}]   ;;  %s808_s1 = inlined_call_operand.vmem [shape: f32[64,32], index: 1, kind: input, shape index: {}]   ;;  %s809_s2 = inlined_call_operand.vmem [shape: bf16[32,96], index: 2, kind: input, shape index: {}]   ;;  %s810_s4 = inlined_call_operand.vmem [shape: bf16[32,96], index: 4, kind: input, shape index: {}]   ;;  %s811_s0 = inlined_call_operand.vmem [shape: f32[64,32], index: 0, kind: input, shape index: {}]   ;;  %s812_s6 = inlined_call_operand.vmem [shape: f32[1,96], index: 6, kind: input, shape index: {}]   ;;  %s813_s7 = inlined_call_operand.vmem [shape: f32[1,96], index: 7, kind: input, shape index: {}]   ;;  %s814_s8 = inlined_call_operand.vmem [shape: f32[64,96], index: 8, kind: output, shape index: {0}]   ;;  %s815_s9 = inlined_call_operand.vmem [shape: f32[64,96], index: 9, kind: output, shape index: {1}]  }
   0x1   :  { %v590_v0 = vld [vmem:[%s806_s3] sm:$0xff]   ;;  %v592_v2 = vld [vmem:[%s806_s3 + $0x8] sm:$0xff]   ;;  %v50_v6 = vld [vmem:[%s808_s1 + $0x10] sm:$0xff] }
   0x2   :  { %v591_v1 = vld [vmem:[%s807_s5] sm:$0xff]   ;;  %526 = vmatprep.subr.bf16.mxu0 %v590_v0  ;;  %v593_v3 = vld [vmem:[%s807_s5 + $0x8] sm:$0xff]   ;;  %v51_v9 = vld [vmem:[%s808_s1 + $0x18] sm:$0xff]  ;;  %v58_v10 = vmax.f32 %v50_v6, 0.0 }
   0x3   :  { %550 = vmatprep.subr.bf16.mxu1 %v591_v1  ;;  %527 = vmatpush3.bf16.msra.mxu0 %v590_v0  ;;  %v48_v4 = vld [vmem:[%s808_s1] sm:$0xff]  ;;  %v49_v5 = vld [vmem:[%s808_s1 + $0x8] sm:$0xff]  ;;  %v59_v11 = vmax.f32 %v51_v9, 0.0  ;;  %v54_v19 = vld [vmem:[%s808_s1 + $0x30] sm:$0xff] }
   0x4   :  { %551 = vmatpush3.bf16.msra.mxu1 %v591_v1  ;;  %528 = vmatprep.subr.bf16.mxu0 %v592_v2  ;;  %v56_v7 = vmax.f32 %v48_v4, 0.0  ;;  %v57_v8 = vmax.f32 %v49_v5, 0.0  ;;  %v594_v12 = vld [vmem:[%s809_s2] sm:$0xff]   ;;  %v53_v17 = vld [vmem:[%s808_s1 + $0x28] sm:$0xff]  ;;  %v55_v20 = vld [vmem:[%s808_s1 + $0x38] sm:$0xff]  ;;  %v62_v22 = vmax.f32 %v54_v19, 0.0 }
   0x5   :  { %552 = vmatprep.subr.bf16.mxu1 %v593_v3  ;;  %v595_v14 = vld [vmem:[%s810_s4] sm:$0xff]   ;;  %v77_v16 = vpack.c.bf16 %v59_v11, %v58_v10  ;;  %v61_v21 = vmax.f32 %v53_v17, 0.0  ;;  %v63_v23 = vmax.f32 %v55_v20, 0.0  ;;  %v596_v24 = vld [vmem:[%s809_s2 + $0x8] sm:$0xff]   ;;  %v34_v33 = vld [vmem:[%s811_s0 + $0x10] sm:$0xff] }
   0x6   :  { %v76_v13 = vpack.c.bf16 %v57_v8, %v56_v7  ;;  %v52_v15 = vld [vmem:[%s808_s1 + $0x20] sm:$0xff]  ;;  %v597_v26 = vld [vmem:[%s810_s4 + $0x8] sm:$0xff]   ;;  %v35_v34 = vld [vmem:[%s811_s0 + $0x18] sm:$0xff]  ;;  %v42_v37 = vmax.f32 %v34_v33, 0.0 }
   0x7   :  { %529 = vmatpush3.bf16.msra.mxu0 %v592_v2  ;;  %v60_v18 = vmax.f32 %v52_v15, 0.0  ;;  %v32_v27 = vld [vmem:[%s811_s0] sm:$0xff]  ;;  %v33_v28 = vld [vmem:[%s811_s0 + $0x8] sm:$0xff]  ;;  %v79_v31 = vpack.c.bf16 %v63_v23, %v62_v22  ;;  %v43_v38 = vmax.f32 %v35_v34, 0.0  ;;  %v38_v43 = vld [vmem:[%s811_s0 + $0x30] sm:$0xff] }
   0x8   :  { %553 = vmatpush3.bf16.msra.mxu1 %v593_v3  ;;  %538 = vmatprep.subr.bf16.mxu0 %v594_v12  ;;  %v40_v29 = vmax.f32 %v32_v27, 0.0  ;;  %v41_v30 = vmax.f32 %v33_v28, 0.0  ;;  %v36_v35 = vld [vmem:[%s811_s0 + $0x20] sm:$0xff]  ;;  %v37_v36 = vld [vmem:[%s811_s0 + $0x28] sm:$0xff]  ;;  %v39_v44 = vld [vmem:[%s811_s0 + $0x38] sm:$0xff]  ;;  %v46_v45 = vmax.f32 %v38_v43, 0.0 }
   0x9   :  { %530 = vmatprep.mubr.msk.bf16.mxu0 %vm92_vm0, %v76_v13  ;;  %554 = vmatprep.mubr.msk.bf16.mxu1 %vm92_vm0, %v76_v13  ;;  %v78_v25 = vpack.c.bf16 %v61_v21, %v60_v18  ;;  %v44_v39 = vmax.f32 %v36_v35, 0.0  ;;  %v45_v40 = vmax.f32 %v37_v36, 0.0  ;;  %v69_v41 = vpack.c.bf16 %v43_v38, %v42_v37  ;;  %v488_v48 = vld [vmem:[%s812_s6] ss:$0 sm:$0xff] }
   0xa   :  { %531 = vmatmul.mubr.msk.bf16.vlgmr.msra.gmra.mrb[0].mxu0 %vm92_vm0, %v77_v16  ;;  %562 = vmatprep.subr.bf16.mxu1 %v595_v14  ;;  %v68_v32 = vpack.c.bf16 %v41_v30, %v40_v29  ;;  %v47_v46 = vmax.f32 %v39_v44, 0.0  ;;  %v501_v49 = vld [vmem:[%s813_s7] ss:$0 sm:$0xff] }
   0xb   :  { %555 = vmatmul.mubr.msk.bf16.vlgmr.msra.gmra.mrb[0].mxu1 %vm92_vm0, %v77_v16  ;;  %539 = vmatpush3.bf16.msra.mxu0 %v594_v12  ;;  %v70_v42 = vpack.c.bf16 %v45_v40, %v44_v39 }
   0xc   :  { %563 = vmatpush3.bf16.msra.mxu1 %v595_v14  ;;  %540 = vmatprep.subr.bf16.mxu0 %v596_v24  ;;  %v71_v47 = vpack.c.bf16 %v47_v46, %v46_v45 }
   0xd   :  { %534 = vmatprep.mubr.msk.bf16.mxu0 %vm92_vm0, %v78_v25  ;;  %558 = vmatprep.mubr.msk.bf16.mxu1 %vm92_vm0, %v78_v25 }
   0xe   :  { %564 = vmatprep.subr.bf16.mxu1 %v597_v26 }
   0xf   :  { %541 = vmatpush3.bf16.msra.mxu0 %v596_v24 }
  0x10   :  { %565 = vmatpush3.bf16.msra.mxu1 %v597_v26 }
  0x12   :  { %535 = vmatmul.mubr.msk.bf16.gmra.mrb[4].mxu0 %vm92_vm0, %v79_v31 }
  0x13   :  { %559 = vmatmul.mubr.msk.bf16.gmra.mrb[4].mxu1 %vm92_vm0, %v79_v31  ;;  %542 = vmatprep.mubr.msk.bf16.mxu0 %vm92_vm0, %v68_v32 }
  0x14   :  { %566 = vmatprep.mubr.msk.bf16.mxu1 %vm92_vm0, %v68_v32 }
  0x1a   :  { %543 = vmatmul.mubr.msk.bf16.vlgmr.msra.gmra.mrb[0].mxu0 %vm92_vm0, %v69_v41 }
  0x1b   :  { %567 = vmatmul.mubr.msk.bf16.vlgmr.msra.gmra.mrb[0].mxu1 %vm92_vm0, %v69_v41  ;;  %546 = vmatprep.mubr.msk.bf16.mxu0 %vm92_vm0, %v70_v42 }
  0x1c   :  { %570 = vmatprep.mubr.msk.bf16.mxu1 %vm92_vm0, %v70_v42 }
  0x22   :  { %547 = vmatmul.mubr.msk.bf16.gmra.mrb[4].mxu0 %vm92_vm0, %v71_v47 }
  0x23   :  { %571 = vmatmul.mubr.msk.bf16.gmra.mrb[4].mxu1 %vm92_vm0, %v71_v47 }
  0xed   :  { %v544_v50 = vpop.f32.mrb[0].mxu0 }
  0xee   :  { %v268_v51 = vadd.f32 %v544_v50, %v488_v48  ;;  %v568_v52 = vpop.f32.mrb[0].mxu1  ;;  %v228_v53 = vpop.f32.mrb[1].mxu0 }
  0xef   :  { %v454_v54 = vadd.f32 %v568_v52, %v501_v49  ;;  %v266_v55 = vadd.f32 %v488_v48, %v228_v53  ;;  %v414_v56 = vpop.f32.mrb[1].mxu1  ;;  %v545_v57 = vpop.f32.mrb[2].mxu0 }
  0xf0   :  { %277 = vst.msk [vmem:[%s814_s8 + $0x10] sm:$0xff] %vm274_vm1, %v268_v51  ;;  %v452_v58 = vadd.f32 %v501_v49, %v414_v56  ;;  %v269_v59 = vadd.f32 %v545_v57, %v488_v48  ;;  %v569_v60 = vpop.f32.mrb[2].mxu1  ;;  %v231_v61 = vpop.f32.mrb[3].mxu0 }
  0xf1   :  { %462 = vst.msk [vmem:[%s815_s9 + $0x10] sm:$0xff] %vm274_vm1, %v454_v54  ;;  %275 = vst.msk [vmem:[%s814_s8] sm:$0xff] %vm274_vm1, %v266_v55  ;;  %v455_v62 = vadd.f32 %v569_v60, %v501_v49  ;;  %v267_v63 = vadd.f32 %v488_v48, %v231_v61  ;;  %v417_v0 = vpop.f32.mrb[3].mxu1 }
  0xf2   :  { %460 = vst.msk [vmem:[%s815_s9] sm:$0xff] %vm274_vm1, %v452_v58  ;;  %278 = vst.msk [vmem:[%s814_s8 + $0x18] sm:$0xff] %vm274_vm1, %v269_v59  ;;  %v453_v1 = vadd.f32 %v501_v49, %v417_v0 }
  0xf3   :  { %463 = vst.msk [vmem:[%s815_s9 + $0x18] sm:$0xff] %vm274_vm1, %v455_v62  ;;  %276 = vst.msk [vmem:[%s814_s8 + $0x8] sm:$0xff] %vm274_vm1, %v267_v63 }
  0xf4   :  { %461 = vst.msk [vmem:[%s815_s9 + $0x8] sm:$0xff] %vm274_vm1, %v453_v1 }
  0xf5   :  { %v548_v2 = vpop.f32.mrb[4].mxu0 }
  0xf6   :  { %v272_v3 = vadd.f32 %v548_v2, %v488_v48  ;;  %v572_v4 = vpop.f32.mrb[4].mxu1  ;;  %v244_v5 = vpop.f32.mrb[5].mxu0 }
  0xf7   :  { %v458_v6 = vadd.f32 %v572_v4, %v501_v49  ;;  %v270_v7 = vadd.f32 %v488_v48, %v244_v5  ;;  %v430_v8 = vpop.f32.mrb[5].mxu1  ;;  %v549_v9 = vpop.f32.mrb[6].mxu0 }
  0xf8   :  { %281 = vst.msk [vmem:[%s814_s8 + $0x30] sm:$0xff] %vm274_vm1, %v272_v3  ;;  %v456_v10 = vadd.f32 %v501_v49, %v430_v8  ;;  %v273_v11 = vadd.f32 %v549_v9, %v488_v48  ;;  %v573_v12 = vpop.f32.mrb[6].mxu1  ;;  %v247_v13 = vpop.f32.mrb[7].mxu0 }
  0xf9   :  { %466 = vst.msk [vmem:[%s815_s9 + $0x30] sm:$0xff] %vm274_vm1, %v458_v6  ;;  %279 = vst.msk [vmem:[%s814_s8 + $0x20] sm:$0xff] %vm274_vm1, %v270_v7  ;;  %v459_v14 = vadd.f32 %v573_v12, %v501_v49  ;;  %v271_v15 = vadd.f32 %v488_v48, %v247_v13  ;;  %v433_v16 = vpop.f32.mrb[7].mxu1 }
  0xfa   :  { %464 = vst.msk [vmem:[%s815_s9 + $0x20] sm:$0xff] %vm274_vm1, %v456_v10  ;;  %282 = vst.msk [vmem:[%s814_s8 + $0x38] sm:$0xff] %vm274_vm1, %v273_v11  ;;  %v457_v17 = vadd.f32 %v501_v49, %v433_v16 }
  0xfb   :  { %467 = vst.msk [vmem:[%s815_s9 + $0x38] sm:$0xff] %vm274_vm1, %v459_v14  ;;  %280 = vst.msk [vmem:[%s814_s8 + $0x28] sm:$0xff] %vm274_vm1, %v271_v15 }
  0xfc   :  { %465 = vst.msk [vmem:[%s815_s9 + $0x28] sm:$0xff] %vm274_vm1, %v457_v17 }

// kernel: _lambda_.21
= control target key start
LH: loop header
LB: loop body
LE: loop exit
PB: predicated region body
PF: predicated region fallthrough
CT: control target
= control target key end

     0   :  { %vm71_vm0 = vcmask 261120   ;;  %s617_s3 = inlined_call_operand.vmem [shape: bf16[32,32], index: 3, kind: input, shape index: {}]   ;;  %s618_s1 = inlined_call_operand.vmem [shape: f32[64,32], index: 1, kind: input, shape index: {}]   ;;  %s619_s2 = inlined_call_operand.vmem [shape: bf16[32,32], index: 2, kind: input, shape index: {}]   ;;  %s620_s0 = inlined_call_operand.vmem [shape: f32[64,32], index: 0, kind: input, shape index: {}]   ;;  %s621_s5 = inlined_call_operand.vmem [shape: bf16[32,128], index: 5, kind: input, shape index: {}]   ;;  %s622_s4 = inlined_call_operand.vmem [shape: f32[1,32], index: 4, kind: input, shape index: {}]   ;;  %s623_s6 = inlined_call_operand.vmem [shape: f32[1,128], index: 6, kind: input, shape index: {}]   ;;  %s624_s7 = inlined_call_operand.vmem [shape: f32[64,128], index: 7, kind: output, shape index: {}]  }
   0x1   :  { %v463_v0 = vld [vmem:[%s617_s3] sm:$0xff]   ;;  %v464_v1 = vld [vmem:[%s617_s3 + $0x8] sm:$0xff]   ;;  %v45_v4 = vld [vmem:[%s618_s1 + $0x10] sm:$0xff] }
   0x2   :  { %415 = vmatprep.subr.bf16.mxu0 %v463_v0  ;;  %v43_v2 = vld [vmem:[%s618_s1] sm:$0xff]  ;;  %v44_v3 = vld [vmem:[%s618_s1 + $0x8] sm:$0xff]  ;;  %451 = vmatprep.subr.bf16.mxu1 %v463_v0  ;;  %v46_v6 = vld [vmem:[%s618_s1 + $0x18] sm:$0xff] }
   0x3   :  { %416 = vmatpush3.bf16.msra.mxu0 %v463_v0  ;;  %v55_v5 = vpack.c.bf16 %v44_v3, %v43_v2  ;;  %453 = vmatpush3.bf16.msra.mxu1 %v463_v0  ;;  %v465_v7 = vld [vmem:[%s619_s2] sm:$0xff]   ;;  %v28_v9 = vld [vmem:[%s620_s0 + $0x8] sm:$0xff]  ;;  %v56_v10 = vpack.c.bf16 %v46_v6, %v45_v4  ;;  %v49_v14 = vld [vmem:[%s618_s1 + $0x30] sm:$0xff] }
   0x4   :  { %417 = vmatprep.subr.bf16.mxu0 %v464_v1  ;;  %452 = vmatprep.subr.bf16.mxu1 %v464_v1  ;;  %v27_v8 = vld [vmem:[%s620_s0] sm:$0xff]  ;;  %v48_v13 = vld [vmem:[%s618_s1 + $0x28] sm:$0xff]  ;;  %v50_v15 = vld [vmem:[%s618_s1 + $0x38] sm:$0xff] }
   0x5   :  { %419 = vmatprep.mubr.msk.bf16.mxu0 %vm71_vm0, %v55_v5  ;;  %v47_v11 = vld [vmem:[%s618_s1 + $0x20] sm:$0xff]  ;;  %v39_v12 = vpack.c.bf16 %v28_v9, %v27_v8  ;;  %v466_v16 = vld [vmem:[%s619_s2 + $0x8] sm:$0xff]   ;;  %v58_v18 = vpack.c.bf16 %v50_v15, %v49_v14  ;;  %v29_v19 = vld [vmem:[%s620_s0 + $0x10] sm:$0xff] }
   0x6   :  { %v57_v17 = vpack.c.bf16 %v48_v13, %v47_v11  ;;  %v30_v20 = vld [vmem:[%s620_s0 + $0x18] sm:$0xff]  ;;  %v31_v21 = vld [vmem:[%s620_s0 + $0x20] sm:$0xff]  ;;  %v32_v22 = vld [vmem:[%s620_s0 + $0x28] sm:$0xff] }
   0x7   :  { %418 = vmatpush3.bf16.msra.mxu0 %v464_v1  ;;  %454 = vmatpush3.bf16.msra.mxu1 %v464_v1  ;;  %v40_v23 = vpack.c.bf16 %v30_v20, %v29_v19  ;;  %v41_v24 = vpack.c.bf16 %v32_v22, %v31_v21  ;;  %v33_v25 = vld [vmem:[%s620_s0 + $0x30] sm:$0xff]  ;;  %v34_v26 = vld [vmem:[%s620_s0 + $0x38] sm:$0xff]  ;;  %v467_v28 = vld [vmem:[%s621_s5] sm:$0xff]  }
   0x8   :  { %427 = vmatprep.subr.bf16.mxu0 %v465_v7  ;;  %423 = vmatprep.mubr.msk.bf16.mxu1 %vm71_vm0, %v57_v17  ;;  %v42_v27 = vpack.c.bf16 %v34_v26, %v33_v25  ;;  %v468_v29 = vld [vmem:[%s621_s5 + $0x8] sm:$0xff]   ;;  %v389_v34 = vld [vmem:[%s622_s4] ss:$0 sm:$0xff] }
   0x9   :  { %439 = vmatprep.subr.bf16.mxu1 %v467_v28  ;;  %v390_v3 = vld [vmem:[%s623_s6] ss:$0 sm:$0xff] }
   0xa   :  { %420 = vmatmul.mubr.msk.bf16.vlgmr.msra.gmra.mrb[0].mxu0 %vm71_vm0, %v56_v10  ;;  %424 = vmatmul.mubr.msk.bf16.vlgmr.msra.gmra.mrb[0].mxu1 %vm71_vm0, %v58_v18 }
   0xb   :  { %428 = vmatpush3.bf16.msra.mxu0 %v465_v7  ;;  %431 = vmatprep.mubr.msk.bf16.mxu0 %vm71_vm0, %v39_v12 }
   0xc   :  { %429 = vmatprep.subr.bf16.mxu0 %v466_v16  ;;  %440 = vmatpush3.bf16.msra.mxu1 %v467_v28 }
   0xd   :  { %441 = vmatprep.subr.bf16.mxu1 %v468_v29 }
   0xf   :  { %430 = vmatpush3.bf16.msra.mxu0 %v466_v16 }
  0x10   :  { %442 = vmatpush3.bf16.msra.mxu1 %v468_v29 }
  0x16   :  { %432 = vmatmul.mubr.msk.bf16.vlgmr.msra.gmra.mrb[0].mxu0 %vm71_vm0, %v40_v23 }
  0x17   :  { %435 = vmatprep.mubr.msk.bf16.mxu0 %vm71_vm0, %v41_v24 }
  0x1e   :  { %436 = vmatmul.mubr.msk.bf16.gmra.mrb[4].mxu0 %vm71_vm0, %v42_v27 }
  0xdd   :  { %v425_v30 = vpop.f32.mrb[0].mxu1 }
  0xde   :  { %v134_v31 = vpop.f32.mrb[1].mxu1 }
  0xdf   :  { %v426_v32 = vpop.f32.mrb[2].mxu1 }
  0xe0   :  { %v137_v33 = vpop.f32.mrb[3].mxu1 }
  0xe9   :  { %v433_v35 = vpop.f32.mrb[0].mxu0 }
  0xea   :  { %v247_v36 = vadd.f32 %v433_v35, %v389_v34  ;;  %v207_v37 = vpop.f32.mrb[1].mxu0 }
  0xeb   :  { %v245_v38 = vadd.f32 %v389_v34, %v207_v37  ;;  %v434_v39 = vpop.f32.mrb[2].mxu0 }
  0xec   :  { %v248_v40 = vadd.f32 %v434_v39, %v389_v34  ;;  %v210_v41 = vpop.f32.mrb[3].mxu0  ;;  %v255_v43 = vmax.f32 %v247_v36, 0.0 }
  0xed   :  { %v246_v42 = vadd.f32 %v389_v34, %v210_v41  ;;  %v253_v45 = vmax.f32 %v245_v38, 0.0 }
  0xee   :  { %v256_v44 = vmax.f32 %v248_v40, 0.0 }
  0xef   :  { %v254_v46 = vmax.f32 %v246_v42, 0.0 }
  0xf0   :  { %v266_v47 = vpack.c.bf16 %v256_v44, %v255_v43 }
  0xf1   :  { %v265_v48 = vpack.c.bf16 %v254_v46, %v253_v45  ;;  %v437_v49 = vpop.f32.mrb[4].mxu0 }
  0xf2   :  { %v232_v50 = vadd.f32 %v437_v49, %v425_v30  ;;  %v223_v51 = vpop.f32.mrb[5].mxu0 }
  0xf3   :  { %v224_v52 = vadd.f32 %v223_v51, %v134_v31  ;;  %v438_v53 = vpop.f32.mrb[6].mxu0  ;;  %443 = vmatprep.mubr.msk.bf16.mxu1 %vm71_vm0, %v265_v48 }
  0xf4   :  { %v251_v54 = vadd.f32 %v389_v34, %v232_v50  ;;  %v235_v55 = vadd.f32 %v438_v53, %v426_v32  ;;  %v226_v56 = vpop.f32.mrb[7].mxu0  ;;  %444 = vmatmul.mubr.msk.bf16.vlgmr.msra.gmra.mrb[4].mxu1 %vm71_vm0, %v266_v47 }
  0xf5   :  { %v249_v57 = vadd.f32 %v389_v34, %v224_v52  ;;  %v227_v58 = vadd.f32 %v226_v56, %v137_v33 }
  0xf6   :  { %v252_v59 = vadd.f32 %v389_v34, %v235_v55  ;;  %v259_v61 = vmax.f32 %v251_v54, 0.0 }
  0xf7   :  { %v250_v60 = vadd.f32 %v389_v34, %v227_v58  ;;  %v257_v63 = vmax.f32 %v249_v57, 0.0 }
  0xf8   :  { %v260_v62 = vmax.f32 %v252_v59, 0.0 }
  0xf9   :  { %v258_v0 = vmax.f32 %v250_v60, 0.0 }
  0xfa   :  { %v268_v1 = vpack.c.bf16 %v260_v62, %v259_v61 }
  0xfb   :  { %v267_v2 = vpack.c.bf16 %v258_v0, %v257_v63 }
  0xfd   :  { %447 = vmatprep.mubr.msk.bf16.mxu1 %vm71_vm0, %v267_v2 }
  0xfe   :  { %448 = vmatmul.mubr.msk.bf16.gmra.mrb[8].mxu1 %vm71_vm0, %v268_v1 }
 0x1c7   :  { %v445_v4 = vpop.f32.mrb[4].mxu1 }
 0x1c8   :  { %v343_v5 = vadd.f32 %v445_v4, %v390_v3  ;;  %v334_v6 = vpop.f32.mrb[5].mxu1 }
 0x1c9   :  { %v335_v7 = vadd.f32 %v390_v3, %v334_v6  ;;  %v446_v8 = vpop.f32.mrb[6].mxu1 }
 0x1ca   :  { %367 = vst [vmem:[%s624_s7 + $0x10] sm:$0xff] %v343_v5  ;;  %v346_v9 = vadd.f32 %v446_v8, %v390_v3  ;;  %v337_v10 = vpop.f32.mrb[7].mxu1 }
 0x1cb   :  { %365 = vst [vmem:[%s624_s7] sm:$0xff] %v335_v7  ;;  %v338_v11 = vadd.f32 %v390_v3, %v337_v10 }
 0x1cc   :  { %368 = vst [vmem:[%s624_s7 + $0x18] sm:$0xff] %v346_v9 }
 0x1cd   :  { %366 = vst [vmem:[%s624_s7 + $0x8] sm:$0xff] %v338_v11 }
 0x1d1   :  { %v449_v12 = vpop.f32.mrb[8].mxu1 }
 0x1d2   :  { %v359_v13 = vadd.f32 %v449_v12, %v390_v3  ;;  %v350_v14 = vpop.f32.mrb[9].mxu1 }
 0x1d3   :  { %v351_v15 = vadd.f32 %v390_v3, %v350_v14  ;;  %v450_v16 = vpop.f32.mrb[10].mxu1 }
 0x1d4   :  { %371 = vst [vmem:[%s624_s7 + $0x30] sm:$0xff] %v359_v13  ;;  %v362_v17 = vadd.f32 %v450_v16, %v390_v3  ;;  %v353_v18 = vpop.f32.mrb[11].mxu1 }
 0x1d5   :  { %369 = vst [vmem:[%s624_s7 + $0x20] sm:$0xff] %v351_v15  ;;  %v354_v19 = vadd.f32 %v390_v3, %v353_v18 }
 0x1d6   :  { %372 = vst [vmem:[%s624_s7 + $0x38] sm:$0xff] %v362_v17 }
 0x1d7   :  { %370 = vst [vmem:[%s624_s7 + $0x28] sm:$0xff] %v354_v19 }

// kernel: _lambda_.16
= control target key start
LH: loop header
LB: loop body
LE: loop exit
PB: predicated region body
PF: predicated region fallthrough
CT: control target
= control target key end

     0   :  { %vm65_vm0 = vcmask 261120   ;;  %v2347_v0 = vmov 0.0|0.0   ;;  %v2348_v4 = vmov 0.0   ;;  %vm2349_vm1 = vmmov 0   ;;  %s2350_s19 = smov 64   ;;  %s2351_s22 = smov 32   ;;  %s2793_s2 = inlined_call_operand.vmem [shape: f32[32,96], index: 2, kind: input, shape index: {}]   ;;  %s2794_s3 = inlined_call_operand.vmem [shape: f32[32,96], index: 3, kind: input, shape index: {}]   ;;  %s2795_s4 = inlined_call_operand.vmem [shape: f32[1,96], index: 4, kind: input, shape index: {}]   ;;  %s2796_s5 = inlined_call_operand.vmem [shape: f32[1,96], index: 5, kind: input, shape index: {}]   ;;  %s2797_s0 = inlined_call_operand.vmem [shape: f32[8,8,96], index: 0, kind: input, shape index: {}]   ;;  %s2798_s1 = inlined_call_operand.vmem [shape: f32[8,8,96], index: 1, kind: input, shape index: {}]   ;;  %s2799_s6 = inlined_call_operand.vmem [shape: f32[8,8,32], index: 6, kind: output, shape index: {0}]   ;;  %s2800_s7 = inlined_call_operand.vmem [shape: f32[8,8,32], index: 7, kind: output, shape index: {1}]  }
   0x1   :  { %2149 = vmatprep.subr.bf16.mxu0 %v2347_v0  ;;  %v68_v1 = vld [vmem:[%s2793_s2] sm:$0xff]  ;;  %v69_v2 = vld [vmem:[%s2793_s2 + $0x8] sm:$0xff]  ;;  %2155 = vmatprep.subr.bf16.mxu1 %v2347_v0  ;;  %66 = vst.msk [vmem:[#allocation2] sm:$0xff] %vm65_vm0, %v2348_v4  ;;  %67 = vst.msk [vmem:[#allocation3] sm:$0xff] %vm65_vm0, %v2348_v4  ;;  %s2352_s23 = smov 96  }
   0x2   :  { %v72_v3 = vld [vmem:[%s2794_s3] sm:$0xff]  ;;  %v2408_v5 = vpack.c.bf16 %v69_v2, %v68_v1  ;;  %v73_v6 = vld [vmem:[%s2794_s3 + $0x8] sm:$0xff]  ;;  %v70_v7 = vld [vmem:[%s2793_s2 + $0x10] sm:$0xff]  ;;  %1981 = vmatprep.mubr.msk.f32.mxu0 %vm2349_vm1, %v2348_v4  ;;  %1992 = vmatprep.mubr.msk.f32.mxu1 %vm2349_vm1, %v2348_v4 }
   0x3   :  { %v71_v8 = vld [vmem:[%s2793_s2 + $0x18] sm:$0xff]  ;;  %v2423_v9 = vpack.c.bf16 %v73_v6, %v72_v3  ;;  %v74_v10 = vld [vmem:[%s2794_s3 + $0x10] sm:$0xff]  ;;  %v2460_v16 = vld [vmem:[%s2795_s4] ss:$0 sm:$0xff] }
   0x4   :  { %v75_v11 = vld [vmem:[%s2794_s3 + $0x18] sm:$0xff]  ;;  %2151 = vmatpush3.bf16.msra.mxu0 %v2408_v5  ;;  %v2432_v12 = vpack.c.bf16 %v71_v8, %v70_v7  ;;  %v2465_v18 = vld [vmem:[%s2796_s5] ss:$0 sm:$0xff]  ;;  %v1839_v3 = vld [vmem:[%s2797_s0 + $0x8] sm:$0xff] }
   0x5   :  { %2152 = vmatprep.subr.bf16.mxu0 %v2347_v0  ;;  %2157 = vmatpush3.bf16.msra.mxu1 %v2423_v9  ;;  %v2436_v13 = vpack.c.bf16 %v75_v11, %v74_v10  ;;  %v80_v24 = vld [vmem:[%s2797_s0] sm:$0xff]  ;;  %v1834_v26 = vld [vmem:[%s2798_s1 + $0x38] sm:$0xff]  ;;  %v1843_v7 = vld [vmem:[%s2798_s1 + $0x30] sm:$0xff] }
   0x6   :  { %2158 = vmatprep.subr.bf16.mxu1 %v2347_v0 }
   0x8   :  { %2154 = vmatpush3.bf16.msra.mxu0 %v2432_v12  ;;  %v78_v14 = vld [vmem:[#allocation2] sm:$0xff]  ;;  %v79_v15 = vld [vmem:[#allocation3] sm:$0xff] }
   0x9   :  { %2160 = vmatpush3.bf16.msra.mxu1 %v2436_v13  ;;  %2161 = vmatprep.subr.bf16.mxu0 %v2347_v0 }
   0xa   :  { %2167 = vmatprep.subr.bf16.mxu1 %v2347_v0 }
   0xb   :  { %1982 = vmatmul.mubr.msk.f32.vlgmr.msra.gmra.mrb[0].mxu0 %vm65_vm0, %v78_v14 }
   0xc   :  { %1993 = vmatmul.mubr.msk.f32.vlgmr.msra.gmra.mrb[0].mxu1 %vm65_vm0, %v79_v15  ;;  %2163 = vmatpush3.bf16.msra.mxu0 %v2408_v5 }
   0xd   :  { %2164 = vmatprep.subr.bf16.mxu0 %v2347_v0  ;;  %2169 = vmatpush3.bf16.msra.mxu1 %v2423_v9 }
   0xe   :  { %2003 = vmatprep.mubr.msk.f32.mxu0 %vm2349_vm1, %v2348_v4  ;;  %2170 = vmatprep.subr.bf16.mxu1 %v2347_v0 }
   0xf   :  { %2014 = vmatprep.mubr.msk.f32.mxu1 %vm2349_vm1, %v2348_v4 }
  0x10   :  { %2166 = vmatpush3.bf16.msra.mxu0 %v2432_v12 }
  0x11   :  { %2172 = vmatpush3.bf16.msra.mxu1 %v2436_v13  ;;  %2173 = vmatprep.subr.bf16.mxu0 %v2347_v0 }
  0x12   :  { %2179 = vmatprep.subr.bf16.mxu1 %v2347_v0 }
  0xde   :  { %v157_v17 = vpop.f32.mrb[0].mxu0 }
  0xdf   :  { %v158_v19 = vadd.f32 %v2460_v16, %v157_v17  ;;  %v1983_v20 = vpop.f32.mrb[1].mxu0  ;;  %v272_v21 = vpop.f32.mrb[0].mxu1 }
  0xe0   :  { %v1994_v22 = vpop.f32.mrb[1].mxu1  ;;  %v273_v23 = vadd.f32 %v2465_v18, %v272_v21 }
  0xe1   :  { %169 = vrot.lane.b32.xlu0 %v158_v19, %s2350_s19  ;;  %v161_v25 = vadd.f32 %v158_v19, %v80_v24 }
  0xe2   :  { %v276_v28 = vadd.f32 %v1834_v26, %v273_v23 }
  0xe3   :  { %v1833_v27 = vmul.f32 -1.442695, %v161_v25 }
  0xe4   :  { %v1837_v29 = vmul.f32 -1.442695, %v276_v28 }
  0xe5   :  { %284 = vrot.lane.b32.xlu0 %v273_v23, %s2350_s19  ;;  %2251 = vpow2.f32 %v1833_v27 }
  0xe6   :  { %2253 = vpow2.f32 %v1837_v29 }
  0xef   :  { %v2252_v30 = vpop.eup %2251 }
  0xf0   :  { %v165_v31 = vadd.f32 1.0, %v2252_v30  ;;  %v2254_v32 = vpop.eup %2253 }
  0xf1   :  { %v280_v33 = vadd.f32 1.0, %v2254_v32 }
  0xf2   :  { %2255 = vrcp.f32 %v165_v31 }
  0xf3   :  { %2257 = vrcp.f32 %v280_v33 }
  0xfc   :  { %v2256_v34 = vpop.eup %2255 }
  0xfd   :  { %v2258_v37 = vpop.eup %2257  ;;  %v179_v47 = vsub.f32 1.0, %v2256_v34 }
  0xfe   :  { %v294_v53 = vsub.f32 1.0, %v2258_v37 }
 0x153   :  { %v170_v35 = vpop.permute.xlu0 %169 }
 0x154   :  { %v172_v36 = vmul.f32 %v2256_v34, %v170_v35 }
 0x156   :  { %174 = vrot.lane.b32.xlu1 %v172_v36, %s2350_s19 }
 0x157   :  { %v285_v38 = vpop.permute.xlu0 %284 }
 0x158   :  { %v287_v39 = vmul.f32 %v2258_v37, %v285_v38 }
 0x15a   :  { %289 = vrot.lane.b32.xlu1 %v287_v39, %s2350_s19 }
 0x15e   :  { %185 = vrot.lane.b32.xlu1 %v78_v14, %s2351_s22 }
 0x162   :  { %300 = vrot.lane.b32.xlu1 %v79_v15, %s2351_s22 }
 0x1c8   :  { %v175_v40 = vpop.permute.xlu1 %174 }
 0x1c9   :  { %v177_v41 = vadd.f32 %v175_v40, %v80_v24 }
 0x1cb   :  { %2259 = vtanh.f32 %v177_v41 }
 0x1cc   :  { %v290_v42 = vpop.permute.xlu1 %289 }
 0x1cd   :  { %v292_v43 = vadd.f32 %v1834_v26, %v290_v42 }
 0x1cf   :  { %2261 = vtanh.f32 %v292_v43 }
 0x1d0   :  { %v186_v46 = vpop.permute.xlu1 %185 }
 0x1d1   :  { %v188_v49 = vmul.f32 %v2256_v34, %v186_v46 }
 0x1d4   :  { %v301_v51 = vpop.permute.xlu1 %300 }
 0x1d5   :  { %v2260_v44 = vpop.eup %2259  ;;  %v303_v55 = vmul.f32 %v2258_v37, %v301_v51 }
 0x1d6   :  { %181 = vrot.lane.b32.xlu0 %v2260_v44, %s2352_s23 }
 0x1d9   :  { %v2262_v45 = vpop.eup %2261 }
 0x1da   :  { %296 = vrot.lane.b32.xlu0 %v2262_v45, %s2352_s23 }
 0x248   :  { %v182_v48 = vpop.permute.xlu0 %181 }
 0x249   :  { %v184_v50 = vmul.f32 %v182_v48, %v179_v47 }
 0x24b   :  { %v2481_v52 = vadd.f32 %v188_v49, %v184_v50  ;;  %v1847_v50 = vld [vmem:[%s2797_s0 + $0x10] sm:$0xff] }
 0x24c   :  { %v297_v54 = vpop.permute.xlu0 %296 }
 0x24d   :  { %v299_v56 = vmul.f32 %v297_v54, %v294_v53  ;;  %191 = vrot.lane.b32.xlu0 %v2481_v52, %s2352_s23 }
 0x24f   :  { %v2485_v57 = vadd.f32 %v303_v55, %v299_v56 }
 0x251   :  { %306 = vrot.lane.b32.xlu1 %v2485_v57, %s2352_s23 }
 0x2bf   :  { %v192_v58 = vpop.permute.xlu0 %191 }
 0x2c0   :  { %194 = vst.msk [vmem:[%s2799_s6] sm:$0xff] %vm65_vm0, %v192_v58  ;;  %2004 = vmatmul.mubr.msk.f32.vlgmr.msra.gmra.mrb[2].mxu0 %vm65_vm0, %v192_v58 }
 0x2c1   :  { %2175 = vmatpush3.bf16.msra.mxu0 %v2408_v5  ;;  %2025 = vmatprep.mubr.msk.f32.mxu0 %vm2349_vm1, %v2348_v4 }
 0x2c2   :  { %2176 = vmatprep.subr.bf16.mxu0 %v2347_v0 }
 0x2c3   :  { %v307_v59 = vpop.permute.xlu1 %306 }
 0x2c4   :  { %1838 = vst.msk [vmem:[%s2800_s7 + $0x38] sm:$0xff] %vm65_vm0, %v307_v59  ;;  %2015 = vmatmul.mubr.msk.f32.vlgmr.msra.gmra.mrb[2].mxu1 %vm65_vm0, %v307_v59 }
 0x2c5   :  { %2178 = vmatpush3.bf16.msra.mxu0 %v2432_v12  ;;  %2181 = vmatpush3.bf16.msra.mxu1 %v2423_v9 }
 0x2c6   :  { %2182 = vmatprep.subr.bf16.mxu1 %v2347_v0  ;;  %2036 = vmatprep.mubr.msk.f32.mxu1 %vm2349_vm1, %v2348_v4 }
 0x2c7   :  { %2185 = vmatprep.subr.bf16.mxu0 %v2347_v0 }
 0x2c9   :  { %2184 = vmatpush3.bf16.msra.mxu1 %v2436_v13 }
 0x2ca   :  { %2191 = vmatprep.subr.bf16.mxu1 %v2347_v0 }
 0x393   :  { %v381_v60 = vpop.f32.mrb[2].mxu0 }
 0x394   :  { %v382_v61 = vadd.f32 %v2460_v16, %v381_v60  ;;  %v2005_v62 = vpop.f32.mrb[3].mxu0 }
 0x396   :  { %393 = vrot.lane.b32.xlu0 %v382_v61, %s2350_s19  ;;  %v385_v6 = vadd.f32 %v1839_v3, %v382_v61 }
 0x397   :  { %v487_v63 = vpop.f32.mrb[2].mxu1 }
 0x398   :  { %v488_v1 = vadd.f32 %v2465_v18, %v487_v63  ;;  %v2016_v2 = vpop.f32.mrb[3].mxu1  ;;  %v1841_v8 = vmul.f32 -1.442695, %v385_v6 }
 0x39a   :  { %499 = vrot.lane.b32.xlu1 %v488_v1, %s2350_s19  ;;  %v491_v10 = vadd.f32 %v1843_v7, %v488_v1  ;;  %2263 = vpow2.f32 %v1841_v8 }
 0x39c   :  { %v1845_v11 = vmul.f32 -1.442695, %v491_v10 }
 0x39e   :  { %2265 = vpow2.f32 %v1845_v11 }
 0x3a4   :  { %v2264_v14 = vpop.eup %2263 }
 0x3a5   :  { %v389_v15 = vadd.f32 1.0, %v2264_v14 }
 0x3a7   :  { %2267 = vrcp.f32 %v389_v15 }
 0x3a8   :  { %v2266_v17 = vpop.eup %2265 }
 0x3a9   :  { %v495_v19 = vadd.f32 1.0, %v2266_v17 }
 0x3ab   :  { %2269 = vrcp.f32 %v495_v19 }
 0x3b1   :  { %v2268_v20 = vpop.eup %2267 }
 0x3b2   :  { %v403_v32 = vsub.f32 1.0, %v2268_v20  ;;  %v409_v34 = vmul.f32 %v2268_v20, %v2481_v52  ;;  %v1851_v52 = vld [vmem:[%s2798_s1 + $0x28] sm:$0xff] }
 0x3b5   :  { %v2270_v23 = vpop.eup %2269 }
 0x3b6   :  { %v509_v37 = vsub.f32 1.0, %v2270_v23  ;;  %v515_v39 = vmul.f32 %v2270_v23, %v2485_v57 }
 0x408   :  { %v394_v21 = vpop.permute.xlu0 %393 }
 0x409   :  { %v396_v22 = vmul.f32 %v2268_v20, %v394_v21 }
 0x40b   :  { %398 = vrot.lane.b32.xlu0 %v396_v22, %s2350_s19 }
 0x40c   :  { %v500_v24 = vpop.permute.xlu1 %499 }
 0x40d   :  { %v502_v25 = vmul.f32 %v2270_v23, %v500_v24 }
 0x40f   :  { %504 = vrot.lane.b32.xlu1 %v502_v25, %s2350_s19 }
 0x47d   :  { %v399_v26 = vpop.permute.xlu0 %398 }
 0x47e   :  { %v401_v27 = vadd.f32 %v1839_v3, %v399_v26 }
 0x480   :  { %2271 = vtanh.f32 %v401_v27 }
 0x481   :  { %v505_v28 = vpop.permute.xlu1 %504 }
 0x482   :  { %v507_v29 = vadd.f32 %v1843_v7, %v505_v28 }
 0x484   :  { %2273 = vtanh.f32 %v507_v29 }
 0x48a   :  { %v2272_v30 = vpop.eup %2271 }
 0x48b   :  { %405 = vrot.lane.b32.xlu0 %v2272_v30, %s2352_s23 }
 0x48e   :  { %v2274_v31 = vpop.eup %2273 }
 0x48f   :  { %511 = vrot.lane.b32.xlu1 %v2274_v31, %s2352_s23 }
 0x4fd   :  { %v406_v33 = vpop.permute.xlu0 %405 }
 0x4fe   :  { %v408_v35 = vmul.f32 %v406_v33, %v403_v32 }
 0x500   :  { %v2526_v36 = vadd.f32 %v409_v34, %v408_v35  ;;  %v1855_v34 = vld [vmem:[%s2797_s0 + $0x18] sm:$0xff] }
 0x501   :  { %v512_v38 = vpop.permute.xlu1 %511 }
 0x502   :  { %v514_v40 = vmul.f32 %v512_v38, %v509_v37  ;;  %412 = vrot.lane.b32.xlu0 %v2526_v36, %s2352_s23 }
 0x504   :  { %v2531_v41 = vadd.f32 %v515_v39, %v514_v40 }
 0x506   :  { %518 = vrot.lane.b32.xlu1 %v2531_v41, %s2352_s23 }
 0x574   :  { %v413_v42 = vpop.permute.xlu0 %412 }
 0x575   :  { %1842 = vst.msk [vmem:[%s2799_s6 + $0x8] sm:$0xff] %vm65_vm0, %v413_v42  ;;  %2026 = vmatmul.mubr.msk.f32.vlgmr.msra.gmra.mrb[4].mxu0 %vm65_vm0, %v413_v42 }
 0x576   :  { %2187 = vmatpush3.bf16.msra.mxu0 %v2408_v5  ;;  %2047 = vmatprep.mubr.msk.f32.mxu0 %vm2349_vm1, %v2348_v4 }
 0x577   :  { %2188 = vmatprep.subr.bf16.mxu0 %v2347_v0 }
 0x578   :  { %v519_v43 = vpop.permute.xlu1 %518 }
 0x579   :  { %1846 = vst.msk [vmem:[%s2800_s7 + $0x30] sm:$0xff] %vm65_vm0, %v519_v43  ;;  %2037 = vmatmul.mubr.msk.f32.vlgmr.msra.gmra.mrb[4].mxu1 %vm65_vm0, %v519_v43 }
 0x57a   :  { %2190 = vmatpush3.bf16.msra.mxu0 %v2432_v12  ;;  %2193 = vmatpush3.bf16.msra.mxu1 %v2423_v9 }
 0x57b   :  { %2194 = vmatprep.subr.bf16.mxu1 %v2347_v0  ;;  %2058 = vmatprep.mubr.msk.f32.mxu1 %vm2349_vm1, %v2348_v4 }
 0x57c   :  { %2197 = vmatprep.subr.bf16.mxu0 %v2347_v0 }
 0x57e   :  { %2196 = vmatpush3.bf16.msra.mxu1 %v2436_v13 }
 0x57f   :  { %2203 = vmatprep.subr.bf16.mxu1 %v2347_v0 }
 0x648   :  { %v593_v44 = vpop.f32.mrb[4].mxu0 }
 0x649   :  { %v594_v45 = vadd.f32 %v2460_v16, %v593_v44  ;;  %v2027_v46 = vpop.f32.mrb[5].mxu0 }
 0x64b   :  { %605 = vrot.lane.b32.xlu0 %v594_v45, %s2350_s19  ;;  %v597_v51 = vadd.f32 %v1847_v50, %v594_v45 }
 0x64c   :  { %v699_v47 = vpop.f32.mrb[4].mxu1 }
 0x64d   :  { %v700_v48 = vadd.f32 %v2465_v18, %v699_v47  ;;  %v2038_v49 = vpop.f32.mrb[5].mxu1  ;;  %v1849_v53 = vmul.f32 -1.442695, %v597_v51 }
 0x64f   :  { %711 = vrot.lane.b32.xlu1 %v700_v48, %s2350_s19  ;;  %v703_v54 = vadd.f32 %v1851_v52, %v700_v48  ;;  %2275 = vpow2.f32 %v1849_v53 }
 0x651   :  { %v1853_v55 = vmul.f32 -1.442695, %v703_v54 }
 0x653   :  { %2277 = vpow2.f32 %v1853_v55 }
 0x659   :  { %v2276_v56 = vpop.eup %2275 }
 0x65a   :  { %v601_v57 = vadd.f32 1.0, %v2276_v56 }
 0x65c   :  { %2279 = vrcp.f32 %v601_v57 }
 0x65d   :  { %v2278_v58 = vpop.eup %2277 }
 0x65e   :  { %v707_v59 = vadd.f32 1.0, %v2278_v58 }
 0x660   :  { %2281 = vrcp.f32 %v707_v59 }
 0x666   :  { %v2280_v60 = vpop.eup %2279 }
 0x667   :  { %v615_v14 = vsub.f32 1.0, %v2280_v60  ;;  %v621_v17 = vmul.f32 %v2280_v60, %v2526_v36  ;;  %v1859_v36 = vld [vmem:[%s2798_s1 + $0x20] sm:$0xff] }
 0x66a   :  { %v2282_v63 = vpop.eup %2281 }
 0x66b   :  { %v721_v21 = vsub.f32 1.0, %v2282_v63  ;;  %v727_v23 = vmul.f32 %v2282_v63, %v2531_v41 }
 0x6bd   :  { %v606_v61 = vpop.permute.xlu0 %605 }
 0x6be   :  { %v608_v62 = vmul.f32 %v2280_v60, %v606_v61 }
 0x6c0   :  { %610 = vrot.lane.b32.xlu0 %v608_v62, %s2350_s19 }
 0x6c1   :  { %v712_v1 = vpop.permute.xlu1 %711 }
 0x6c2   :  { %v714_v2 = vmul.f32 %v2282_v63, %v712_v1 }
 0x6c4   :  { %716 = vrot.lane.b32.xlu1 %v714_v2, %s2350_s19 }
 0x732   :  { %v611_v3 = vpop.permute.xlu0 %610 }
 0x733   :  { %v613_v6 = vadd.f32 %v1847_v50, %v611_v3 }
 0x735   :  { %2283 = vtanh.f32 %v613_v6 }
 0x736   :  { %v717_v7 = vpop.permute.xlu1 %716 }
 0x737   :  { %v719_v8 = vadd.f32 %v1851_v52, %v717_v7 }
 0x739   :  { %2285 = vtanh.f32 %v719_v8 }
 0x73f   :  { %v2284_v10 = vpop.eup %2283 }
 0x740   :  { %617 = vrot.lane.b32.xlu0 %v2284_v10, %s2352_s23 }
 0x743   :  { %v2286_v11 = vpop.eup %2285 }
 0x744   :  { %723 = vrot.lane.b32.xlu1 %v2286_v11, %s2352_s23 }
 0x7b2   :  { %v618_v15 = vpop.permute.xlu0 %617 }
 0x7b3   :  { %v620_v19 = vmul.f32 %v618_v15, %v615_v14 }
 0x7b5   :  { %v2572_v20 = vadd.f32 %v621_v17, %v620_v19  ;;  %v1863_v17 = vld [vmem:[%s2797_s0 + $0x20] sm:$0xff] }
 0x7b6   :  { %v724_v22 = vpop.permute.xlu1 %723 }
 0x7b7   :  { %v726_v24 = vmul.f32 %v724_v22, %v721_v21  ;;  %624 = vrot.lane.b32.xlu0 %v2572_v20, %s2352_s23 }
 0x7b9   :  { %v2577_v25 = vadd.f32 %v727_v23, %v726_v24 }
 0x7bb   :  { %730 = vrot.lane.b32.xlu1 %v2577_v25, %s2352_s23 }
 0x829   :  { %v625_v26 = vpop.permute.xlu0 %624 }
 0x82a   :  { %1850 = vst.msk [vmem:[%s2799_s6 + $0x10] sm:$0xff] %vm65_vm0, %v625_v26  ;;  %2048 = vmatmul.mubr.msk.f32.vlgmr.msra.gmra.mrb[6].mxu0 %vm65_vm0, %v625_v26 }
 0x82b   :  { %2199 = vmatpush3.bf16.msra.mxu0 %v2408_v5  ;;  %2069 = vmatprep.mubr.msk.f32.mxu0 %vm2349_vm1, %v2348_v4 }
 0x82c   :  { %2200 = vmatprep.subr.bf16.mxu0 %v2347_v0 }
 0x82d   :  { %v731_v27 = vpop.permute.xlu1 %730 }
 0x82e   :  { %1854 = vst.msk [vmem:[%s2800_s7 + $0x28] sm:$0xff] %vm65_vm0, %v731_v27  ;;  %2059 = vmatmul.mubr.msk.f32.vlgmr.msra.gmra.mrb[6].mxu1 %vm65_vm0, %v731_v27 }
 0x82f   :  { %2202 = vmatpush3.bf16.msra.mxu0 %v2432_v12  ;;  %2205 = vmatpush3.bf16.msra.mxu1 %v2423_v9 }
 0x830   :  { %2206 = vmatprep.subr.bf16.mxu1 %v2347_v0  ;;  %2080 = vmatprep.mubr.msk.f32.mxu1 %vm2349_vm1, %v2348_v4 }
 0x831   :  { %2209 = vmatprep.subr.bf16.mxu0 %v2347_v0 }
 0x833   :  { %2208 = vmatpush3.bf16.msra.mxu1 %v2436_v13 }
 0x834   :  { %2215 = vmatprep.subr.bf16.mxu1 %v2347_v0 }
 0x8fd   :  { %v805_v28 = vpop.f32.mrb[6].mxu0 }
 0x8fe   :  { %v806_v29 = vadd.f32 %v2460_v16, %v805_v28  ;;  %v2049_v30 = vpop.f32.mrb[7].mxu0 }
 0x900   :  { %817 = vrot.lane.b32.xlu0 %v806_v29, %s2350_s19  ;;  %v809_v35 = vadd.f32 %v1855_v34, %v806_v29 }
 0x901   :  { %v911_v31 = vpop.f32.mrb[6].mxu1 }
 0x902   :  { %v912_v32 = vadd.f32 %v2465_v18, %v911_v31  ;;  %v2060_v33 = vpop.f32.mrb[7].mxu1  ;;  %v1857_v37 = vmul.f32 -1.442695, %v809_v35 }
 0x904   :  { %923 = vrot.lane.b32.xlu1 %v912_v32, %s2350_s19  ;;  %v915_v38 = vadd.f32 %v1859_v36, %v912_v32  ;;  %2287 = vpow2.f32 %v1857_v37 }
 0x906   :  { %v1861_v39 = vmul.f32 -1.442695, %v915_v38 }
 0x908   :  { %2289 = vpow2.f32 %v1861_v39 }
 0x90e   :  { %v2288_v40 = vpop.eup %2287 }
 0x90f   :  { %v813_v41 = vadd.f32 1.0, %v2288_v40 }
 0x911   :  { %2291 = vrcp.f32 %v813_v41 }
 0x912   :  { %v2290_v42 = vpop.eup %2289 }
 0x913   :  { %v919_v43 = vadd.f32 1.0, %v2290_v42 }
 0x915   :  { %2293 = vrcp.f32 %v919_v43 }
 0x91b   :  { %v2292_v44 = vpop.eup %2291 }
 0x91c   :  { %v827_v56 = vsub.f32 1.0, %v2292_v44  ;;  %v833_v58 = vmul.f32 %v2292_v44, %v2572_v20  ;;  %v1867_v20 = vld [vmem:[%s2798_s1 + $0x18] sm:$0xff] }
 0x91f   :  { %v2294_v47 = vpop.eup %2293 }
 0x920   :  { %v933_v61 = vsub.f32 1.0, %v2294_v47  ;;  %v939_v63 = vmul.f32 %v2294_v47, %v2577_v25 }
 0x972   :  { %v818_v45 = vpop.permute.xlu0 %817 }
 0x973   :  { %v820_v46 = vmul.f32 %v2292_v44, %v818_v45 }
 0x975   :  { %822 = vrot.lane.b32.xlu0 %v820_v46, %s2350_s19 }
 0x976   :  { %v924_v48 = vpop.permute.xlu1 %923 }
 0x977   :  { %v926_v49 = vmul.f32 %v2294_v47, %v924_v48 }
 0x979   :  { %928 = vrot.lane.b32.xlu1 %v926_v49, %s2350_s19 }
 0x9e7   :  { %v823_v50 = vpop.permute.xlu0 %822 }
 0x9e8   :  { %v825_v51 = vadd.f32 %v1855_v34, %v823_v50 }
 0x9ea   :  { %2295 = vtanh.f32 %v825_v51 }
 0x9eb   :  { %v929_v52 = vpop.permute.xlu1 %928 }
 0x9ec   :  { %v931_v53 = vadd.f32 %v1859_v36, %v929_v52 }
 0x9ee   :  { %2297 = vtanh.f32 %v931_v53 }
 0x9f4   :  { %v2296_v54 = vpop.eup %2295 }
 0x9f5   :  { %829 = vrot.lane.b32.xlu0 %v2296_v54, %s2352_s23 }
 0x9f8   :  { %v2298_v55 = vpop.eup %2297 }
 0x9f9   :  { %935 = vrot.lane.b32.xlu1 %v2298_v55, %s2352_s23 }
 0xa67   :  { %v830_v57 = vpop.permute.xlu0 %829 }
 0xa68   :  { %v832_v59 = vmul.f32 %v830_v57, %v827_v56 }
 0xa6a   :  { %v2618_v60 = vadd.f32 %v833_v58, %v832_v59  ;;  %v1871_v58 = vld [vmem:[%s2797_s0 + $0x28] sm:$0xff] }
 0xa6b   :  { %v936_v62 = vpop.permute.xlu1 %935 }
 0xa6c   :  { %v938_v1 = vmul.f32 %v936_v62, %v933_v61  ;;  %836 = vrot.lane.b32.xlu0 %v2618_v60, %s2352_s23 }
 0xa6e   :  { %v2623_v2 = vadd.f32 %v939_v63, %v938_v1 }
 0xa70   :  { %942 = vrot.lane.b32.xlu1 %v2623_v2, %s2352_s23 }
 0xade   :  { %v837_v3 = vpop.permute.xlu0 %836 }
 0xadf   :  { %1858 = vst.msk [vmem:[%s2799_s6 + $0x18] sm:$0xff] %vm65_vm0, %v837_v3  ;;  %2070 = vmatmul.mubr.msk.f32.vlgmr.msra.gmra.mrb[8].mxu0 %vm65_vm0, %v837_v3 }
 0xae0   :  { %2211 = vmatpush3.bf16.msra.mxu0 %v2408_v5  ;;  %2091 = vmatprep.mubr.msk.f32.mxu0 %vm2349_vm1, %v2348_v4 }
 0xae1   :  { %2212 = vmatprep.subr.bf16.mxu0 %v2347_v0 }
 0xae2   :  { %v943_v6 = vpop.permute.xlu1 %942 }
 0xae3   :  { %1862 = vst.msk [vmem:[%s2800_s7 + $0x20] sm:$0xff] %vm65_vm0, %v943_v6  ;;  %2081 = vmatmul.mubr.msk.f32.vlgmr.msra.gmra.mrb[8].mxu1 %vm65_vm0, %v943_v6 }
 0xae4   :  { %2214 = vmatpush3.bf16.msra.mxu0 %v2432_v12  ;;  %2217 = vmatpush3.bf16.msra.mxu1 %v2423_v9 }
 0xae5   :  { %2218 = vmatprep.subr.bf16.mxu1 %v2347_v0  ;;  %2102 = vmatprep.mubr.msk.f32.mxu1 %vm2349_vm1, %v2348_v4 }
 0xae6   :  { %2221 = vmatprep.subr.bf16.mxu0 %v2347_v0 }
 0xae8   :  { %2220 = vmatpush3.bf16.msra.mxu1 %v2436_v13 }
 0xae9   :  { %2227 = vmatprep.subr.bf16.mxu1 %v2347_v0 }
 0xbb2   :  { %v1017_v7 = vpop.f32.mrb[8].mxu0 }
 0xbb3   :  { %v1018_v8 = vadd.f32 %v2460_v16, %v1017_v7  ;;  %v2071_v10 = vpop.f32.mrb[9].mxu0 }
 0xbb5   :  { %1029 = vrot.lane.b32.xlu0 %v1018_v8, %s2350_s19  ;;  %v1021_v19 = vadd.f32 %v1863_v17, %v1018_v8 }
 0xbb6   :  { %v1123_v11 = vpop.f32.mrb[8].mxu1 }
 0xbb7   :  { %v1124_v14 = vadd.f32 %v2465_v18, %v1123_v11  ;;  %v2082_v15 = vpop.f32.mrb[9].mxu1  ;;  %v1865_v21 = vmul.f32 -1.442695, %v1021_v19 }
 0xbb9   :  { %1135 = vrot.lane.b32.xlu1 %v1124_v14, %s2350_s19  ;;  %v1127_v22 = vadd.f32 %v1867_v20, %v1124_v14  ;;  %2299 = vpow2.f32 %v1865_v21 }
 0xbbb   :  { %v1869_v23 = vmul.f32 -1.442695, %v1127_v22 }
 0xbbd   :  { %2301 = vpow2.f32 %v1869_v23 }
 0xbc3   :  { %v2300_v24 = vpop.eup %2299 }
 0xbc4   :  { %v1025_v25 = vadd.f32 1.0, %v2300_v24 }
 0xbc6   :  { %2303 = vrcp.f32 %v1025_v25 }
 0xbc7   :  { %v2302_v26 = vpop.eup %2301 }
 0xbc8   :  { %v1131_v27 = vadd.f32 1.0, %v2302_v26 }
 0xbca   :  { %2305 = vrcp.f32 %v1131_v27 }
 0xbd0   :  { %v2304_v28 = vpop.eup %2303 }
 0xbd1   :  { %v1039_v40 = vsub.f32 1.0, %v2304_v28  ;;  %v1045_v42 = vmul.f32 %v2304_v28, %v2618_v60  ;;  %v1875_v60 = vld [vmem:[%s2798_s1 + $0x10] sm:$0xff] }
 0xbd4   :  { %v2306_v31 = vpop.eup %2305 }
 0xbd5   :  { %v1145_v45 = vsub.f32 1.0, %v2306_v31  ;;  %v1151_v47 = vmul.f32 %v2306_v31, %v2623_v2 }
 0xc27   :  { %v1030_v29 = vpop.permute.xlu0 %1029 }
 0xc28   :  { %v1032_v30 = vmul.f32 %v2304_v28, %v1030_v29 }
 0xc2a   :  { %1034 = vrot.lane.b32.xlu0 %v1032_v30, %s2350_s19 }
 0xc2b   :  { %v1136_v32 = vpop.permute.xlu1 %1135 }
 0xc2c   :  { %v1138_v33 = vmul.f32 %v2306_v31, %v1136_v32 }
 0xc2e   :  { %1140 = vrot.lane.b32.xlu1 %v1138_v33, %s2350_s19 }
 0xc9c   :  { %v1035_v34 = vpop.permute.xlu0 %1034 }
 0xc9d   :  { %v1037_v35 = vadd.f32 %v1863_v17, %v1035_v34 }
 0xc9f   :  { %2307 = vtanh.f32 %v1037_v35 }
 0xca0   :  { %v1141_v36 = vpop.permute.xlu1 %1140 }
 0xca1   :  { %v1143_v37 = vadd.f32 %v1867_v20, %v1141_v36 }
 0xca3   :  { %2309 = vtanh.f32 %v1143_v37 }
 0xca9   :  { %v2308_v38 = vpop.eup %2307 }
 0xcaa   :  { %1041 = vrot.lane.b32.xlu0 %v2308_v38, %s2352_s23 }
 0xcad   :  { %v2310_v39 = vpop.eup %2309 }
 0xcae   :  { %1147 = vrot.lane.b32.xlu1 %v2310_v39, %s2352_s23 }
 0xd1c   :  { %v1042_v41 = vpop.permute.xlu0 %1041 }
 0xd1d   :  { %v1044_v43 = vmul.f32 %v1042_v41, %v1039_v40 }
 0xd1f   :  { %v2664_v44 = vadd.f32 %v1045_v42, %v1044_v43 }
 0xd20   :  { %v1148_v46 = vpop.permute.xlu1 %1147 }
 0xd21   :  { %v1150_v48 = vmul.f32 %v1148_v46, %v1145_v45  ;;  %1048 = vrot.lane.b32.xlu0 %v2664_v44, %s2352_s23 }
 0xd23   :  { %v2669_v49 = vadd.f32 %v1151_v47, %v1150_v48 }
 0xd25   :  { %1154 = vrot.lane.b32.xlu1 %v2669_v49, %s2352_s23 }
 0xd93   :  { %v1049_v50 = vpop.permute.xlu0 %1048 }
 0xd94   :  { %1866 = vst.msk [vmem:[%s2799_s6 + $0x20] sm:$0xff] %vm65_vm0, %v1049_v50  ;;  %2092 = vmatmul.mubr.msk.f32.vlgmr.msra.gmra.mrb[10].mxu0 %vm65_vm0, %v1049_v50 }
 0xd95   :  { %2223 = vmatpush3.bf16.msra.mxu0 %v2408_v5  ;;  %2113 = vmatprep.mubr.msk.f32.mxu0 %vm2349_vm1, %v2348_v4 }
 0xd96   :  { %2224 = vmatprep.subr.bf16.mxu0 %v2347_v0 }
 0xd97   :  { %v1155_v51 = vpop.permute.xlu1 %1154 }
 0xd98   :  { %1870 = vst.msk [vmem:[%s2800_s7 + $0x18] sm:$0xff] %vm65_vm0, %v1155_v51  ;;  %2103 = vmatmul.mubr.msk.f32.vlgmr.msra.gmra.mrb[10].mxu1 %vm65_vm0, %v1155_v51 }
 0xd99   :  { %2226 = vmatpush3.bf16.msra.mxu0 %v2432_v12  ;;  %2229 = vmatpush3.bf16.msra.mxu1 %v2423_v9 }
 0xd9a   :  { %2230 = vmatprep.subr.bf16.mxu1 %v2347_v0  ;;  %2124 = vmatprep.mubr.msk.f32.mxu1 %vm2349_vm1, %v2348_v4 }
 0xd9b   :  { %2233 = vmatprep.subr.bf16.mxu0 %v2347_v0 }
 0xd9d   :  { %2232 = vmatpush3.bf16.msra.mxu1 %v2436_v13 }
 0xd9e   :  { %2239 = vmatprep.subr.bf16.mxu1 %v2347_v0 }
 0xe67   :  { %v1229_v52 = vpop.f32.mrb[10].mxu0 }
 0xe68   :  { %v1230_v53 = vadd.f32 %v2460_v16, %v1229_v52  ;;  %v2093_v54 = vpop.f32.mrb[11].mxu0 }
 0xe6a   :  { %1241 = vrot.lane.b32.xlu0 %v1230_v53, %s2350_s19  ;;  %v1233_v59 = vadd.f32 %v1871_v58, %v1230_v53 }
 0xe6b   :  { %v1335_v55 = vpop.f32.mrb[10].mxu1 }
 0xe6c   :  { %v1336_v56 = vadd.f32 %v2465_v18, %v1335_v55  ;;  %v2104_v57 = vpop.f32.mrb[11].mxu1  ;;  %v1873_v61 = vmul.f32 -1.442695, %v1233_v59 }
 0xe6e   :  { %1347 = vrot.lane.b32.xlu1 %v1336_v56, %s2350_s19  ;;  %v1339_v62 = vadd.f32 %v1875_v60, %v1336_v56  ;;  %2311 = vpow2.f32 %v1873_v61 }
 0xe70   :  { %v1877_v63 = vmul.f32 -1.442695, %v1339_v62 }
 0xe72   :  { %2313 = vpow2.f32 %v1877_v63 }
 0xe78   :  { %v2312_v1 = vpop.eup %2311 }
 0xe79   :  { %v1237_v2 = vadd.f32 1.0, %v2312_v1 }
 0xe7b   :  { %2315 = vrcp.f32 %v1237_v2 }
 0xe7c   :  { %v2314_v3 = vpop.eup %2313 }
 0xe7d   :  { %v1343_v6 = vadd.f32 1.0, %v2314_v3 }
 0xe7f   :  { %2317 = vrcp.f32 %v1343_v6 }
 0xe85   :  { %v2316_v7 = vpop.eup %2315 }
 0xe86   :  { %v1251_v24 = vsub.f32 1.0, %v2316_v7  ;;  %v1257_v26 = vmul.f32 %v2316_v7, %v2664_v44 }
 0xe89   :  { %v2318_v11 = vpop.eup %2317 }
 0xe8a   :  { %v1357_v29 = vsub.f32 1.0, %v2318_v11  ;;  %v1363_v31 = vmul.f32 %v2318_v11, %v2669_v49 }
 0xedc   :  { %v1242_v8 = vpop.permute.xlu0 %1241 }
 0xedd   :  { %v1244_v10 = vmul.f32 %v2316_v7, %v1242_v8 }
 0xedf   :  { %1246 = vrot.lane.b32.xlu0 %v1244_v10, %s2350_s19 }
 0xee0   :  { %v1348_v14 = vpop.permute.xlu1 %1347 }
 0xee1   :  { %v1350_v15 = vmul.f32 %v2318_v11, %v1348_v14 }
 0xee3   :  { %1352 = vrot.lane.b32.xlu1 %v1350_v15, %s2350_s19 }
 0xf51   :  { %v1247_v17 = vpop.permute.xlu0 %1246 }
 0xf52   :  { %v1249_v19 = vadd.f32 %v1871_v58, %v1247_v17 }
 0xf54   :  { %2319 = vtanh.f32 %v1249_v19 }
 0xf55   :  { %v1353_v20 = vpop.permute.xlu1 %1352 }
 0xf56   :  { %v1355_v21 = vadd.f32 %v1875_v60, %v1353_v20  ;;  %v1887_v20 = vld [vmem:[%s2797_s0 + $0x38] sm:$0xff] }
 0xf58   :  { %2321 = vtanh.f32 %v1355_v21 }
 0xf5e   :  { %v2320_v22 = vpop.eup %2319 }
 0xf5f   :  { %1253 = vrot.lane.b32.xlu0 %v2320_v22, %s2352_s23  ;;  %v1689_v22 = vld [vmem:[%s2798_s1] sm:$0xff] }
 0xf62   :  { %v2322_v23 = vpop.eup %2321 }
 0xf63   :  { %1359 = vrot.lane.b32.xlu1 %v2322_v23, %s2352_s23 }
 0xfd1   :  { %v1254_v25 = vpop.permute.xlu0 %1253 }
 0xfd2   :  { %v1256_v27 = vmul.f32 %v1254_v25, %v1251_v24 }
 0xfd4   :  { %v2710_v28 = vadd.f32 %v1257_v26, %v1256_v27 }
 0xfd5   :  { %v1360_v30 = vpop.permute.xlu1 %1359 }
 0xfd6   :  { %v1362_v32 = vmul.f32 %v1360_v30, %v1357_v29  ;;  %1260 = vrot.lane.b32.xlu0 %v2710_v28, %s2352_s23 }
 0xfd8   :  { %v2715_v33 = vadd.f32 %v1363_v31, %v1362_v32 }
 0xfda   :  { %1366 = vrot.lane.b32.xlu1 %v2715_v33, %s2352_s23 }
0x1048   :  { %v1261_v34 = vpop.permute.xlu0 %1260 }
0x1049   :  { %1874 = vst.msk [vmem:[%s2799_s6 + $0x28] sm:$0xff] %vm65_vm0, %v1261_v34  ;;  %2114 = vmatmul.mubr.msk.f32.vlgmr.msra.gmra.mrb[12].mxu0 %vm65_vm0, %v1261_v34 }
0x104a   :  { %2235 = vmatpush3.bf16.msra.mxu0 %v2408_v5  ;;  %2135 = vmatprep.mubr.msk.f32.mxu0 %vm2349_vm1, %v2348_v4 }
0x104b   :  { %2236 = vmatprep.subr.bf16.mxu0 %v2347_v0 }
0x104c   :  { %v1367_v35 = vpop.permute.xlu1 %1366 }
0x104d   :  { %1878 = vst.msk [vmem:[%s2800_s7 + $0x10] sm:$0xff] %vm65_vm0, %v1367_v35  ;;  %2125 = vmatmul.mubr.msk.f32.vlgmr.msra.gmra.mrb[12].mxu1 %vm65_vm0, %v1367_v35 }
0x104e   :  { %2238 = vmatpush3.bf16.msra.mxu0 %v2432_v12  ;;  %2241 = vmatpush3.bf16.msra.mxu1 %v2423_v9 }
0x104f   :  { %2242 = vmatprep.subr.bf16.mxu1 %v2347_v0  ;;  %2146 = vmatprep.mubr.msk.f32.mxu1 %vm2349_vm1, %v2348_v4  ;;  %v1879_v0 = vld [vmem:[%s2797_s0 + $0x30] sm:$0xff]  ;;  %v1883_v4 = vld [vmem:[%s2798_s1 + $0x8] sm:$0xff] }
0x1052   :  { %2244 = vmatpush3.bf16.msra.mxu1 %v2436_v13 }
0x111c   :  { %v1441_v5 = vpop.f32.mrb[12].mxu0 }
0x111d   :  { %v1442_v36 = vadd.f32 %v2460_v16, %v1441_v5  ;;  %v2115_v37 = vpop.f32.mrb[13].mxu0 }
0x111f   :  { %1453 = vrot.lane.b32.xlu0 %v1442_v36, %s2350_s19  ;;  %v1445_v9 = vadd.f32 %v1879_v0, %v1442_v36 }
0x1120   :  { %v1547_v38 = vpop.f32.mrb[12].mxu1 }
0x1121   :  { %v1548_v39 = vadd.f32 %v2465_v18, %v1547_v38  ;;  %v2126_v40 = vpop.f32.mrb[13].mxu1  ;;  %v1881_v12 = vmul.f32 -1.442695, %v1445_v9 }
0x1123   :  { %1559 = vrot.lane.b32.xlu1 %v1548_v39, %s2350_s19  ;;  %v1551_v13 = vadd.f32 %v1883_v4, %v1548_v39  ;;  %2323 = vpow2.f32 %v1881_v12 }
0x1125   :  { %v1885_v41 = vmul.f32 -1.442695, %v1551_v13 }
0x1127   :  { %2325 = vpow2.f32 %v1885_v41 }
0x112d   :  { %v2324_v42 = vpop.eup %2323 }
0x112e   :  { %v1449_v43 = vadd.f32 1.0, %v2324_v42 }
0x1130   :  { %2327 = vrcp.f32 %v1449_v43 }
0x1131   :  { %v2326_v44 = vpop.eup %2325 }
0x1132   :  { %v1555_v45 = vadd.f32 1.0, %v2326_v44 }
0x1134   :  { %2329 = vrcp.f32 %v1555_v45 }
0x113a   :  { %v2328_v46 = vpop.eup %2327 }
0x113b   :  { %v1463_v58 = vsub.f32 1.0, %v2328_v46  ;;  %v1469_v60 = vmul.f32 %v2328_v46, %v2710_v28 }
0x113e   :  { %v2330_v49 = vpop.eup %2329 }
0x113f   :  { %v1569_v63 = vsub.f32 1.0, %v2330_v49  ;;  %v1575_v2 = vmul.f32 %v2330_v49, %v2715_v33 }
0x1191   :  { %v1454_v47 = vpop.permute.xlu0 %1453 }
0x1192   :  { %v1456_v48 = vmul.f32 %v2328_v46, %v1454_v47 }
0x1194   :  { %1458 = vrot.lane.b32.xlu0 %v1456_v48, %s2350_s19 }
0x1195   :  { %v1560_v50 = vpop.permute.xlu1 %1559 }
0x1196   :  { %v1562_v51 = vmul.f32 %v2330_v49, %v1560_v50 }
0x1198   :  { %1564 = vrot.lane.b32.xlu1 %v1562_v51, %s2350_s19 }
0x1206   :  { %v1459_v52 = vpop.permute.xlu0 %1458 }
0x1207   :  { %v1461_v53 = vadd.f32 %v1879_v0, %v1459_v52 }
0x1209   :  { %2331 = vtanh.f32 %v1461_v53 }
0x120a   :  { %v1565_v54 = vpop.permute.xlu1 %1564 }
0x120b   :  { %v1567_v55 = vadd.f32 %v1883_v4, %v1565_v54 }
0x120d   :  { %2333 = vtanh.f32 %v1567_v55 }
0x1213   :  { %v2332_v56 = vpop.eup %2331 }
0x1214   :  { %1465 = vrot.lane.b32.xlu0 %v2332_v56, %s2352_s23 }
0x1217   :  { %v2334_v57 = vpop.eup %2333 }
0x1218   :  { %1571 = vrot.lane.b32.xlu1 %v2334_v57, %s2352_s23 }
0x1286   :  { %v1466_v59 = vpop.permute.xlu0 %1465 }
0x1287   :  { %v1468_v61 = vmul.f32 %v1466_v59, %v1463_v58 }
0x1289   :  { %v1470_v62 = vadd.f32 %v1469_v60, %v1468_v61 }
0x128a   :  { %v1572_v1 = vpop.permute.xlu1 %1571 }
0x128b   :  { %v1574_v3 = vmul.f32 %v1572_v1, %v1569_v63  ;;  %1472 = vrot.lane.b32.xlu0 %v1470_v62, %s2352_s23 }
0x128d   :  { %v1576_v6 = vadd.f32 %v1575_v2, %v1574_v3 }
0x128f   :  { %1578 = vrot.lane.b32.xlu1 %v1576_v6, %s2352_s23 }
0x12fd   :  { %v1473_v7 = vpop.permute.xlu0 %1472 }
0x12fe   :  { %1882 = vst.msk [vmem:[%s2799_s6 + $0x30] sm:$0xff] %vm65_vm0, %v1473_v7  ;;  %2136 = vmatmul.mubr.msk.f32.vlgmr.msra.gmra.mrb[14].mxu0 %vm65_vm0, %v1473_v7 }
0x1301   :  { %v1579_v8 = vpop.permute.xlu1 %1578 }
0x1302   :  { %1886 = vst.msk [vmem:[%s2800_s7 + $0x8] sm:$0xff] %vm65_vm0, %v1579_v8  ;;  %2147 = vmatmul.mubr.msk.f32.vlgmr.msra.gmra.mrb[14].mxu1 %vm65_vm0, %v1579_v8 }
0x13d1   :  { %v1653_v10 = vpop.f32.mrb[14].mxu0 }
0x13d2   :  { %v1654_v11 = vadd.f32 %v2460_v16, %v1653_v10  ;;  %v2137_v14 = vpop.f32.mrb[15].mxu0 }
0x13d4   :  { %1665 = vrot.lane.b32.xlu0 %v1654_v11, %s2350_s19  ;;  %v1657_v21 = vadd.f32 %v1887_v20, %v1654_v11 }
0x13d5   :  { %v1758_v15 = vpop.f32.mrb[14].mxu1 }
0x13d6   :  { %v1759_v17 = vadd.f32 %v2465_v18, %v1758_v15  ;;  %v2148_v19 = vpop.f32.mrb[15].mxu1  ;;  %v1889_v23 = vmul.f32 -1.442695, %v1657_v21 }
0x13d8   :  { %1770 = vrot.lane.b32.xlu1 %v1759_v17, %s2350_s19  ;;  %v1762_v16 = vadd.f32 %v1759_v17, %v1689_v22  ;;  %2335 = vpow2.f32 %v1889_v23 }
0x13da   :  { %v1892_v24 = vmul.f32 -1.442695, %v1762_v16 }
0x13dc   :  { %2337 = vpow2.f32 %v1892_v24 }
0x13e2   :  { %v2336_v25 = vpop.eup %2335 }
0x13e3   :  { %v1661_v26 = vadd.f32 1.0, %v2336_v25 }
0x13e5   :  { %2339 = vrcp.f32 %v1661_v26 }
0x13e6   :  { %v2338_v18 = vpop.eup %2337 }
0x13e7   :  { %v1766_v27 = vadd.f32 1.0, %v2338_v18 }
0x13e9   :  { %2341 = vrcp.f32 %v1766_v27 }
0x13ef   :  { %v2340_v28 = vpop.eup %2339 }
0x13f0   :  { %v1675_v39 = vsub.f32 1.0, %v2340_v28  ;;  %v1681_v0 = vmul.f32 %v2340_v28, %v1470_v62 }
0x13f3   :  { %v2342_v31 = vpop.eup %2341 }
0x13f4   :  { %v1780_v12 = vsub.f32 1.0, %v2342_v31  ;;  %v1786_v41 = vmul.f32 %v2342_v31, %v1576_v6 }
0x1446   :  { %v1666_v29 = vpop.permute.xlu0 %1665 }
0x1447   :  { %v1668_v30 = vmul.f32 %v2340_v28, %v1666_v29 }
0x1449   :  { %1670 = vrot.lane.b32.xlu0 %v1668_v30, %s2350_s19 }
0x144a   :  { %v1771_v32 = vpop.permute.xlu1 %1770 }
0x144b   :  { %v1773_v33 = vmul.f32 %v2342_v31, %v1771_v32 }
0x144d   :  { %1775 = vrot.lane.b32.xlu1 %v1773_v33, %s2350_s19 }
0x14bb   :  { %v1671_v34 = vpop.permute.xlu0 %1670 }
0x14bc   :  { %v1673_v35 = vadd.f32 %v1887_v20, %v1671_v34 }
0x14be   :  { %2343 = vtanh.f32 %v1673_v35 }
0x14bf   :  { %v1776_v5 = vpop.permute.xlu1 %1775 }
0x14c0   :  { %v1778_v36 = vadd.f32 %v1776_v5, %v1689_v22 }
0x14c2   :  { %2345 = vtanh.f32 %v1778_v36 }
0x14c8   :  { %v2344_v37 = vpop.eup %2343 }
0x14c9   :  { %1677 = vrot.lane.b32.xlu0 %v2344_v37, %s2352_s23 }
0x14cc   :  { %v2346_v38 = vpop.eup %2345 }
0x14cd   :  { %1782 = vrot.lane.b32.xlu1 %v2346_v38, %s2352_s23 }
0x153b   :  { %v1678_v40 = vpop.permute.xlu0 %1677 }
0x153c   :  { %v1680_v9 = vmul.f32 %v1678_v40, %v1675_v39 }
0x153e   :  { %v1682_v4 = vadd.f32 %v1681_v0, %v1680_v9 }
0x153f   :  { %v1783_v13 = vpop.permute.xlu1 %1782 }
0x1540   :  { %v1785_v42 = vmul.f32 %v1783_v13, %v1780_v12  ;;  %1684 = vrot.lane.b32.xlu0 %v1682_v4, %s2352_s23 }
0x1542   :  { %v1787_v43 = vadd.f32 %v1786_v41, %v1785_v42 }
0x1544   :  { %1789 = vrot.lane.b32.xlu1 %v1787_v43, %s2352_s23 }
0x15b2   :  { %v1685_v44 = vpop.permute.xlu0 %1684 }
0x15b3   :  { %1890 = vst.msk [vmem:[%s2799_s6 + $0x38] sm:$0xff] %vm65_vm0, %v1685_v44  ;;  %1793 = vst.msk [vmem:[#allocation2] sm:$0xff] %vm65_vm0, %v1685_v44 }
0x15b6   :  { %v1790_v45 = vpop.permute.xlu1 %1789 }
0x15b7   :  { %1792 = vst.msk [vmem:[%s2800_s7] sm:$0xff] %vm65_vm0, %v1790_v45  ;;  %1794 = vst.msk [vmem:[#allocation3] sm:$0xff] %vm65_vm0, %v1790_v45 }

</bundles_post_ra>
